<compile_context>
chip_gen: v7x
topology: tpu7x:2x2x1
jax: 0.10.0
libtpu: 0.0.40
codegen_flags: <defaults>
</compile_context>

<pallas_src>
import jax
import jax.numpy as jnp
from jax.experimental import pallas as pl
from jax.experimental.pallas import tpu as pltpu


# --------------------------------------------------------------------------------------
# Pallas kernels
# --------------------------------------------------------------------------------------
def _conv_bias_kernel(p_ref, w_ref, b_ref, o_ref):
    # p_ref: (1, H*W, F) bf16 im2col patches for one batch element
    # w_ref: (F, Cpad)   bf16 conv weight (rows ordered (kh, kw, cin))
    # b_ref: (1, Cpad)   f32  conv bias
    # o_ref: (1, H, W, Cpad)  lane-dense output (Cpad multiple of 128)
    _, H, W, C = o_ref.shape
    y = jnp.dot(p_ref[0], w_ref[...], preferred_element_type=jnp.float32)
    y = y + b_ref[...]
    o_ref[0] = y.reshape(H, W, C).astype(o_ref.dtype)


def _conv_bias_frelu_kernel(p_ref, w_ref, b_ref, dw_ref, db_ref, o_ref, ypad_ref):
    # Fused: (KxK conv + folded BN) -> FReLU funnel (depthwise 3x3 + folded BN + max).
    # p_ref:    (1, H*W, F) bf16 im2col patches
    # w_ref:    (F, Cpad)   bf16 conv weight (BN scale folded)
    # b_ref:    (1, Cpad)   f32  conv bias (BN shift folded)
    # dw_ref:   (9, Cpad)   f32  depthwise 3x3 weight (BN scale folded)
    # db_ref:   (1, Cpad)   f32  depthwise bias (BN shift folded)
    # o_ref:    (1, H, W, Cpad)
    # ypad_ref: VMEM scratch (H+2, W+2, Cpad) f32 -- zero-padded conv output
    _, H, W, C = o_ref.shape

    # Single lane-dense MXU matmul, bf16 operands, f32 accumulation.
    y = jnp.dot(p_ref[0], w_ref[...], preferred_element_type=jnp.float32)
    y = (y + b_ref[...]).reshape(H, W, C)

    # FReLU funnel: zero padding handled entirely in VMEM (no HBM round-trip of y).
    ypad_ref[...] = jnp.zeros_like(ypad_ref)
    ypad_ref[1:H + 1, 1:W + 1, :] = y

    dw = dw_ref[...]
    z = jnp.zeros((H, W, C), jnp.float32)
    for k in range(9):                              # static unroll, pure VPU work
        kh, kw = k // 3, k % 3
        z = z + dw[k].reshape(1, 1, C) * ypad_ref[kh:kh + H, kw:kw + W, :]
    z = z + db_ref[...].reshape(1, 1, C)

    o_ref[0] = jnp.maximum(y, z).astype(o_ref.dtype)


# --------------------------------------------------------------------------------------
# Wrappers around pallas_call
# --------------------------------------------------------------------------------------
def _round_up(n, m):
    return ((n + m - 1) // m) * m


def _im2col(x_nhwc, k, pad):
    """(B,H,W,C) -> (B, H*W, k*k*C) patches, feature ordering = (kh, kw, c)."""
    B, H, W, C = x_nhwc.shape
    xp = jnp.pad(x_nhwc, ((0, 0), (pad, pad), (pad, pad), (0, 0)))
    cols = [xp[:, kh:kh + H, kw:kw + W, :] for kh in range(k) for kw in range(k)]
    return jnp.concatenate(cols, axis=-1).reshape(B, H * W, k * k * C)


def _prep_conv(x_nhwc, w, b):
    B, H, W, Cin = x_nhwc.shape
    Cout, _, K, _ = w.shape
    Cp = _round_up(Cout, 128)                                  # lane-dense output channels
    patches = _im2col(x_nhwc, K, K // 2).astype(jnp.bfloat16)  # bf16 MXU operand
    F = K * K * Cin
    w2 = jnp.transpose(w, (2, 3, 1, 0)).reshape(F, Cout)       # rows: (kh, kw, cin)
    w2 = jnp.pad(w2, ((0, 0), (0, Cp - Cout))).astype(jnp.bfloat16)
    b2 = jnp.pad(b, (0, Cp - Cout)).reshape(1, Cp).astype(jnp.float32)
    return patches, w2, b2, (B, H, W, F, Cout, Cp)


def conv_bias(x_nhwc, w, b):
    """Plain KxK 'same' conv + bias (used for the last conv of SFEB2)."""
    patches, w2, b2, (B, H, W, F, Cout, Cp) = _prep_conv(x_nhwc, w, b)
    out = pl.pallas_call(
        _conv_bias_kernel,
        out_shape=jax.ShapeDtypeStruct((B, H, W, Cp), jnp.float32),
        grid_spec=pltpu.PrefetchScalarGridSpec(
            num_scalar_prefetch=0,
            grid=(B,),
            in_specs=[
                pl.BlockSpec((1, H * W, F), lambda bi: (bi, 0, 0)),
                pl.BlockSpec((F, Cp), lambda bi: (0, 0)),
                pl.BlockSpec((1, Cp), lambda bi: (0, 0)),
            ],
            out_specs=pl.BlockSpec((1, H, W, Cp), lambda bi: (bi, 0, 0, 0)),
        ),
        compiler_params=pltpu.CompilerParams(dimension_semantics=("parallel",)),
    )(patches, w2, b2)
    return out[..., :Cout]


def conv_bn_frelu(x_nhwc, w, b, dw, db):
    """Fused: KxK 'same' conv (+ folded BN) -> FReLU (depthwise3x3 + folded BN + max)."""
    patches, w2, b2, (B, H, W, F, Cout, Cp) = _prep_conv(x_nhwc, w, b)
    dw2 = jnp.pad(dw.reshape(Cout, 9).T, ((0, 0), (0, Cp - Cout))).astype(jnp.float32)
    db2 = jnp.pad(db, (0, Cp - Cout)).reshape(1, Cp).astype(jnp.float32)
    out = pl.pallas_call(
        _conv_bias_frelu_kernel,
        out_shape=jax.ShapeDtypeStruct((B, H, W, Cp), jnp.float32),
        grid_spec=pltpu.PrefetchScalarGridSpec(
            num_scalar_prefetch=0,
            grid=(B,),
            in_specs=[
                pl.BlockSpec((1, H * W, F), lambda bi: (bi, 0, 0)),
                pl.BlockSpec((F, Cp), lambda bi: (0, 0)),
                pl.BlockSpec((1, Cp), lambda bi: (0, 0)),
                pl.BlockSpec((9, Cp), lambda bi: (0, 0)),
                pl.BlockSpec((1, Cp), lambda bi: (0, 0)),
            ],
            out_specs=pl.BlockSpec((1, H, W, Cp), lambda bi: (bi, 0, 0, 0)),
            scratch_shapes=[pltpu.VMEM((H + 2, W + 2, Cp), jnp.float32)],
        ),
        compiler_params=pltpu.CompilerParams(dimension_semantics=("parallel",)),
    )(patches, w2, b2, dw2, db2)
    return out[..., :Cout]


# --------------------------------------------------------------------------------------
# Feature_extract forward (Pallas) -- BN folded into the convs (inference mode)
# --------------------------------------------------------------------------------------
def _fold_bn(w, b, gamma, beta, mean, var, eps=1e-5):
    s = gamma / jnp.sqrt(var + eps)
    return w * s[:, None, None, None], s * (b - mean) + beta


def feature_extract_pallas(x_nchw, p):
    x = jnp.transpose(x_nchw, (0, 2, 3, 1)).astype(jnp.float32)   # NHWC

    def stage(x_in, cname, bname, fname):
        w, b = _fold_bn(p[f"{cname}_w"], p[f"{cname}_b"],
                        p[f"{bname}_g"], p[f"{bname}_be"], p[f"{bname}_m"], p[f"{bname}_v"])
        dw, db = _fold_bn(p[f"{fname}_w"], p[f"{fname}_b"],
                          p[f"{fname}_g"], p[f"{fname}_be"], p[f"{fname}_m"], p[f"{fname}_v"])
        return conv_bn_frelu(x_in, w, b, dw, db)

    h = stage(x, "c1", "bn1", "f1")          # Conv7x7 + BN + FReLU
    high = stage(h, "c2", "bn2", "f2")       # Conv3x3 + BN + FReLU  -> high_x
    g = stage(high, "c3", "bn3", "f3")       # Conv3x3 + BN + FReLU
    out = conv_bias(g, p["c4_w"], p["c4_b"])  # final Conv3x3        -> x

    return (jnp.transpose(high, (0, 3, 1, 2)),
            jnp.transpose(out, (0, 3, 1, 2)))


# --------------------------------------------------------------------------------------
# Pure-JAX reference (same eval-mode semantics) + parameter construction
# --------------------------------------------------------------------------------------
def _conv_ref(x, w, b, pad, groups=1):
    y = jax.lax.conv_general_dilated(
        x, w, window_strides=(1, 1), padding=((pad, pad), (pad, pad)),
        dimension_numbers=("NCHW", "OIHW", "NCHW"), feature_group_count=groups)
    return y + b[None, :, None, None]


def _bn_ref(x, g, be, m, v, eps=1e-5):
    s = g / jnp.sqrt(v + eps)
    return x * s[None, :, None, None] + (be - s * m)[None, :, None, None]


def _frelu_ref(x, p, name):
    c = x.shape[1]
    y = _conv_ref(x, p[f"{name}_w"], p[f"{name}_b"], pad=1, groups=c)
    y = _bn_ref(y, p[f"{name}_g"], p[f"{name}_be"], p[f"{name}_m"], p[f"{name}_v"])
    return jnp.maximum(x, y)


def feature_extract_ref(x, p):
    h = _conv_ref(x, p["c1_w"], p["c1_b"], pad=3)
    h = _bn_ref(h, p["bn1_g"], p["bn1_be"], p["bn1_m"], p["bn1_v"])
    h = _frelu_ref(h, p, "f1")
    h = _conv_ref(h, p["c2_w"], p["c2_b"], pad=1)
    h = _bn_ref(h, p["bn2_g"], p["bn2_be"], p["bn2_m"], p["bn2_v"])
    high = _frelu_ref(h, p, "f2")
    g = _conv_ref(high, p["c3_w"], p["c3_b"], pad=1)
    g = _bn_ref(g, p["bn3_g"], p["bn3_be"], p["bn3_m"], p["bn3_v"])
    g = _frelu_ref(g, p, "f3")
    out = _conv_ref(g, p["c4_w"], p["c4_b"], pad=1)
    return high, out


def make_params(key, in_ch, out_ch):
    c_half = out_ch // 2
    p = {}

    def take():
        nonlocal key
        key, sub = jax.random.split(key)
        return sub

    def conv_p(name, cout, cin, k):
        p[f"{name}_w"] = 0.1 * jax.random.normal(take(), (cout, cin, k, k), jnp.float32)
        p[f"{name}_b"] = 0.1 * jax.random.normal(take(), (cout,), jnp.float32)

    def bn_p(name, c):
        p[f"{name}_g"] = 1.0 + 0.1 * jax.random.normal(take(), (c,), jnp.float32)
        p[f"{name}_be"] = 0.1 * jax.random.normal(take(), (c,), jnp.float32)
        p[f"{name}_m"] = 0.1 * jax.random.normal(take(), (c,), jnp.float32)
        p[f"{name}_v"] = 0.5 + jnp.abs(0.5 * jax.random.normal(take(), (c,), jnp.float32))

    def frelu_p(name, c):
        p[f"{name}_w"] = 0.1 * jax.random.normal(take(), (c, 1, 3, 3), jnp.float32)
        p[f"{name}_b"] = 0.1 * jax.random.normal(take(), (c,), jnp.float32)
        bn_p(name, c)

    conv_p("c1", c_half, in_ch, 7); bn_p("bn1", c_half); frelu_p("f1", c_half)
    conv_p("c2", c_half, c_half, 3); bn_p("bn2", c_half); frelu_p("f2", c_half)
    conv_p("c3", out_ch, c_half, 3); bn_p("bn3", out_ch); frelu_p("f3", out_ch)
    conv_p("c4", out_ch, out_ch, 3)
    return p


# --------------------------------------------------------------------------------------
if __name__ == "__main__":
    B, IN_CH, H, W = 2, 4, 16, 16
    OUT_CH = 32

    root = jax.random.PRNGKey(0)
    k_x, k_p = jax.random.split(root)
    x = jax.random.normal(k_x, (B, IN_CH, H, W), dtype=jnp.float32)
    params = make_params(k_p, IN_CH, OUT_CH)

    fwd = jax.jit(feature_extract_pallas)
    high_x, out_x = fwd(x, params)
    high_x, out_x = jax.block_until_ready((high_x, out_x))

    assert high_x.shape == (B, OUT_CH // 2, H, W)
    assert out_x.shape == (B, OUT_CH, H, W)

    # Correctness check vs pure-JAX f32 reference (bf16 MXU operands -> loose tolerance).
    high_ref, out_ref = feature_extract_ref(x, params)
    for name, got, want in (("high_x", high_x, high_ref), ("x", out_x, out_ref)):
        err = float(jnp.max(jnp.abs(got - want)))
        scale = float(jnp.max(jnp.abs(want)))
        assert err <= 0.1 + 0.08 * scale, f"{name}: max abs err {err:.4f} (ref scale {scale:.4f})"

    print("KERNEL_OK")
</pallas_src>

<mosaic_0001>
module attributes {stable_mosaic.version = 11 : i64} {
  func.func @_conv_bias_frelu_kernel(%arg0: i32, %arg1: memref<1x256x196xbf16, #tpu.memory_space<vmem>>, %arg2: memref<196x128xbf16, #tpu.memory_space<vmem>>, %arg3: memref<1x128xf32, #tpu.memory_space<vmem>>, %arg4: memref<9x128xf32, #tpu.memory_space<vmem>>, %arg5: memref<1x128xf32, #tpu.memory_space<vmem>>, %arg6: memref<1x16x16x128xf32, #tpu.memory_space<vmem>>, %arg7: memref<18x18x128xf32, #tpu.memory_space<vmem>>) attributes {dimension_semantics = [#tpu.dimension_semantics<parallel>], iteration_bounds = array<i64: 2>, scalar_prefetch = 0 : i64, scratch_operands = 1 : i64, tpu.core_type = #tpu.core_type<tc>, window_params = [{transform_indices = @transform_0, window_bounds = array<i64: 1, 256, 196>}, {pipeline_mode = #tpu.pipeline_mode<synchronous>, transform_indices = @transform_1, window_bounds = array<i64: 196, 128>}, {pipeline_mode = #tpu.pipeline_mode<synchronous>, transform_indices = @transform_2, window_bounds = array<i64: 1, 128>}, {pipeline_mode = #tpu.pipeline_mode<synchronous>, transform_indices = @transform_3, window_bounds = array<i64: 9, 128>}, {pipeline_mode = #tpu.pipeline_mode<synchronous>, transform_indices = @transform_4, window_bounds = array<i64: 1, 128>}, {transform_indices = @transform_5, window_bounds = array<i64: 1, 16, 16, 128>}]} {
    %c0 = arith.constant 0 : index
    %c0_0 = arith.constant 0 : index
    %c0_1 = arith.constant 0 : index
    %0 = vector.load %arg1[%c0, %c0_0, %c0_1] : memref<1x256x196xbf16, #tpu.memory_space<vmem>>, vector<1x256x196xbf16>
    %1 = vector.shape_cast %0 : vector<1x256x196xbf16> to vector<256x196xbf16>
    %c0_2 = arith.constant 0 : index
    %c0_3 = arith.constant 0 : index
    %2 = vector.load %arg2[%c0_2, %c0_3] : memref<196x128xbf16, #tpu.memory_space<vmem>>, vector<196x128xbf16>
    %cst = arith.constant dense<0.000000e+00> : vector<256x128xf32>
    %3 = tpu.matmul %1, %2, %cst {dimension_numbers = #tpu.dot_dimension_numbers<[1], [0], [0], [1], [0, 0, 1, 1], [], []>} : vector<256x196xbf16>, vector<196x128xbf16>, vector<256x128xf32> -> vector<256x128xf32>
    %c0_4 = arith.constant 0 : index
    %c0_5 = arith.constant 0 : index
    %4 = vector.load %arg3[%c0_4, %c0_5] : memref<1x128xf32, #tpu.memory_space<vmem>>, vector<1x128xf32>
    %5 = vector.broadcast %4 : vector<1x128xf32> to vector<256x128xf32>
    %6 = arith.addf %3, %5 : vector<256x128xf32>
    %7 = vector.shape_cast %6 : vector<256x128xf32> to vector<16x16x128xf32>
    %cst_6 = arith.constant 0.000000e+00 : f32
    %8 = vector.broadcast %cst_6 : f32 to vector<18x18x128xf32>
    %c0_7 = arith.constant 0 : index
    %c0_8 = arith.constant 0 : index
    %c0_9 = arith.constant 0 : index
    %9 = vector.load %arg7[%c0_7, %c0_8, %c0_9] : memref<18x18x128xf32, #tpu.memory_space<vmem>>, vector<18x18x128xf32>
    tpu.vector_store %arg7[%c0_7, %c0_8, %c0_9], %8 {strides = array<i32>} : memref<18x18x128xf32, #tpu.memory_space<vmem>>, vector<18x18x128xf32>,
    %c1 = arith.constant 1 : index
    %c1_10 = arith.constant 1 : index
    %c0_11 = arith.constant 0 : index
    %10 = vector.load %arg7[%c1, %c1_10, %c0_11] : memref<18x18x128xf32, #tpu.memory_space<vmem>>, vector<16x16x128xf32>
    tpu.vector_store %arg7[%c1, %c1_10, %c0_11], %7 {strides = array<i32>} : memref<18x18x128xf32, #tpu.memory_space<vmem>>, vector<16x16x128xf32>,
    %c0_12 = arith.constant 0 : index
    %c0_13 = arith.constant 0 : index
    %11 = vector.load %arg4[%c0_12, %c0_13] : memref<9x128xf32, #tpu.memory_space<vmem>>, vector<9x128xf32>
    %cst_14 = arith.constant 0.000000e+00 : f32
    %12 = vector.broadcast %cst_14 : f32 to vector<16x16x128xf32>
    %13 = vector.extract_strided_slice %11 {offsets = [0, 0], sizes = [1, 128], strides = [1, 1]} : vector<9x128xf32> to vector<1x128xf32>
    %14 = vector.shape_cast %13 : vector<1x128xf32> to vector<128xf32>
    %15 = vector.shape_cast %14 : vector<128xf32> to vector<1x1x128xf32>
    %c0_15 = arith.constant 0 : index
    %c0_16 = arith.constant 0 : index
    %c0_17 = arith.constant 0 : index
    %16 = vector.load %arg7[%c0_15, %c0_16, %c0_17] : memref<18x18x128xf32, #tpu.memory_space<vmem>>, vector<16x16x128xf32>
    %17 = vector.broadcast %15 : vector<1x1x128xf32> to vector<16x16x128xf32>
    %18 = arith.mulf %17, %16 : vector<16x16x128xf32>
    %19 = arith.addf %12, %18 : vector<16x16x128xf32>
    %20 = vector.extract_strided_slice %11 {offsets = [1, 0], sizes = [1, 128], strides = [1, 1]} : vector<9x128xf32> to vector<1x128xf32>
    %21 = vector.shape_cast %20 : vector<1x128xf32> to vector<128xf32>
    %22 = vector.shape_cast %21 : vector<128xf32> to vector<1x1x128xf32>
    %c0_18 = arith.constant 0 : index
    %c1_19 = arith.constant 1 : index
    %c0_20 = arith.constant 0 : index
    %23 = vector.load %arg7[%c0_18, %c1_19, %c0_20] : memref<18x18x128xf32, #tpu.memory_space<vmem>>, vector<16x16x128xf32>
    %24 = vector.broadcast %22 : vector<1x1x128xf32> to vector<16x16x128xf32>
    %25 = arith.mulf %24, %23 : vector<16x16x128xf32>
    %26 = arith.addf %19, %25 : vector<16x16x128xf32>
    %27 = vector.extract_strided_slice %11 {offsets = [2, 0], sizes = [1, 128], strides = [1, 1]} : vector<9x128xf32> to vector<1x128xf32>
    %28 = vector.shape_cast %27 : vector<1x128xf32> to vector<128xf32>
    %29 = vector.shape_cast %28 : vector<128xf32> to vector<1x1x128xf32>
    %c0_21 = arith.constant 0 : index
    %c2 = arith.constant 2 : index
    %c0_22 = arith.constant 0 : index
    %30 = vector.load %arg7[%c0_21, %c2, %c0_22] : memref<18x18x128xf32, #tpu.memory_space<vmem>>, vector<16x16x128xf32>
    %31 = vector.broadcast %29 : vector<1x1x128xf32> to vector<16x16x128xf32>
    %32 = arith.mulf %31, %30 : vector<16x16x128xf32>
    %33 = arith.addf %26, %32 : vector<16x16x128xf32>
    %34 = vector.extract_strided_slice %11 {offsets = [3, 0], sizes = [1, 128], strides = [1, 1]} : vector<9x128xf32> to vector<1x128xf32>
    %35 = vector.shape_cast %34 : vector<1x128xf32> to vector<128xf32>
    %36 = vector.shape_cast %35 : vector<128xf32> to vector<1x1x128xf32>
    %c1_23 = arith.constant 1 : index
    %c0_24 = arith.constant 0 : index
    %c0_25 = arith.constant 0 : index
    %37 = vector.load %arg7[%c1_23, %c0_24, %c0_25] : memref<18x18x128xf32, #tpu.memory_space<vmem>>, vector<16x16x128xf32>
    %38 = vector.broadcast %36 : vector<1x1x128xf32> to vector<16x16x128xf32>
    %39 = arith.mulf %38, %37 : vector<16x16x128xf32>
    %40 = arith.addf %33, %39 : vector<16x16x128xf32>
    %41 = vector.extract_strided_slice %11 {offsets = [4, 0], sizes = [1, 128], strides = [1, 1]} : vector<9x128xf32> to vector<1x128xf32>
    %42 = vector.shape_cast %41 : vector<1x128xf32> to vector<128xf32>
    %43 = vector.shape_cast %42 : vector<128xf32> to vector<1x1x128xf32>
    %c1_26 = arith.constant 1 : index
    %c1_27 = arith.constant 1 : index
    %c0_28 = arith.constant 0 : index
    %44 = vector.load %arg7[%c1_26, %c1_27, %c0_28] : memref<18x18x128xf32, #tpu.memory_space<vmem>>, vector<16x16x128xf32>
    %45 = vector.broadcast %43 : vector<1x1x128xf32> to vector<16x16x128xf32>
    %46 = arith.mulf %45, %44 : vector<16x16x128xf32>
    %47 = arith.addf %40, %46 : vector<16x16x128xf32>
    %48 = vector.extract_strided_slice %11 {offsets = [5, 0], sizes = [1, 128], strides = [1, 1]} : vector<9x128xf32> to vector<1x128xf32>
    %49 = vector.shape_cast %48 : vector<1x128xf32> to vector<128xf32>
    %50 = vector.shape_cast %49 : vector<128xf32> to vector<1x1x128xf32>
    %c1_29 = arith.constant 1 : index
    %c2_30 = arith.constant 2 : index
    %c0_31 = arith.constant 0 : index
    %51 = vector.load %arg7[%c1_29, %c2_30, %c0_31] : memref<18x18x128xf32, #tpu.memory_space<vmem>>, vector<16x16x128xf32>
    %52 = vector.broadcast %50 : vector<1x1x128xf32> to vector<16x16x128xf32>
    %53 = arith.mulf %52, %51 : vector<16x16x128xf32>
    %54 = arith.addf %47, %53 : vector<16x16x128xf32>
    %55 = vector.extract_strided_slice %11 {offsets = [6, 0], sizes = [1, 128], strides = [1, 1]} : vector<9x128xf32> to vector<1x128xf32>
    %56 = vector.shape_cast %55 : vector<1x128xf32> to vector<128xf32>
    %57 = vector.shape_cast %56 : vector<128xf32> to vector<1x1x128xf32>
    %c2_32 = arith.constant 2 : index
    %c0_33 = arith.constant 0 : index
    %c0_34 = arith.constant 0 : index
    %58 = vector.load %arg7[%c2_32, %c0_33, %c0_34] : memref<18x18x128xf32, #tpu.memory_space<vmem>>, vector<16x16x128xf32>
    %59 = vector.broadcast %57 : vector<1x1x128xf32> to vector<16x16x128xf32>
    %60 = arith.mulf %59, %58 : vector<16x16x128xf32>
    %61 = arith.addf %54, %60 : vector<16x16x128xf32>
    %62 = vector.extract_strided_slice %11 {offsets = [7, 0], sizes = [1, 128], strides = [1, 1]} : vector<9x128xf32> to vector<1x128xf32>
    %63 = vector.shape_cast %62 : vector<1x128xf32> to vector<128xf32>
    %64 = vector.shape_cast %63 : vector<128xf32> to vector<1x1x128xf32>
    %c2_35 = arith.constant 2 : index
    %c1_36 = arith.constant 1 : index
    %c0_37 = arith.constant 0 : index
    %65 = vector.load %arg7[%c2_35, %c1_36, %c0_37] : memref<18x18x128xf32, #tpu.memory_space<vmem>>, vector<16x16x128xf32>
    %66 = vector.broadcast %64 : vector<1x1x128xf32> to vector<16x16x128xf32>
    %67 = arith.mulf %66, %65 : vector<16x16x128xf32>
    %68 = arith.addf %61, %67 : vector<16x16x128xf32>
    %69 = vector.extract_strided_slice %11 {offsets = [8, 0], sizes = [1, 128], strides = [1, 1]} : vector<9x128xf32> to vector<1x128xf32>
    %70 = vector.shape_cast %69 : vector<1x128xf32> to vector<128xf32>
    %71 = vector.shape_cast %70 : vector<128xf32> to vector<1x1x128xf32>
    %c2_38 = arith.constant 2 : index
    %c2_39 = arith.constant 2 : index
    %c0_40 = arith.constant 0 : index
    %72 = vector.load %arg7[%c2_38, %c2_39, %c0_40] : memref<18x18x128xf32, #tpu.memory_space<vmem>>, vector<16x16x128xf32>
    %73 = vector.broadcast %71 : vector<1x1x128xf32> to vector<16x16x128xf32>
    %74 = arith.mulf %73, %72 : vector<16x16x128xf32>
    %75 = arith.addf %68, %74 : vector<16x16x128xf32>
    %c0_41 = arith.constant 0 : index
    %c0_42 = arith.constant 0 : index
    %76 = vector.load %arg5[%c0_41, %c0_42] : memref<1x128xf32, #tpu.memory_space<vmem>>, vector<1x128xf32>
    %77 = vector.shape_cast %76 : vector<1x128xf32> to vector<1x1x128xf32>
    %78 = vector.broadcast %77 : vector<1x1x128xf32> to vector<16x16x128xf32>
    %79 = arith.addf %75, %78 : vector<16x16x128xf32>
    %80 = arith.maximumf %7, %79 : vector<16x16x128xf32>
    %c0_43 = arith.constant 0 : index
    %c0_44 = arith.constant 0 : index
    %c0_45 = arith.constant 0 : index
    %c0_46 = arith.constant 0 : index
    %81 = vector.load %arg6[%c0_43, %c0_44, %c0_45, %c0_46] : memref<1x16x16x128xf32, #tpu.memory_space<vmem>>, vector<1x16x16x128xf32>
    %82 = vector.shape_cast %81 : vector<1x16x16x128xf32> to vector<16x16x128xf32>
    %83 = vector.shape_cast %80 : vector<16x16x128xf32> to vector<1x16x16x128xf32>
    tpu.vector_store %arg6[%c0_43, %c0_44, %c0_45, %c0_46], %83 {strides = array<i32>} : memref<1x16x16x128xf32, #tpu.memory_space<vmem>>, vector<1x16x16x128xf32>,
    return
  }
  func.func @transform_0(%arg0: i32) -> (i32, i32, i32) {
    %c0_i32 = arith.constant 0 : i32
    %c0_i32_0 = arith.constant 0 : i32
    %c0_i32_1 = arith.constant 0 : i32
    return %arg0, %c0_i32, %c0_i32_0 : i32, i32, i32
  }
  func.func @transform_1(%arg0: i32) -> (i32, i32) {
    %c0_i32 = arith.constant 0 : i32
    %c0_i32_0 = arith.constant 0 : i32
    %c0_i32_1 = arith.constant 0 : i32
    return %c0_i32, %c0_i32_0 : i32, i32
  }
  func.func @transform_2(%arg0: i32) -> (i32, i32) {
    %c0_i32 = arith.constant 0 : i32
    %c0_i32_0 = arith.constant 0 : i32
    %c0_i32_1 = arith.constant 0 : i32
    return %c0_i32, %c0_i32_0 : i32, i32
  }
  func.func @transform_3(%arg0: i32) -> (i32, i32) {
    %c0_i32 = arith.constant 0 : i32
    %c0_i32_0 = arith.constant 0 : i32
    %c0_i32_1 = arith.constant 0 : i32
    return %c0_i32, %c0_i32_0 : i32, i32
  }
  func.func @transform_4(%arg0: i32) -> (i32, i32) {
    %c0_i32 = arith.constant 0 : i32
    %c0_i32_0 = arith.constant 0 : i32
    %c0_i32_1 = arith.constant 0 : i32
    return %c0_i32, %c0_i32_0 : i32, i32
  }
  func.func @transform_5(%arg0: i32) -> (i32, i32, i32, i32) {
    %c0_i32 = arith.constant 0 : i32
    %c0_i32_0 = arith.constant 0 : i32
    %c0_i32_1 = arith.constant 0 : i32
    %c0_i32_2 = arith.constant 0 : i32
    return %arg0, %c0_i32, %c0_i32_0, %c0_i32_1 : i32, i32, i32, i32
  }
}

module attributes {stable_mosaic.version = 11 : i64} {
  func.func @_conv_bias_frelu_kernel(%arg0: i32, %arg1: memref<1x256x144xbf16, #tpu.memory_space<vmem>>, %arg2: memref<144x128xbf16, #tpu.memory_space<vmem>>, %arg3: memref<1x128xf32, #tpu.memory_space<vmem>>, %arg4: memref<9x128xf32, #tpu.memory_space<vmem>>, %arg5: memref<1x128xf32, #tpu.memory_space<vmem>>, %arg6: memref<1x16x16x128xf32, #tpu.memory_space<vmem>>, %arg7: memref<18x18x128xf32, #tpu.memory_space<vmem>>) attributes {dimension_semantics = [#tpu.dimension_semantics<parallel>], iteration_bounds = array<i64: 2>, scalar_prefetch = 0 : i64, scratch_operands = 1 : i64, tpu.core_type = #tpu.core_type<tc>, window_params = [{transform_indices = @transform_0, window_bounds = array<i64: 1, 256, 144>}, {pipeline_mode = #tpu.pipeline_mode<synchronous>, transform_indices = @transform_1, window_bounds = array<i64: 144, 128>}, {pipeline_mode = #tpu.pipeline_mode<synchronous>, transform_indices = @transform_2, window_bounds = array<i64: 1, 128>}, {pipeline_mode = #tpu.pipeline_mode<synchronous>, transform_indices = @transform_3, window_bounds = array<i64: 9, 128>}, {pipeline_mode = #tpu.pipeline_mode<synchronous>, transform_indices = @transform_4, window_bounds = array<i64: 1, 128>}, {transform_indices = @transform_5, window_bounds = array<i64: 1, 16, 16, 128>}]} {
    %c0 = arith.constant 0 : index
    %c0_0 = arith.constant 0 : index
    %c0_1 = arith.constant 0 : index
    %0 = vector.load %arg1[%c0, %c0_0, %c0_1] : memref<1x256x144xbf16, #tpu.memory_space<vmem>>, vector<1x256x144xbf16>
    %1 = vector.shape_cast %0 : vector<1x256x144xbf16> to vector<256x144xbf16>
    %c0_2 = arith.constant 0 : index
    %c0_3 = arith.constant 0 : index
    %2 = vector.load %arg2[%c0_2, %c0_3] : memref<144x128xbf16, #tpu.memory_space<vmem>>, vector<144x128xbf16>
    %cst = arith.constant dense<0.000000e+00> : vector<256x128xf32>
    %3 = tpu.matmul %1, %2, %cst {dimension_numbers = #tpu.dot_dimension_numbers<[1], [0], [0], [1], [0, 0, 1, 1], [], []>} : vector<256x144xbf16>, vector<144x128xbf16>, vector<256x128xf32> -> vector<256x128xf32>
    %c0_4 = arith.constant 0 : index
    %c0_5 = arith.constant 0 : index
    %4 = vector.load %arg3[%c0_4, %c0_5] : memref<1x128xf32, #tpu.memory_space<vmem>>, vector<1x128xf32>
    %5 = vector.broadcast %4 : vector<1x128xf32> to vector<256x128xf32>
    %6 = arith.addf %3, %5 : vector<256x128xf32>
    %7 = vector.shape_cast %6 : vector<256x128xf32> to vector<16x16x128xf32>
    %cst_6 = arith.constant 0.000000e+00 : f32
    %8 = vector.broadcast %cst_6 : f32 to vector<18x18x128xf32>
    %c0_7 = arith.constant 0 : index
    %c0_8 = arith.constant 0 : index
    %c0_9 = arith.constant 0 : index
    %9 = vector.load %arg7[%c0_7, %c0_8, %c0_9] : memref<18x18x128xf32, #tpu.memory_space<vmem>>, vector<18x18x128xf32>
    tpu.vector_store %arg7[%c0_7, %c0_8, %c0_9], %8 {strides = array<i32>} : memref<18x18x128xf32, #tpu.memory_space<vmem>>, vector<18x18x128xf32>,
    %c1 = arith.constant 1 : index
    %c1_10 = arith.constant 1 : index
    %c0_11 = arith.constant 0 : index
    %10 = vector.load %arg7[%c1, %c1_10, %c0_11] : memref<18x18x128xf32, #tpu.memory_space<vmem>>, vector<16x16x128xf32>
    tpu.vector_store %arg7[%c1, %c1_10, %c0_11], %7 {strides = array<i32>} : memref<18x18x128xf32, #tpu.memory_space<vmem>>, vector<16x16x128xf32>,
    %c0_12 = arith.constant 0 : index
    %c0_13 = arith.constant 0 : index
    %11 = vector.load %arg4[%c0_12, %c0_13] : memref<9x128xf32, #tpu.memory_space<vmem>>, vector<9x128xf32>
    %cst_14 = arith.constant 0.000000e+00 : f32
    %12 = vector.broadcast %cst_14 : f32 to vector<16x16x128xf32>
    %13 = vector.extract_strided_slice %11 {offsets = [0, 0], sizes = [1, 128], strides = [1, 1]} : vector<9x128xf32> to vector<1x128xf32>
    %14 = vector.shape_cast %13 : vector<1x128xf32> to vector<128xf32>
    %15 = vector.shape_cast %14 : vector<128xf32> to vector<1x1x128xf32>
    %c0_15 = arith.constant 0 : index
    %c0_16 = arith.constant 0 : index
    %c0_17 = arith.constant 0 : index
    %16 = vector.load %arg7[%c0_15, %c0_16, %c0_17] : memref<18x18x128xf32, #tpu.memory_space<vmem>>, vector<16x16x128xf32>
    %17 = vector.broadcast %15 : vector<1x1x128xf32> to vector<16x16x128xf32>
    %18 = arith.mulf %17, %16 : vector<16x16x128xf32>
    %19 = arith.addf %12, %18 : vector<16x16x128xf32>
    %20 = vector.extract_strided_slice %11 {offsets = [1, 0], sizes = [1, 128], strides = [1, 1]} : vector<9x128xf32> to vector<1x128xf32>
    %21 = vector.shape_cast %20 : vector<1x128xf32> to vector<128xf32>
    %22 = vector.shape_cast %21 : vector<128xf32> to vector<1x1x128xf32>
    %c0_18 = arith.constant 0 : index
    %c1_19 = arith.constant 1 : index
    %c0_20 = arith.constant 0 : index
    %23 = vector.load %arg7[%c0_18, %c1_19, %c0_20] : memref<18x18x128xf32, #tpu.memory_space<vmem>>, vector<16x16x128xf32>
    %24 = vector.broadcast %22 : vector<1x1x128xf32> to vector<16x16x128xf32>
    %25 = arith.mulf %24, %23 : vector<16x16x128xf32>
    %26 = arith.addf %19, %25 : vector<16x16x128xf32>
    %27 = vector.extract_strided_slice %11 {offsets = [2, 0], sizes = [1, 128], strides = [1, 1]} : vector<9x128xf32> to vector<1x128xf32>
    %28 = vector.shape_cast %27 : vector<1x128xf32> to vector<128xf32>
    %29 = vector.shape_cast %28 : vector<128xf32> to vector<1x1x128xf32>
    %c0_21 = arith.constant 0 : index
    %c2 = arith.constant 2 : index
    %c0_22 = arith.constant 0 : index
    %30 = vector.load %arg7[%c0_21, %c2, %c0_22] : memref<18x18x128xf32, #tpu.memory_space<vmem>>, vector<16x16x128xf32>
    %31 = vector.broadcast %29 : vector<1x1x128xf32> to vector<16x16x128xf32>
    %32 = arith.mulf %31, %30 : vector<16x16x128xf32>
    %33 = arith.addf %26, %32 : vector<16x16x128xf32>
    %34 = vector.extract_strided_slice %11 {offsets = [3, 0], sizes = [1, 128], strides = [1, 1]} : vector<9x128xf32> to vector<1x128xf32>
    %35 = vector.shape_cast %34 : vector<1x128xf32> to vector<128xf32>
    %36 = vector.shape_cast %35 : vector<128xf32> to vector<1x1x128xf32>
    %c1_23 = arith.constant 1 : index
    %c0_24 = arith.constant 0 : index
    %c0_25 = arith.constant 0 : index
    %37 = vector.load %arg7[%c1_23, %c0_24, %c0_25] : memref<18x18x128xf32, #tpu.memory_space<vmem>>, vector<16x16x128xf32>
    %38 = vector.broadcast %36 : vector<1x1x128xf32> to vector<16x16x128xf32>
    %39 = arith.mulf %38, %37 : vector<16x16x128xf32>
    %40 = arith.addf %33, %39 : vector<16x16x128xf32>
    %41 = vector.extract_strided_slice %11 {offsets = [4, 0], sizes = [1, 128], strides = [1, 1]} : vector<9x128xf32> to vector<1x128xf32>
    %42 = vector.shape_cast %41 : vector<1x128xf32> to vector<128xf32>
    %43 = vector.shape_cast %42 : vector<128xf32> to vector<1x1x128xf32>
    %c1_26 = arith.constant 1 : index
    %c1_27 = arith.constant 1 : index
    %c0_28 = arith.constant 0 : index
    %44 = vector.load %arg7[%c1_26, %c1_27, %c0_28] : memref<18x18x128xf32, #tpu.memory_space<vmem>>, vector<16x16x128xf32>
    %45 = vector.broadcast %43 : vector<1x1x128xf32> to vector<16x16x128xf32>
    %46 = arith.mulf %45, %44 : vector<16x16x128xf32>
    %47 = arith.addf %40, %46 : vector<16x16x128xf32>
    %48 = vector.extract_strided_slice %11 {offsets = [5, 0], sizes = [1, 128], strides = [1, 1]} : vector<9x128xf32> to vector<1x128xf32>
    %49 = vector.shape_cast %48 : vector<1x128xf32> to vector<128xf32>
    %50 = vector.shape_cast %49 : vector<128xf32> to vector<1x1x128xf32>
    %c1_29 = arith.constant 1 : index
    %c2_30 = arith.constant 2 : index
    %c0_31 = arith.constant 0 : index
    %51 = vector.load %arg7[%c1_29, %c2_30, %c0_31] : memref<18x18x128xf32, #tpu.memory_space<vmem>>, vector<16x16x128xf32>
    %52 = vector.broadcast %50 : vector<1x1x128xf32> to vector<16x16x128xf32>
    %53 = arith.mulf %52, %51 : vector<16x16x128xf32>
    %54 = arith.addf %47, %53 : vector<16x16x128xf32>
    %55 = vector.extract_strided_slice %11 {offsets = [6, 0], sizes = [1, 128], strides = [1, 1]} : vector<9x128xf32> to vector<1x128xf32>
    %56 = vector.shape_cast %55 : vector<1x128xf32> to vector<128xf32>
    %57 = vector.shape_cast %56 : vector<128xf32> to vector<1x1x128xf32>
    %c2_32 = arith.constant 2 : index
    %c0_33 = arith.constant 0 : index
    %c0_34 = arith.constant 0 : index
    %58 = vector.load %arg7[%c2_32, %c0_33, %c0_34] : memref<18x18x128xf32, #tpu.memory_space<vmem>>, vector<16x16x128xf32>
    %59 = vector.broadcast %57 : vector<1x1x128xf32> to vector<16x16x128xf32>
    %60 = arith.mulf %59, %58 : vector<16x16x128xf32>
    %61 = arith.addf %54, %60 : vector<16x16x128xf32>
    %62 = vector.extract_strided_slice %11 {offsets = [7, 0], sizes = [1, 128], strides = [1, 1]} : vector<9x128xf32> to vector<1x128xf32>
    %63 = vector.shape_cast %62 : vector<1x128xf32> to vector<128xf32>
    %64 = vector.shape_cast %63 : vector<128xf32> to vector<1x1x128xf32>
    %c2_35 = arith.constant 2 : index
    %c1_36 = arith.constant 1 : index
    %c0_37 = arith.constant 0 : index
    %65 = vector.load %arg7[%c2_35, %c1_36, %c0_37] : memref<18x18x128xf32, #tpu.memory_space<vmem>>, vector<16x16x128xf32>
    %66 = vector.broadcast %64 : vector<1x1x128xf32> to vector<16x16x128xf32>
    %67 = arith.mulf %66, %65 : vector<16x16x128xf32>
    %68 = arith.addf %61, %67 : vector<16x16x128xf32>
    %69 = vector.extract_strided_slice %11 {offsets = [8, 0], sizes = [1, 128], strides = [1, 1]} : vector<9x128xf32> to vector<1x128xf32>
    %70 = vector.shape_cast %69 : vector<1x128xf32> to vector<128xf32>
    %71 = vector.shape_cast %70 : vector<128xf32> to vector<1x1x128xf32>
    %c2_38 = arith.constant 2 : index
    %c2_39 = arith.constant 2 : index
    %c0_40 = arith.constant 0 : index
    %72 = vector.load %arg7[%c2_38, %c2_39, %c0_40] : memref<18x18x128xf32, #tpu.memory_space<vmem>>, vector<16x16x128xf32>
    %73 = vector.broadcast %71 : vector<1x1x128xf32> to vector<16x16x128xf32>
    %74 = arith.mulf %73, %72 : vector<16x16x128xf32>
    %75 = arith.addf %68, %74 : vector<16x16x128xf32>
    %c0_41 = arith.constant 0 : index
    %c0_42 = arith.constant 0 : index
    %76 = vector.load %arg5[%c0_41, %c0_42] : memref<1x128xf32, #tpu.memory_space<vmem>>, vector<1x128xf32>
    %77 = vector.shape_cast %76 : vector<1x128xf32> to vector<1x1x128xf32>
    %78 = vector.broadcast %77 : vector<1x1x128xf32> to vector<16x16x128xf32>
    %79 = arith.addf %75, %78 : vector<16x16x128xf32>
    %80 = arith.maximumf %7, %79 : vector<16x16x128xf32>
    %c0_43 = arith.constant 0 : index
    %c0_44 = arith.constant 0 : index
    %c0_45 = arith.constant 0 : index
    %c0_46 = arith.constant 0 : index
    %81 = vector.load %arg6[%c0_43, %c0_44, %c0_45, %c0_46] : memref<1x16x16x128xf32, #tpu.memory_space<vmem>>, vector<1x16x16x128xf32>
    %82 = vector.shape_cast %81 : vector<1x16x16x128xf32> to vector<16x16x128xf32>
    %83 = vector.shape_cast %80 : vector<16x16x128xf32> to vector<1x16x16x128xf32>
    tpu.vector_store %arg6[%c0_43, %c0_44, %c0_45, %c0_46], %83 {strides = array<i32>} : memref<1x16x16x128xf32, #tpu.memory_space<vmem>>, vector<1x16x16x128xf32>,
    return
  }
  func.func @transform_0(%arg0: i32) -> (i32, i32, i32) {
    %c0_i32 = arith.constant 0 : i32
    %c0_i32_0 = arith.constant 0 : i32
    %c0_i32_1 = arith.constant 0 : i32
    return %arg0, %c0_i32, %c0_i32_0 : i32, i32, i32
  }
  func.func @transform_1(%arg0: i32) -> (i32, i32) {
    %c0_i32 = arith.constant 0 : i32
    %c0_i32_0 = arith.constant 0 : i32
    %c0_i32_1 = arith.constant 0 : i32
    return %c0_i32, %c0_i32_0 : i32, i32
  }
  func.func @transform_2(%arg0: i32) -> (i32, i32) {
    %c0_i32 = arith.constant 0 : i32
    %c0_i32_0 = arith.constant 0 : i32
    %c0_i32_1 = arith.constant 0 : i32
    return %c0_i32, %c0_i32_0 : i32, i32
  }
  func.func @transform_3(%arg0: i32) -> (i32, i32) {
    %c0_i32 = arith.constant 0 : i32
    %c0_i32_0 = arith.constant 0 : i32
    %c0_i32_1 = arith.constant 0 : i32
    return %c0_i32, %c0_i32_0 : i32, i32
  }
  func.func @transform_4(%arg0: i32) -> (i32, i32) {
    %c0_i32 = arith.constant 0 : i32
    %c0_i32_0 = arith.constant 0 : i32
    %c0_i32_1 = arith.constant 0 : i32
    return %c0_i32, %c0_i32_0 : i32, i32
  }
  func.func @transform_5(%arg0: i32) -> (i32, i32, i32, i32) {
    %c0_i32 = arith.constant 0 : i32
    %c0_i32_0 = arith.constant 0 : i32
    %c0_i32_1 = arith.constant 0 : i32
    %c0_i32_2 = arith.constant 0 : i32
    return %arg0, %c0_i32, %c0_i32_0, %c0_i32_1 : i32, i32, i32, i32
  }
}

module attributes {stable_mosaic.version = 11 : i64} {
  func.func @_conv_bias_kernel(%arg0: i32, %arg1: memref<1x256x288xbf16, #tpu.memory_space<vmem>>, %arg2: memref<288x128xbf16, #tpu.memory_space<vmem>>, %arg3: memref<1x128xf32, #tpu.memory_space<vmem>>, %arg4: memref<1x16x16x128xf32, #tpu.memory_space<vmem>>) attributes {dimension_semantics = [#tpu.dimension_semantics<parallel>], iteration_bounds = array<i64: 2>, scalar_prefetch = 0 : i64, scratch_operands = 0 : i64, tpu.core_type = #tpu.core_type<tc>, window_params = [{transform_indices = @transform_0, window_bounds = array<i64: 1, 256, 288>}, {pipeline_mode = #tpu.pipeline_mode<synchronous>, transform_indices = @transform_1, window_bounds = array<i64: 288, 128>}, {pipeline_mode = #tpu.pipeline_mode<synchronous>, transform_indices = @transform_2, window_bounds = array<i64: 1, 128>}, {transform_indices = @transform_3, window_bounds = array<i64: 1, 16, 16, 128>}]} {
    %c0 = arith.constant 0 : index
    %c0_0 = arith.constant 0 : index
    %c0_1 = arith.constant 0 : index
    %0 = vector.load %arg1[%c0, %c0_0, %c0_1] : memref<1x256x288xbf16, #tpu.memory_space<vmem>>, vector<1x256x288xbf16>
    %1 = vector.shape_cast %0 : vector<1x256x288xbf16> to vector<256x288xbf16>
    %c0_2 = arith.constant 0 : index
    %c0_3 = arith.constant 0 : index
    %2 = vector.load %arg2[%c0_2, %c0_3] : memref<288x128xbf16, #tpu.memory_space<vmem>>, vector<288x128xbf16>
    %cst = arith.constant dense<0.000000e+00> : vector<256x128xf32>
    %3 = tpu.matmul %1, %2, %cst {dimension_numbers = #tpu.dot_dimension_numbers<[1], [0], [0], [1], [0, 0, 1, 1], [], []>} : vector<256x288xbf16>, vector<288x128xbf16>, vector<256x128xf32> -> vector<256x128xf32>
    %c0_4 = arith.constant 0 : index
    %c0_5 = arith.constant 0 : index
    %4 = vector.load %arg3[%c0_4, %c0_5] : memref<1x128xf32, #tpu.memory_space<vmem>>, vector<1x128xf32>
    %5 = vector.broadcast %4 : vector<1x128xf32> to vector<256x128xf32>
    %6 = arith.addf %3, %5 : vector<256x128xf32>
    %7 = vector.shape_cast %6 : vector<256x128xf32> to vector<16x16x128xf32>
    %c0_6 = arith.constant 0 : index
    %c0_7 = arith.constant 0 : index
    %c0_8 = arith.constant 0 : index
    %c0_9 = arith.constant 0 : index
    %8 = vector.load %arg4[%c0_6, %c0_7, %c0_8, %c0_9] : memref<1x16x16x128xf32, #tpu.memory_space<vmem>>, vector<1x16x16x128xf32>
    %9 = vector.shape_cast %8 : vector<1x16x16x128xf32> to vector<16x16x128xf32>
    %10 = vector.shape_cast %7 : vector<16x16x128xf32> to vector<1x16x16x128xf32>
    tpu.vector_store %arg4[%c0_6, %c0_7, %c0_8, %c0_9], %10 {strides = array<i32>} : memref<1x16x16x128xf32, #tpu.memory_space<vmem>>, vector<1x16x16x128xf32>,
    return
  }
  func.func @transform_0(%arg0: i32) -> (i32, i32, i32) {
    %c0_i32 = arith.constant 0 : i32
    %c0_i32_0 = arith.constant 0 : i32
    %c0_i32_1 = arith.constant 0 : i32
    return %arg0, %c0_i32, %c0_i32_0 : i32, i32, i32
  }
  func.func @transform_1(%arg0: i32) -> (i32, i32) {
    %c0_i32 = arith.constant 0 : i32
    %c0_i32_0 = arith.constant 0 : i32
    %c0_i32_1 = arith.constant 0 : i32
    return %c0_i32, %c0_i32_0 : i32, i32
  }
  func.func @transform_2(%arg0: i32) -> (i32, i32) {
    %c0_i32 = arith.constant 0 : i32
    %c0_i32_0 = arith.constant 0 : i32
    %c0_i32_1 = arith.constant 0 : i32
    return %c0_i32, %c0_i32_0 : i32, i32
  }
  func.func @transform_3(%arg0: i32) -> (i32, i32, i32, i32) {
    %c0_i32 = arith.constant 0 : i32
    %c0_i32_0 = arith.constant 0 : i32
    %c0_i32_1 = arith.constant 0 : i32
    %c0_i32_2 = arith.constant 0 : i32
    return %arg0, %c0_i32, %c0_i32_0, %c0_i32_1 : i32, i32, i32, i32
  }
}

</mosaic_0001>

<bundles_post_ra>
// kernel: feature_extract_pallas.4
= control target key start
LH: loop header
LB: loop body
LE: loop exit
PB: predicated region body
PF: predicated region fallthrough
CT: control target
= control target key end

     0   :  { %s2091_s18 = smov 0   ;;  %s3246_s0 = inlined_call_operand.vmem [shape: bf16[2,256,196], index: 0, kind: input, shape index: {}]   ;;  %s3247_s1 = inlined_call_operand.vmem [shape: bf16[196,128], index: 1, kind: input, shape index: {}]   ;;  %s3248_s2 = inlined_call_operand.vmem [shape: f32[1,128], index: 2, kind: input, shape index: {}]   ;;  %s3249_s3 = inlined_call_operand.vmem [shape: f32[9,128], index: 3, kind: input, shape index: {}]   ;;  %s3250_s4 = inlined_call_operand.vmem [shape: f32[1,128], index: 4, kind: input, shape index: {}]   ;;  %s3251_s5 = inlined_call_operand.vmem [shape: f32[2,16,16,128], index: 5, kind: output, shape index: {}]  }
   0x1 LB: > { %s1871_s19 = sadd.s32 4294967295, %s2057_s18   ;;  %p1875_p0 = scmp.ge.s32.totalorder %s2057_s18, 1  ;;  %s2057_s18 = sphi %s2091_s18, %s15_s18  }
   0x2   : > { %p187_p1 = scmp.lt.s32.totalorder %s2057_s18, 3 }
   0x4   : > { %p188_p2 = pnand %p1875_p0, %p187_p1 }
   0x6   : > { %191 = sbr.rel (%p188_p2) target bundleno = 454 (0x1c6), region = 40 }
   0xd   : > { %v1984_v0 = vld [vmem:[%s3247_s1] sm:$0xff]   ;;  %v2059_v1 = vmov 0   ;;  %v1985_v2 = vld [vmem:[%s3247_s1 + $0x8] sm:$0xff]   ;;  %p215_p3 = scmp.lt.s32.totalorder %s1871_s19, 1  ;;  %v1986_v3 = vld [vmem:[%s3247_s1 + $0x10] sm:$0xff]   ;;  %vm509_vm0 = vcmask 556032   ;;  %v844_v48 = vlaneseq }
   0xe   : > { %562 = vmatprep.subr.bf16.mxu0 %v2059_v1  ;;  %1948 = vmatprep.subr.bf16.mxu1 %v2059_v1  ;;  %v1987_v4 = vld [vmem:[%s3247_s1 + $0x18] sm:$0xff]   ;;  %v1988_v6 = vld [vmem:[%s3247_s1 + $0x20] sm:$0xff]   ;;  %v1989_v8 = vld [vmem:[%s3247_s1 + $0x28] sm:$0xff]   ;;  %vm558_vm1 = vcmask 1041408   ;;  %v2060_v47 = vmov 0.0  }
   0xf   : > { %563 = vmatpush1.bf16.msra.mxu0 %v1984_v0  ;;  %1961 = vmatpush1.bf16.msra.mxu1 %v1984_v0  ;;  %s3390_s19 = smov (!%p215_p3, %s1871_s19), 1  ;;  %v1990_v9 = vld [vmem:[%s3247_s1 + $0x30] sm:$0xff]   ;;  %v1991_v10 = vld [vmem:[%s3247_s1 + $0x38] sm:$0xff]   ;;  %v1992_v11 = vld [vmem:[%s3247_s1 + $0x40] sm:$0xff]   ;;  %723 = vst [vmem:[#allocation2] sm:$0xff] %v2060_v47  ;;  %v845_v49 = vshrl.u32 %v844_v48, 7 }
  0x10   : > { %564 = vmatprep.subr.bf16.mxu0 %v2059_v1  ;;  %1949 = vmatprep.subr.bf16.mxu1 %v2059_v1  ;;  %s1946_s26 = sshll.u32 %s3390_s19, 8  ;;  %v1993_v12 = vld [vmem:[%s3247_s1 + $0x48] sm:$0xff]   ;;  %v1994_v13 = vld [vmem:[%s3247_s1 + $0x50] sm:$0xff]   ;;  %v1995_v14 = vld [vmem:[%s3247_s1 + $0x58] sm:$0xff]   ;;  %724 = vst [vmem:[#allocation2 + $0x8] sm:$0xff] %v2060_v47 }
  0x11   : > { %s2125_s6 = scalar_lea.vmem %s3246_s0, %s1946_s26  ;;  %v1996_v15 = vld [vmem:[%s3247_s1 + $0x60] ss:$0 sps:$4 sm:$0x33]   ;;  %726 = vst [vmem:[#allocation2 + $0x18] sm:$0xff] %v2060_v47  ;;  %727 = vst [vmem:[#allocation2 + $0x20] sm:$0xff] %v2060_v47  ;;  %v846_v50 = vsub.s32 0, %v845_v49  ;;  %s2547_s13 = scalar_lea.vmem %s3251_s5, %s1946_s26 }
  0x12   : > { %v1999_v5 = vld [vmem:[%s2125_s6 + $0x4] ss:$8 sps:$4 sm:$0xff]   ;;  %v560_v16 = vsel %vm558_vm1, %v1996_v15, 0  ;;  %v1997_v17 = vld [vmem:[%s2125_s6] ss:$8 sps:$4 sm:$0xff]   ;;  %729 = vst [vmem:[#allocation2 + $0x30] sm:$0xff] %v2060_v47 }
  0x13   : > { %565 = vmatpush1.bf16.msra.mxu0 %v1985_v2  ;;  %1962 = vmatpush1.bf16.msra.mxu1 %v1985_v2  ;;  %v2002_v7 = vld [vmem:[%s2125_s6 + $0x84] ss:$8 sps:$4 sm:$0xff]   ;;  %v2000_v18 = vld [vmem:[%s2125_s6 + $0x80] ss:$8 sps:$4 sm:$0xff]   ;;  %v2003_v19 = vld [vmem:[%s2125_s6 + $0x14] ss:$8 sps:$4 sm:$0xff]  }
  0x14   : > { %566 = vmatprep.subr.bf16.mxu0 %v2059_v1  ;;  %1950 = vmatprep.subr.bf16.mxu1 %v2059_v1  ;;  %v2005_v20 = vld [vmem:[%s2125_s6 + $0x94] ss:$8 sps:$4 sm:$0xff]   ;;  %v2007_v21 = vld [vmem:[%s2125_s6 + $0x10] ss:$8 sps:$4 sm:$0xff]   ;;  %v2009_v23 = vld [vmem:[%s2125_s6 + $0x24] ss:$8 sps:$4 sm:$0xff]  }
  0x15   : > { %1926 = vmatprep.mubr.msk.bf16.mxu0 %vm509_vm0, %v1999_v5  ;;  %1934 = vmatprep.mubr.msk.bf16.mxu1 %vm509_vm0, %v2002_v7  ;;  %v2008_v22 = vld [vmem:[%s2125_s6 + $0x90] ss:$8 sps:$4 sm:$0xff]   ;;  %v2011_v24 = vld [vmem:[%s2125_s6 + $0xa4] ss:$8 sps:$4 sm:$0xff]   ;;  %v2013_v25 = vld [vmem:[%s2125_s6 + $0x20] ss:$8 sps:$4 sm:$0xff]  }
  0x16   : > { %v2014_v26 = vld [vmem:[%s2125_s6 + $0xa0] ss:$8 sps:$4 sm:$0xff]   ;;  %v2015_v27 = vld [vmem:[%s2125_s6 + $0x34] ss:$8 sps:$4 sm:$0xff]   ;;  %v2019_v29 = vld [vmem:[%s2125_s6 + $0x30] ss:$8 sps:$4 sm:$0xff]  }
  0x17   : > { %567 = vmatpush1.bf16.msra.mxu0 %v1986_v3  ;;  %1963 = vmatpush1.bf16.msra.mxu1 %v1986_v3  ;;  %v2017_v28 = vld [vmem:[%s2125_s6 + $0xb4] ss:$8 sps:$4 sm:$0xff]   ;;  %v2020_v30 = vld [vmem:[%s2125_s6 + $0xb0] ss:$8 sps:$4 sm:$0xff]   ;;  %v2021_v31 = vld [vmem:[%s2125_s6 + $0x44] ss:$8 sps:$4 sm:$0xff]  }
  0x18   : > { %568 = vmatprep.subr.bf16.mxu0 %v2059_v1  ;;  %1951 = vmatprep.subr.bf16.mxu1 %v2059_v1  ;;  %v2023_v32 = vld [vmem:[%s2125_s6 + $0xc4] ss:$8 sps:$4 sm:$0xff]   ;;  %v2025_v33 = vld [vmem:[%s2125_s6 + $0x40] ss:$8 sps:$4 sm:$0xff]   ;;  %v2027_v35 = vld [vmem:[%s2125_s6 + $0x54] ss:$8 sps:$4 sm:$0xff]  }
  0x19   : > { %v2026_v34 = vld [vmem:[%s2125_s6 + $0xc0] ss:$8 sps:$4 sm:$0xff]   ;;  %v2029_v36 = vld [vmem:[%s2125_s6 + $0xd4] ss:$8 sps:$4 sm:$0xff]   ;;  %v2031_v37 = vld [vmem:[%s2125_s6 + $0x50] ss:$8 sps:$4 sm:$0xff]  }
  0x1a   : > { %v2032_v38 = vld [vmem:[%s2125_s6 + $0xd0] ss:$8 sps:$4 sm:$0xff]   ;;  %v2033_v39 = vld [vmem:[%s2125_s6 + $0x64] ss:$8 sps:$4 sm:$0xff]   ;;  %v2037_v41 = vld [vmem:[%s2125_s6 + $0x60] ss:$8 sps:$4 sm:$0xff]  }
  0x1b   : > { %569 = vmatpush1.bf16.msra.mxu0 %v1987_v4  ;;  %1964 = vmatpush1.bf16.msra.mxu1 %v1987_v4  ;;  %v2035_v40 = vld [vmem:[%s2125_s6 + $0xe4] ss:$8 sps:$4 sm:$0xff]   ;;  %v2038_v42 = vld [vmem:[%s2125_s6 + $0xe0] ss:$8 sps:$4 sm:$0xff]   ;;  %v2039_v43 = vld [vmem:[%s2125_s6 + $0x74] ss:$8 sps:$4 sm:$0xff]  }
  0x1c   : > { %570 = vmatprep.subr.bf16.mxu0 %v2059_v1  ;;  %1952 = vmatprep.subr.bf16.mxu1 %v2059_v1  ;;  %v2041_v44 = vld [vmem:[%s2125_s6 + $0xf4] ss:$8 sps:$4 sm:$0xff]   ;;  %v2043_v45 = vld [vmem:[%s2125_s6 + $0x70] ss:$8 sps:$4 sm:$0xff]   ;;  %725 = vst [vmem:[#allocation2 + $0x10] sm:$0x3] %v2060_v47 }
  0x1d   : > { %v2044_v46 = vld [vmem:[%s2125_s6 + $0xf0] ss:$8 sps:$4 sm:$0xff]   ;;  %728 = vst [vmem:[#allocation2 + $0x28] sm:$0x3] %v2060_v47  ;;  %730 = vst [vmem:[#allocation2 + $0x38] sm:$0xff] %v2060_v47  ;;  %v946_v51 = vsub.s32 1, %v845_v49 }
  0x1e   : > { %731 = vst [vmem:[#allocation2 + $0x40] sm:$0x3] %v2060_v47  ;;  %732 = vst [vmem:[#allocation2 + $0x48] sm:$0xff] %v2060_v47  ;;  %v810_v52 = vld [vmem:[%s3249_s3] sm:$0xff]  ;;  %v1046_v54 = vsub.s32 2, %v845_v49  ;;  %v1246_v3 = vsub.s32 4, %v845_v49 }
  0x1f   : > { %571 = vmatpush1.bf16.msra.mxu0 %v1988_v6  ;;  %1965 = vmatpush1.bf16.msra.mxu1 %v1988_v6  ;;  %733 = vst [vmem:[#allocation2 + $0x50] sm:$0xff] %v2060_v47  ;;  %734 = vst [vmem:[#allocation2 + $0x58] sm:$0x3] %v2060_v47  ;;  %v2225_v53 = vrot.slane %v810_v52, %v846_v50  ;;  %v912_v55 = vld [vmem:[#allocation2 + $0x1] sm:$0xff]  ;;  %v2227_v56 = vrot.slane %v810_v52, %v946_v51  ;;  %v2232_v58 = vld [vmem:[%s3248_s2] ss:$0 sm:$0xff] }
  0x20   : > { %572 = vmatprep.subr.bf16.mxu0 %v2059_v1  ;;  %1953 = vmatprep.subr.bf16.mxu1 %v2059_v1  ;;  %735 = vst [vmem:[#allocation2 + $0x60] sm:$0xff] %v2060_v47  ;;  %736 = vst [vmem:[#allocation2 + $0x68] sm:$0xff] %v2060_v47  ;;  %v2236_v61 = vrot.slane %v810_v52, %v1046_v54  ;;  %v1012_v63 = vld [vmem:[#allocation2 + $0x2] sm:$0xff]  ;;  %v1346_v15 = vsub.s32 5, %v845_v49 }
  0x21   : > { %737 = vst [vmem:[#allocation2 + $0x70] sm:$0x3] %v2060_v47  ;;  %738 = vst [vmem:[#allocation2 + $0x78] sm:$0xff] %v2060_v47  ;;  %v848_v59 = vmul.f32 0.0, %v2225_v53  ;;  %v948_v60 = vmul.f32 %v2227_v56, %v912_v55 }
  0x22   : > { %739 = vst [vmem:[#allocation2 + $0x80] sm:$0xff] %v2060_v47  ;;  %740 = vst [vmem:[#allocation2 + $0x88] sm:$0x3] %v2060_v47 }
  0x23   : > { %573 = vmatpush1.bf16.msra.mxu0 %v1989_v8  ;;  %1966 = vmatpush1.bf16.msra.mxu1 %v1989_v8  ;;  %741 = vst [vmem:[#allocation2 + $0x90] sm:$0xff] %v2060_v47  ;;  %742 = vst [vmem:[#allocation2 + $0x98] sm:$0xff] %v2060_v47  ;;  %v913_v57 = vld [vmem:[#allocation2 + $0x9] sm:$0xff]  ;;  %v1146_v8 = vsub.s32 3, %v845_v49 }
  0x24   : > { %574 = vmatprep.subr.bf16.mxu0 %v2059_v1  ;;  %1954 = vmatprep.subr.bf16.mxu1 %v2059_v1  ;;  %743 = vst [vmem:[#allocation2 + $0xa0] sm:$0x3] %v2060_v47  ;;  %744 = vst [vmem:[#allocation2 + $0xa8] sm:$0xff] %v2060_v47  ;;  %v1013_v7 = vld [vmem:[#allocation2 + $0xa] sm:$0xff] }
  0x25   : > { %745 = vst [vmem:[#allocation2 + $0xb0] sm:$0xff] %v2060_v47  ;;  %746 = vst [vmem:[#allocation2 + $0xb8] sm:$0x3] %v2060_v47 }
  0x26   : > { %747 = vst [vmem:[#allocation2 + $0xc0] sm:$0xff] %v2060_v47  ;;  %748 = vst [vmem:[#allocation2 + $0xc8] sm:$0xff] %v2060_v47 }
  0x27   : > { %575 = vmatpush1.bf16.msra.mxu0 %v1990_v9  ;;  %1967 = vmatpush1.bf16.msra.mxu1 %v1990_v9  ;;  %749 = vst [vmem:[#allocation2 + $0xd0] sm:$0x3] %v2060_v47  ;;  %750 = vst [vmem:[#allocation2 + $0xd8] sm:$0xff] %v2060_v47  ;;  %v1547_v9 = vsub.s32 7, %v845_v49 }
  0x28   : > { %576 = vmatprep.subr.bf16.mxu0 %v2059_v1  ;;  %1955 = vmatprep.subr.bf16.mxu1 %v2059_v1  ;;  %751 = vst [vmem:[#allocation2 + $0xe0] sm:$0xff] %v2060_v47  ;;  %752 = vst [vmem:[#allocation2 + $0xe8] sm:$0x3] %v2060_v47 }
  0x29   : > { %753 = vst [vmem:[#allocation2 + $0xf0] sm:$0xff] %v2060_v47  ;;  %754 = vst [vmem:[#allocation2 + $0xf8] sm:$0xff] %v2060_v47 }
  0x2a   : > { %755 = vst [vmem:[#allocation2 + $0x100] sm:$0x3] %v2060_v47  ;;  %756 = vst [vmem:[#allocation2 + $0x108] sm:$0xff] %v2060_v47 }
  0x2b   : > { %577 = vmatpush1.bf16.msra.mxu0 %v1991_v10  ;;  %1968 = vmatpush1.bf16.msra.mxu1 %v1991_v10  ;;  %757 = vst [vmem:[#allocation2 + $0x110] sm:$0xff] %v2060_v47  ;;  %758 = vst [vmem:[#allocation2 + $0x118] sm:$0x3] %v2060_v47 }
  0x2c   : > { %578 = vmatprep.subr.bf16.mxu0 %v2059_v1  ;;  %1956 = vmatprep.subr.bf16.mxu1 %v2059_v1  ;;  %759 = vst [vmem:[#allocation2 + $0x120] sm:$0xff] %v2060_v47  ;;  %760 = vst [vmem:[#allocation2 + $0x128] sm:$0xff] %v2060_v47 }
  0x2d   : > { %761 = vst [vmem:[#allocation2 + $0x130] sm:$0x3] %v2060_v47  ;;  %762 = vst [vmem:[#allocation2 + $0x138] sm:$0xff] %v2060_v47 }
  0x2e   : > { %763 = vst [vmem:[#allocation2 + $0x140] sm:$0xff] %v2060_v47  ;;  %764 = vst [vmem:[#allocation2 + $0x148] sm:$0x3] %v2060_v47 }
  0x2f   : > { %579 = vmatpush1.bf16.msra.mxu0 %v1992_v11  ;;  %1969 = vmatpush1.bf16.msra.mxu1 %v1992_v11  ;;  %765 = vst [vmem:[#allocation2 + $0x150] sm:$0xff] %v2060_v47  ;;  %766 = vst [vmem:[#allocation2 + $0x158] sm:$0xff] %v2060_v47 }
  0x30   : > { %580 = vmatprep.subr.bf16.mxu0 %v2059_v1  ;;  %1957 = vmatprep.subr.bf16.mxu1 %v2059_v1  ;;  %767 = vst [vmem:[#allocation2 + $0x160] sm:$0x3] %v2060_v47  ;;  %768 = vst [vmem:[#allocation2 + $0x168] sm:$0xff] %v2060_v47 }
  0x31   : > { %769 = vst [vmem:[#allocation2 + $0x170] sm:$0xff] %v2060_v47  ;;  %770 = vst [vmem:[#allocation2 + $0x178] sm:$0x3] %v2060_v47 }
  0x32   : > { %771 = vst [vmem:[#allocation2 + $0x180] sm:$0xff] %v2060_v47  ;;  %772 = vst [vmem:[#allocation2 + $0x188] sm:$0xff] %v2060_v47 }
  0x33   : > { %581 = vmatpush1.bf16.msra.mxu0 %v1993_v12  ;;  %1970 = vmatpush1.bf16.msra.mxu1 %v1993_v12  ;;  %773 = vst [vmem:[#allocation2 + $0x190] sm:$0x3] %v2060_v47  ;;  %774 = vst [vmem:[#allocation2 + $0x198] sm:$0xff] %v2060_v47  ;;  %v980_v12 = vadd.f32 %v948_v60, %v848_v59 }
  0x34   : > { %582 = vmatprep.subr.bf16.mxu0 %v2059_v1  ;;  %1958 = vmatprep.subr.bf16.mxu1 %v2059_v1  ;;  %775 = vst [vmem:[#allocation2 + $0x1a0] sm:$0xff] %v2060_v47  ;;  %776 = vst [vmem:[#allocation2 + $0x1a8] sm:$0x3] %v2060_v47 }
  0x35   : > { %3277 = vst [vmem:[#allocation3_spill] sm:$0xff] %v2232_v58 }
  0x37   : > { %583 = vmatpush1.bf16.msra.mxu0 %v1994_v13  ;;  %1971 = vmatpush1.bf16.msra.mxu1 %v1994_v13  ;;  %v1048_v13 = vmul.f32 %v2236_v61, %v1012_v63 }
  0x38   : > { %584 = vmatprep.subr.bf16.mxu0 %v2059_v1  ;;  %1959 = vmatprep.subr.bf16.mxu1 %v2059_v1 }
  0x3b   : > { %585 = vmatpush1.bf16.msra.mxu0 %v1995_v14  ;;  %1972 = vmatpush1.bf16.msra.mxu1 %v1995_v14  ;;  %v1447_v14 = vsub.s32 6, %v845_v49 }
  0x3c   : > { %586 = vmatprep.subr.bf16.mxu0 %v2059_v1  ;;  %1960 = vmatprep.subr.bf16.mxu1 %v2059_v1  ;;  %v949_v1 = vmul.f32 %v2227_v56, %v913_v57 }
  0x3f   : > { %587 = vmatpush1.bf16.msra.mxu0 %v560_v16  ;;  %1973 = vmatpush1.bf16.msra.mxu1 %v560_v16 }
  0x42   : > { %595 = vmatmul.mubr.bf16.vlgmr.msra.gmra.mrb[0].mxu0 %v1997_v17  ;;  %659 = vmatmul.mubr.bf16.vlgmr.msra.gmra.mrb[0].mxu1 %v2000_v18 }
  0x43   : > { %1927 = vmatprep.mubr.msk.bf16.mxu0 %vm509_vm0, %v2003_v19  ;;  %1935 = vmatprep.mubr.msk.bf16.mxu1 %vm509_vm0, %v2005_v20  ;;  %v981_v19 = vadd.f32 %v949_v1, %v848_v59  ;;  %v1049_v20 = vmul.f32 %v2236_v61, %v1013_v7 }
  0x4a   : > { %603 = vmatmul.mubr.bf16.gmra.mrb[4].mxu0 %v2007_v21  ;;  %667 = vmatmul.mubr.bf16.gmra.mrb[4].mxu1 %v2008_v22  ;;  %v2250_v22 = vrot.slane %v810_v52, %v1246_v3 }
  0x4b   : > { %1928 = vmatprep.mubr.msk.bf16.mxu0 %vm509_vm0, %v2009_v23  ;;  %1936 = vmatprep.mubr.msk.bf16.mxu1 %vm509_vm0, %v2011_v24  ;;  %v2252_v23 = vrot.slane %v810_v52, %v1547_v9  ;;  %v2255_v24 = vrot.slane %v810_v52, %v1146_v8 }
  0x4c   : > { %3278 = vst [vmem:[#allocation4_spill] sm:$0xff] %v2250_v22 }
  0x4d   : > { %3279 = vst [vmem:[#allocation5_spill] sm:$0xff] %v2252_v23 }
  0x52   : > { %611 = vmatmul.mubr.bf16.gmra.mrb[8].mxu0 %v2013_v25  ;;  %675 = vmatmul.mubr.bf16.gmra.mrb[8].mxu1 %v2014_v26  ;;  %v1080_v25 = vadd.f32 %v1048_v13, %v980_v12  ;;  %v2257_v26 = vrot.slane %v810_v52, %v1447_v14 }
  0x53   : > { %1929 = vmatprep.mubr.msk.bf16.mxu0 %vm509_vm0, %v2015_v27  ;;  %1937 = vmatprep.mubr.msk.bf16.mxu1 %vm509_vm0, %v2017_v28  ;;  %v1081_v27 = vadd.f32 %v1049_v20, %v981_v19  ;;  %v2259_v28 = vrot.slane %v810_v52, %v1346_v15 }
  0x5a   : > { %619 = vmatmul.mubr.bf16.gmra.mrb[12].mxu0 %v2019_v29  ;;  %683 = vmatmul.mubr.bf16.gmra.mrb[12].mxu1 %v2020_v30 }
  0x5b   : > { %1930 = vmatprep.mubr.msk.bf16.mxu0 %vm509_vm0, %v2021_v31  ;;  %1938 = vmatprep.mubr.msk.bf16.mxu1 %vm509_vm0, %v2023_v32 }
  0x62   : > { %627 = vmatmul.mubr.bf16.gmra.mrb[16].mxu0 %v2025_v33  ;;  %691 = vmatmul.mubr.bf16.gmra.mrb[16].mxu1 %v2026_v34 }
  0x63   : > { %1931 = vmatprep.mubr.msk.bf16.mxu0 %vm509_vm0, %v2027_v35  ;;  %1939 = vmatprep.mubr.msk.bf16.mxu1 %vm509_vm0, %v2029_v36 }
  0x6a   : > { %635 = vmatmul.mubr.bf16.gmra.mrb[20].mxu0 %v2031_v37  ;;  %699 = vmatmul.mubr.bf16.gmra.mrb[20].mxu1 %v2032_v38 }
  0x6b   : > { %1932 = vmatprep.mubr.msk.bf16.mxu0 %vm509_vm0, %v2033_v39  ;;  %1940 = vmatprep.mubr.msk.bf16.mxu1 %vm509_vm0, %v2035_v40 }
  0x72   : > { %643 = vmatmul.mubr.bf16.gmra.mrb[24].mxu0 %v2037_v41  ;;  %707 = vmatmul.mubr.bf16.gmra.mrb[24].mxu1 %v2038_v42 }
  0x73   : > { %1933 = vmatprep.mubr.msk.bf16.mxu0 %vm509_vm0, %v2039_v43  ;;  %1941 = vmatprep.mubr.msk.bf16.mxu1 %vm509_vm0, %v2041_v44 }
  0x7a   : > { %651 = vmatmul.mubr.bf16.gmra.mrb[28].mxu0 %v2043_v45  ;;  %715 = vmatmul.mubr.bf16.gmra.mrb[28].mxu1 %v2044_v46 }
 0x115   : > { %v596_v62 = vpop.f32.mrb[0].mxu0  ;;  %v660_v0 = vpop.f32.mrb[0].mxu1 }
 0x116   : > { %v2240_v2 = vadd.f32 %v2232_v58, %v596_v62  ;;  %v661_v4 = vadd.f32 %v2232_v58, %v660_v0  ;;  %v598_v5 = vpop.f32.mrb[1].mxu0  ;;  %v662_v6 = vpop.f32.mrb[1].mxu1 }
 0x117   : > { %v599_v10 = vpop.f32.mrb[2].mxu0  ;;  %v663_v11 = vpop.f32.mrb[2].mxu1 }
 0x118   : > { %778 = vst [vmem:[#allocation2 + $0x19] sm:$0xff] %v2240_v2  ;;  %794 = vst [vmem:[#allocation2 + $0xd9] sm:$0xff] %v661_v4  ;;  %v601_v16 = vpop.f32.mrb[3].mxu0  ;;  %v665_v17 = vpop.f32.mrb[3].mxu1  ;;  %v2246_v18 = vadd.f32 %v2232_v58, %v599_v10  ;;  %v664_v21 = vadd.f32 %v2232_v58, %v663_v11  ;;  %v950_v31 = vmul.f32 %v2227_v56, %v2240_v2 }
 0x119   : > { %v1248_v32 = vmul.f32 %v2250_v22, %v2240_v2  ;;  %v966_v39 = vmul.f32 %v2227_v56, %v661_v4  ;;  %v2273_v40 = vmul.f32 %v2250_v22, %v661_v4  ;;  %v2276_v41 = vmul.f32 %v2252_v23, %v661_v4 }
 0x11a   : > { %779 = vst [vmem:[#allocation2 + $0x21] sm:$0xff] %v2246_v18  ;;  %795 = vst [vmem:[#allocation2 + $0xe1] sm:$0xff] %v664_v21  ;;  %v951_v42 = vmul.f32 %v2227_v56, %v2246_v18  ;;  %v1249_v48 = vmul.f32 %v2250_v22, %v2246_v18  ;;  %v967_v54 = vmul.f32 %v2227_v56, %v664_v21 }
 0x11b   : > { %3280 = vst [vmem:[#allocation6_spill] sm:$0xff] %v2273_v40  ;;  %3281 = vst [vmem:[#allocation7_spill] sm:$0xff] %v2276_v41  ;;  %v2299_v55 = vmul.f32 %v2250_v22, %v664_v21 }
 0x11d   : > { %v604_v29 = vpop.f32.mrb[4].mxu0  ;;  %v668_v30 = vpop.f32.mrb[4].mxu1  ;;  %3284 = vst [vmem:[#allocation10_spill] sm:$0xff] %v2299_v55 }
 0x11e   : > { %v2266_v33 = vadd.f32 %v2232_v58, %v604_v29  ;;  %v2269_v34 = vadd.f32 %v2232_v58, %v668_v30  ;;  %v606_v35 = vpop.f32.mrb[5].mxu0  ;;  %v670_v36 = vpop.f32.mrb[5].mxu1 }
 0x11f   : > { %v814_v37 = vld [vmem:[#allocation2 + $0x18] sm:$0xff]  ;;  %v2280_v43 = vpop.f32.mrb[6].mxu0  ;;  %v2282_v44 = vpop.f32.mrb[6].mxu1 }
 0x120   : > { %v830_v38 = vld [vmem:[#allocation2 + $0xd8] sm:$0xff]  ;;  %v850_v45 = vmul.f32 %v2225_v53, %v814_v37  ;;  %v1148_v46 = vmul.f32 %v2255_v24, %v814_v37  ;;  %780 = vst [vmem:[#allocation2 + $0x31] sm:$0xff] %v2266_v33  ;;  %796 = vst [vmem:[#allocation2 + $0xf1] sm:$0xff] %v2269_v34  ;;  %v609_v49 = vpop.f32.mrb[7].mxu0  ;;  %v673_v50 = vpop.f32.mrb[7].mxu1  ;;  %v952_v63 = vmul.f32 %v2227_v56, %v2266_v33 }
 0x121   : > { %v866_v47 = vmul.f32 %v2225_v53, %v830_v38  ;;  %v2292_v51 = vmul.f32 %v2255_v24, %v830_v38  ;;  %v2295_v52 = vmul.f32 %v2257_v26, %v830_v38  ;;  %v815_v59 = vld [vmem:[#allocation2 + $0x20] sm:$0xff]  ;;  %v1250_v0 = vmul.f32 %v2250_v22, %v2266_v33 }
 0x122   : > { %v1180_v57 = vadd.f32 %v1148_v46, %v1080_v25  ;;  %v1014_v60 = vld [vmem:[#allocation2 + $0x1a] sm:$0xff]  ;;  %v1015_v62 = vld [vmem:[#allocation2 + $0x22] sm:$0xff]  ;;  %v1549_v1 = vmul.f32 %v2252_v23, %v2266_v33  ;;  %v982_v3 = vadd.f32 %v950_v31, %v850_v45  ;;  %v851_v4 = vmul.f32 %v2225_v53, %v815_v59 }
 0x123   : > { %3282 = vst [vmem:[#allocation8_spill] sm:$0xff] %v2292_v51  ;;  %3283 = vst [vmem:[#allocation9_spill] sm:$0xff] %v2295_v52  ;;  %v1050_v5 = vmul.f32 %v2236_v61, %v1014_v60  ;;  %v1149_v6 = vmul.f32 %v2255_v24, %v815_v59  ;;  %v831_v7 = vld [vmem:[#allocation2 + $0xe0] sm:$0xff]  ;;  %v998_v11 = vadd.f32 %v966_v39, %v866_v47 }
 0x124   : > { %v1030_v8 = vld [vmem:[#allocation2 + $0xda] sm:$0xff]  ;;  %v1031_v9 = vld [vmem:[#allocation2 + $0xe2] sm:$0xff]  ;;  %v1280_v10 = vadd.f32 %v1248_v32, %v1180_v57  ;;  %v867_v12 = vmul.f32 %v2225_v53, %v831_v7  ;;  %v968_v13 = vmul.f32 %v2227_v56, %v2269_v34  ;;  %v983_v14 = vadd.f32 %v951_v42, %v851_v4 }
 0x125   : > { %v1181_v15 = vadd.f32 %v1149_v6, %v1081_v27  ;;  %v1348_v16 = vmul.f32 %v2259_v28, %v1014_v60  ;;  %v1066_v17 = vmul.f32 %v2236_v61, %v1030_v8  ;;  %v612_v19 = vpop.f32.mrb[8].mxu0  ;;  %v676_v20 = vpop.f32.mrb[8].mxu1  ;;  %v1051_v21 = vmul.f32 %v2236_v61, %v1015_v62  ;;  %v2321_v27 = vld [vmem:[%s3249_s3 + $0x8] ss:$0 sm:$0xff] }
 0x126   : > { %v1349_v25 = vmul.f32 %v2259_v28, %v1015_v62  ;;  %v999_v29 = vadd.f32 %v967_v54, %v867_v12  ;;  %v1067_v30 = vmul.f32 %v2236_v61, %v1031_v9  ;;  %v614_v31 = vpop.f32.mrb[9].mxu0  ;;  %v678_v32 = vpop.f32.mrb[9].mxu1  ;;  %v1082_v35 = vadd.f32 %v1050_v5, %v982_v3 }
 0x127   : > { %v1281_v36 = vadd.f32 %v1249_v48, %v1181_v15  ;;  %v1380_v37 = vadd.f32 %v1348_v16, %v1280_v10  ;;  %v2324_v38 = vmul.f32 %v2255_v24, %v831_v7  ;;  %v816_v39 = vld [vmem:[#allocation2 + $0x30] sm:$0xff]  ;;  %v615_v45 = vpop.f32.mrb[10].mxu0  ;;  %v679_v46 = vpop.f32.mrb[10].mxu1  ;;  %v2326_v47 = vadd.f32 %v1051_v21, %v983_v14 }
 0x128   : > { %v832_v42 = vld [vmem:[#allocation2 + $0xf0] sm:$0xff]  ;;  %v1098_v49 = vadd.f32 %v1066_v17, %v998_v11  ;;  %v2329_v50 = vmul.f32 %v2259_v28, %v1030_v8  ;;  %v852_v48 = vmul.f32 %v2225_v53, %v816_v39  ;;  %v617_v54 = vpop.f32.mrb[11].mxu0  ;;  %v681_v57 = vpop.f32.mrb[11].mxu1  ;;  %v2332_v59 = vadd.f32 %v1067_v30, %v999_v29 }
 0x129   : > { %3285 = vst [vmem:[#allocation11_spill] sm:$0xff] %v2324_v38  ;;  %v2335_v60 = vmul.f32 %v2259_v28, %v1031_v9  ;;  %v1150_v62 = vmul.f32 %v2255_v24, %v816_v39  ;;  %v1449_v3 = vmul.f32 %v2257_v26, %v816_v39  ;;  %v2339_v4 = vadd.f32 %v1349_v25, %v1281_v36 }
 0x12a   : > { %3286 = vst [vmem:[#allocation12_spill] sm:$0xff] %v2329_v50  ;;  %v2342_v5 = vmul.f32 %v2321_v27, %v1030_v8  ;;  %v868_v6 = vmul.f32 %v2225_v53, %v832_v42  ;;  %v1166_v7 = vmul.f32 %v2255_v24, %v832_v42  ;;  %v2346_v10 = vadd.f32 %v952_v63, %v852_v48 }
 0x12b   : > { %3287 = vst [vmem:[#allocation13_spill] sm:$0xff] %v2335_v60  ;;  %v1182_v11 = vadd.f32 %v1150_v62, %v1082_v35  ;;  %v1481_v12 = vadd.f32 %v1449_v3, %v1380_v37  ;;  %v1266_v9 = vmul.f32 %v2250_v22, %v2269_v34  ;;  %v2352_v15 = vadd.f32 %v2232_v58, %v2280_v43 }
 0x12c   : > { %3288 = vst [vmem:[#allocation14_spill] sm:$0xff] %v2342_v5  ;;  %v1198_v14 = vadd.f32 %v1166_v7, %v1098_v49  ;;  %v2356_v8 = vadd.f32 %v2232_v58, %v2282_v44  ;;  %v2359_v16 = vadd.f32 %v2232_v58, %v612_v19  ;;  %v2366_v21 = vadd.f32 %v2232_v58, %v676_v20  ;;  %v1428_v7 = vld [vmem:[#allocation2 + $0xe0] sm:$0xff] }
 0x12d   : > { %v2361_v17 = vadd.f32 %v1250_v0, %v1182_v11  ;;  %v2363_v63 = vadd.f32 %v1549_v1, %v1481_v12  ;;  %v2369_v25 = vadd.f32 %v2232_v58, %v615_v45  ;;  %v620_v29 = vpop.f32.mrb[12].mxu0  ;;  %v684_v43 = vpop.f32.mrb[12].mxu1  ;;  %v2371_v30 = vadd.f32 %v968_v13, %v868_v6  ;;  %781 = vst [vmem:[#allocation2 + $0x39] sm:$0xff] %v2352_v15  ;;  %v1528_v11 = vld [vmem:[#allocation2 + $0xe1] sm:$0xff] }
 0x12e   : > { %3289 = vst [vmem:[#allocation15_spill] sm:$0xff] %v2356_v8  ;;  %3290 = vst [vmem:[#allocation16_spill] sm:$0xff] %v2359_v16  ;;  %v2373_v31 = vadd.f32 %v1266_v9, %v1198_v14  ;;  %v2376_v44 = vmul.f32 %v2257_v26, %v832_v42  ;;  %v2380_v0 = vmul.f32 %v2252_v23, %v2269_v34  ;;  %v622_v1 = vpop.f32.mrb[13].mxu0  ;;  %v686_v19 = vpop.f32.mrb[13].mxu1  ;;  %v1628_v12 = vld [vmem:[#allocation2 + $0xe2] sm:$0xff] }
 0x12f   : > { %3291 = vst [vmem:[#allocation17_spill] sm:$0xff] %v2366_v21  ;;  %3292 = vst [vmem:[#allocation18_spill] sm:$0xff] %v2369_v25  ;;  %v953_v13 = vmul.f32 %v2227_v56, %v2352_v15  ;;  %v2389_v20 = vmul.f32 %v2250_v22, %v2352_v15  ;;  %v2393_v32 = vmul.f32 %v2252_v23, %v2352_v15  ;;  %v623_v36 = vpop.f32.mrb[14].mxu0  ;;  %v687_v37 = vpop.f32.mrb[14].mxu1 }
 0x130   : > { %3293 = vst [vmem:[#allocation19_spill] sm:$0xff] %v2376_v44  ;;  %3294 = vst [vmem:[#allocation20_spill] sm:$0xff] %v2380_v0  ;;  %v2397_v35 = vmul.f32 %v2227_v56, %v2356_v8  ;;  %v2403_v39 = vmul.f32 %v2250_v22, %v2356_v8  ;;  %v2407_v42 = vmul.f32 %v2252_v23, %v2356_v8  ;;  %v625_v48 = vpop.f32.mrb[15].mxu0  ;;  %v689_v54 = vpop.f32.mrb[15].mxu1 }
 0x131   : > { %797 = vst [vmem:[#allocation2 + $0xf9] sm:$0xff] %v2356_v8  ;;  %782 = vst [vmem:[#allocation2 + $0x49] sm:$0xff] %v2359_v16  ;;  %v2411_v45 = vmul.f32 %v2227_v56, %v2359_v16  ;;  %v2415_v49 = vmul.f32 %v2250_v22, %v2359_v16  ;;  %v2419_v57 = vmul.f32 %v2252_v23, %v2359_v16 }
 0x132   : > { %798 = vst [vmem:[#allocation2 + $0x109] sm:$0xff] %v2366_v21  ;;  %783 = vst [vmem:[#allocation2 + $0x51] sm:$0xff] %v2369_v25  ;;  %v2423_v62 = vmul.f32 %v2227_v56, %v2366_v21  ;;  %v2427_v3 = vmul.f32 %v2250_v22, %v2366_v21  ;;  %v2431_v6 = vmul.f32 %v2252_v23, %v2366_v21 }
 0x133   : > { %3295 = vst [vmem:[#allocation21_spill] sm:$0xff] %v2407_v42  ;;  %v2434_v9 = vadd.f32 %v2232_v58, %v679_v46  ;;  %v2437_v14 = vadd.f32 %v2232_v58, %v620_v29  ;;  %v2440_v1 = vadd.f32 %v2232_v58, %v684_v43  ;;  %v2443_v19 = vadd.f32 %v2232_v58, %v623_v36 }
 0x134   : > { %v2447_v48 = vmul.f32 %v2227_v56, %v2369_v25  ;;  %v2451_v54 = vmul.f32 %v2250_v22, %v2369_v25  ;;  %v2455_v46 = vmul.f32 %v2252_v23, %v2369_v25  ;;  %v2458_v29 = vadd.f32 %v2232_v58, %v687_v37  ;;  %v817_v0 = vld [vmem:[#allocation2 + $0x38] sm:$0xff] }
 0x135   : > { %3296 = vst [vmem:[#allocation22_spill] sm:$0xff] %v2434_v9  ;;  %3297 = vst [vmem:[#allocation23_spill] sm:$0xff] %v2437_v14  ;;  %v2463_v43 = vmul.f32 %v2227_v56, %v2434_v9  ;;  %v2469_v36 = vmul.f32 %v2257_v26, %v1428_v7  ;;  %v2472_v42 = vmul.f32 %v2252_v23, %v1528_v11  ;;  %v1016_v44 = vld [vmem:[#allocation2 + $0x32] sm:$0xff]  ;;  %v1017_v5 = vld [vmem:[#allocation2 + $0x3a] sm:$0xff] }
 0x136   : > { %3298 = vst [vmem:[#allocation24_spill] sm:$0xff] %v2458_v29  ;;  %799 = vst [vmem:[#allocation2 + $0x111] sm:$0xff] %v2434_v9  ;;  %v2475_v37 = vmul.f32 %v2321_v27, %v1628_v12  ;;  %v2479_v60 = vmul.f32 %v2250_v22, %v2434_v9  ;;  %v2483_v50 = vmul.f32 %v2252_v23, %v2434_v9  ;;  %v2494_v12 = vpop.f32.mrb[16].mxu0 }
 0x137   : > { %784 = vst [vmem:[#allocation2 + $0x61] sm:$0xff] %v2437_v14  ;;  %800 = vst [vmem:[#allocation2 + $0x121] sm:$0xff] %v2440_v1  ;;  %v2487_v7 = vmul.f32 %v2227_v56, %v2437_v14  ;;  %v2491_v11 = vmul.f32 %v2250_v22, %v2437_v14  ;;  %v2502_v55 = vmul.f32 %v2252_v23, %v2437_v14  ;;  %v630_v52 = vpop.f32.mrb[17].mxu0 }
 0x138   : > { %785 = vst [vmem:[#allocation2 + $0x69] sm:$0xff] %v2443_v19  ;;  %3299 = vst [vmem:[#allocation25_spill] sm:$0xff] %v2469_v36  ;;  %v1151_v36 = vmul.f32 %v2255_v24, %v817_v0  ;;  %v833_v41 = vld [vmem:[#allocation2 + $0xf8] sm:$0xff]  ;;  %v2506_v40 = vmul.f32 %v2227_v56, %v2440_v1  ;;  %v1052_v51 = vmul.f32 %v2236_v61, %v1016_v44  ;;  %v2517_v14 = vpop.f32.mrb[18].mxu0 }
 0x139   : > { %3300 = vst [vmem:[#allocation26_spill] sm:$0xff] %v2472_v42  ;;  %3301 = vst [vmem:[#allocation27_spill] sm:$0xff] %v2475_v37  ;;  %v2496_v37 = vpop.f32.mrb[16].mxu1  ;;  %v853_v42 = vmul.f32 %v2225_v53, %v817_v0  ;;  %v1450_v9 = vmul.f32 %v2257_v26, %v817_v0  ;;  %v1649_v21 = vmul.f32 %v2321_v27, %v1016_v44  ;;  %v1032_v25 = vld [vmem:[#allocation2 + $0xf2] sm:$0xff] }
 0x13a   : > { %801 = vst [vmem:[#allocation2 + $0x129] sm:$0xff] %v2458_v29  ;;  %3302 = vst [vmem:[#allocation28_spill] sm:$0xff] %v2494_v12  ;;  %v694_v38 = vpop.f32.mrb[17].mxu1  ;;  %v2515_v58 = vmul.f32 %v2250_v22, %v2440_v1  ;;  %v1053_v52 = vmul.f32 %v2236_v61, %v1017_v5  ;;  %v1350_v0 = vmul.f32 %v2259_v28, %v1016_v44  ;;  %v2527_v29 = vld [vmem:[%s3250_s4] ss:$0 sm:$0xff] }
 0x13b   : > { %3303 = vst [vmem:[#allocation29_spill] sm:$0xff] %v2496_v37  ;;  %3304 = vst [vmem:[#allocation30_spill] sm:$0xff] %v2502_v55  ;;  %v2511_v37 = vld [vmem:[#allocation2 + $0xfa] sm:$0xff]  ;;  %v2519_v12 = vpop.f32.mrb[18].mxu1  ;;  %v985_v16 = vadd.f32 %v953_v13, %v853_v42  ;;  %v1183_v38 = vadd.f32 %v1151_v36, %v2326_v47  ;;  %v633_v55 = vpop.f32.mrb[19].mxu0  ;;  %v1681_v13 = vadd.f32 %v1649_v21, %v2363_v63 }
 0x13c   : > { %3305 = vst [vmem:[#allocation31_spill] sm:$0xff] %v2515_v58  ;;  %3306 = vst [vmem:[#allocation32_spill] sm:$0xff] %v2517_v14  ;;  %v697_v22 = vpop.f32.mrb[19].mxu1  ;;  %v1351_v58 = vmul.f32 %v2259_v28, %v1017_v5  ;;  %v1482_v14 = vadd.f32 %v1450_v9, %v2339_v4  ;;  %v869_v42 = vmul.f32 %v2225_v53, %v833_v41 }
 0x13d   : > { %3307 = vst [vmem:[#allocation33_spill] sm:$0xff] %v2519_v12  ;;  %v1283_v47 = vadd.f32 %v2389_v20, %v1183_v38  ;;  %v1650_v44 = vmul.f32 %v2321_v27, %v1017_v5  ;;  %v1068_v36 = vmul.f32 %v2236_v61, %v1032_v25  ;;  %v1069_v12 = vmul.f32 %v2236_v61, %v2511_v37  ;;  %v2558_v23 = vpop.f32.mrb[20].mxu1 }
 0x13e   : > { %v1582_v55 = vadd.f32 %v2393_v32, %v1482_v14  ;;  %v1720_v22 = vadd.f32 %v2527_v29, %v1681_v13  ;;  %v1001_v8 = vadd.f32 %v2397_v35, %v869_v42  ;;  %v1167_v4 = vmul.f32 %v2255_v24, %v833_v41  ;;  %v818_v32 = vld [vmem:[#allocation2 + $0x48] sm:$0xff]  ;;  %v2556_v42 = vpop.f32.mrb[20].mxu0 }
 0x13f   : > { %v1084_v5 = vadd.f32 %v1052_v51, %v2346_v10  ;;  %v1085_v63 = vadd.f32 %v1053_v52, %v985_v16  ;;  %v1382_v21 = vadd.f32 %v1350_v0, %v2361_v17  ;;  %v1366_v20 = vmul.f32 %v2259_v28, %v1032_v25  ;;  %v834_v13 = vld [vmem:[#allocation2 + $0x108] sm:$0xff]  ;;  %v638_v17 = vpop.f32.mrb[21].mxu0  ;;  %v702_v52 = vpop.f32.mrb[21].mxu1 }
 0x140   : > { %v2552_v9 = vadd.f32 %v1351_v58, %v1283_v47  ;;  %v1682_v35 = vadd.f32 %v1650_v44, %v1582_v55  ;;  %v1752_v14 = vmax.f32 %v2240_v2, %v1720_v22  ;;  %v1199_v38 = vadd.f32 %v1167_v4, %v2332_v59  ;;  %v1018_v55 = vld [vmem:[#allocation2 + $0x4a] sm:$0xff] }
 0x141   : > { %v1100_v51 = vadd.f32 %v1068_v36, %v2371_v30  ;;  %v2561_v10 = vadd.f32 %v1069_v12, %v1001_v8  ;;  %v1367_v16 = vmul.f32 %v2259_v28, %v2511_v37  ;;  %v1398_v58 = vadd.f32 %v1366_v20, %v2373_v31  ;;  %v2573_v30 = vpop.f32.mrb[22].mxu0  ;;  %v2575_v8 = vpop.f32.mrb[22].mxu1 }
 0x142   : > { %v1721_v2 = vadd.f32 %v2527_v29, %v1682_v35  ;;  %1784 = vst [vmem:[%s2547_s13] sm:$0xff] %v1752_v14  ;;  %v2569_v59 = vmul.f32 %v2257_v26, %v833_v41  ;;  %v854_v0 = vmul.f32 %v2225_v53, %v818_v32  ;;  %v1152_v47 = vmul.f32 %v2255_v24, %v818_v32  ;;  %v819_v41 = vld [vmem:[#allocation2 + $0x50] sm:$0xff]  ;;  %v641_v22 = vpop.f32.mrb[23].mxu0  ;;  %v705_v4 = vpop.f32.mrb[23].mxu1 }
 0x143   : > { %3309 = vst [vmem:[#allocation35_spill] sm:$0xff] %v2575_v8  ;;  %v2578_v12 = vmul.f32 %v2321_v27, %v1032_v25  ;;  %v1451_v31 = vmul.f32 %v2257_v26, %v818_v32  ;;  %v1168_v44 = vmul.f32 %v2255_v24, %v834_v13  ;;  %v1467_v36 = vmul.f32 %v2257_v26, %v834_v13 }
 0x144   : > { %3308 = vst [vmem:[#allocation34_spill] sm:$0xff] %v2569_v59  ;;  %v1753_v20 = vmax.f32 %v2246_v18, %v1721_v2  ;;  %v1299_v35 = vadd.f32 %v2403_v39, %v1199_v38  ;;  %v1184_v14 = vadd.f32 %v1152_v47, %v1084_v5  ;;  %v870_v17 = vmul.f32 %v2225_v53, %v834_v13  ;;  %v1019_v59 = vld [vmem:[#allocation2 + $0x52] sm:$0xff] }
 0x145   : > { %3310 = vst [vmem:[#allocation36_spill] sm:$0xff] %v2578_v12  ;;  %v986_v25 = vadd.f32 %v2411_v45, %v854_v0  ;;  %v1483_v52 = vadd.f32 %v1451_v31, %v1382_v21  ;;  %v1200_v32 = vadd.f32 %v1168_v44, %v1100_v51  ;;  %v1499_v12 = vadd.f32 %v1467_v36, %v1398_v58  ;;  %v835_v13 = vld [vmem:[#allocation2 + $0x110] sm:$0xff]  ;;  %v2602_v0 = vpop.f32.mrb[24].mxu0  ;;  %v2604_v47 = vpop.f32.mrb[24].mxu1 }
 0x146   : > { %1785 = vst [vmem:[%s2547_s13 + $0x8] sm:$0xff] %v1753_v20  ;;  %v2590_v8 = vmul.f32 %v2321_v27, %v2511_v37  ;;  %v1284_v22 = vadd.f32 %v2415_v49, %v1184_v14  ;;  %v855_v18 = vmul.f32 %v2225_v53, %v819_v41  ;;  %v1054_v39 = vmul.f32 %v2236_v61, %v1018_v55  ;;  %v1034_v51 = vld [vmem:[#allocation2 + $0x10a] sm:$0xff]  ;;  %v646_v44 = vpop.f32.mrb[25].mxu0  ;;  %v710_v36 = vpop.f32.mrb[25].mxu1 }
 0x147   : > { %v1583_v5 = vadd.f32 %v2419_v57, %v1483_v52  ;;  %v1300_v38 = vadd.f32 %v2427_v3, %v1200_v32  ;;  %v1599_v45 = vadd.f32 %v2431_v6, %v1499_v12  ;;  %v1153_v21 = vmul.f32 %v2255_v24, %v819_v41  ;;  %3312 = vst [vmem:[#allocation38_spill] sm:$0xff] %v2604_v47  ;;  %v1035_v12 = vld [vmem:[#allocation2 + $0x112] sm:$0xff]  ;;  %v2612_v20 = vpop.f32.mrb[26].mxu0 }
 0x148   : > { %3311 = vst [vmem:[#allocation37_spill] sm:$0xff] %v2590_v8  ;;  %v1399_v58 = vadd.f32 %v1367_v16, %v1299_v35  ;;  %v1002_v37 = vadd.f32 %v2423_v62, %v870_v17  ;;  %v987_v2 = vadd.f32 %v2447_v48, %v855_v18  ;;  %v1055_v49 = vmul.f32 %v2236_v61, %v1019_v59  ;;  %v2614_v35 = vpop.f32.mrb[26].mxu1 }
 0x149   : > { %v1086_v57 = vadd.f32 %v1054_v39, %v986_v25  ;;  %v1185_v31 = vadd.f32 %v1153_v21, %v1085_v63  ;;  %v1452_v3 = vmul.f32 %v2257_v26, %v819_v41  ;;  %v1651_v6 = vmul.f32 %v2321_v27, %v1018_v55  ;;  %3313 = vst [vmem:[#allocation39_spill] sm:$0xff] %v2612_v20  ;;  %v649_v25 = vpop.f32.mrb[27].mxu0  ;;  %v713_v52 = vpop.f32.mrb[27].mxu1 }
 0x14a   : > { %v1352_v16 = vmul.f32 %v2259_v28, %v1018_v55  ;;  %v1353_v62 = vmul.f32 %v2259_v28, %v1019_v59  ;;  %v871_v48 = vmul.f32 %v2225_v53, %v835_v13  ;;  %v1070_v4 = vmul.f32 %v2236_v61, %v1034_v51  ;;  %3314 = vst [vmem:[#allocation40_spill] sm:$0xff] %v2614_v35  ;;  %v821_v25 = vld [vmem:[#allocation2 + $0x68] sm:$0xff] }
 0x14b   : > { %v1285_v63 = vadd.f32 %v2451_v54, %v1185_v31  ;;  %v1484_v41 = vadd.f32 %v1452_v3, %v2552_v9  ;;  %v1652_v14 = vmul.f32 %v2321_v27, %v1019_v59  ;;  %v1683_v17 = vadd.f32 %v1651_v6, %v1583_v5  ;;  %v820_v9 = vld [vmem:[#allocation2 + $0x60] sm:$0xff] }
 0x14c   : > { %v2619_v55 = vadd.f32 %v1055_v49, %v987_v2  ;;  %v1384_v32 = vadd.f32 %v1352_v16, %v1284_v22  ;;  %v1071_v18 = vmul.f32 %v2236_v61, %v1035_v12  ;;  %v1169_v39 = vmul.f32 %v2255_v24, %v835_v13  ;;  %v836_v2 = vld [vmem:[#allocation2 + $0x120] sm:$0xff] }
 0x14d   : > { %v1584_v21 = vadd.f32 %v2455_v46, %v1484_v41  ;;  %v1722_v44 = vadd.f32 %v2527_v29, %v1683_v17  ;;  %v1003_v54 = vadd.f32 %v2463_v43, %v871_v48  ;;  %v1102_v31 = vadd.f32 %v1070_v4, %v1002_v37  ;;  %v2639_v48 = vpop.f32.mrb[28].mxu1 }
 0x14e   : > { %v2626_v3 = vadd.f32 %v1353_v62, %v1285_v63  ;;  %v1201_v59 = vadd.f32 %v1169_v39, %v2561_v10  ;;  %v1368_v5 = vmul.f32 %v2259_v28, %v1034_v51  ;;  %v1468_v22 = vmul.f32 %v2257_v26, %v835_v13  ;;  %v2637_v10 = vpop.f32.mrb[28].mxu0  ;;  %3316 = vst [vmem:[#allocation42_spill] sm:$0xff] %v2639_v48  ;;  %v718_v41 = vpop.f32.mrb[29].mxu1 }
 0x14f   : > { %v1684_v49 = vadd.f32 %v1652_v14, %v1584_v21  ;;  %v1754_v6 = vmax.f32 %v2266_v33, %v1722_v44  ;;  %v1369_v46 = vmul.f32 %v2259_v28, %v1035_v12  ;;  %v1667_v36 = vmul.f32 %v2321_v27, %v1034_v51  ;;  %3315 = vst [vmem:[#allocation41_spill] sm:$0xff] %v2637_v10  ;;  %v654_v51 = vpop.f32.mrb[29].mxu0  ;;  %v2651_v39 = vpop.f32.mrb[30].mxu1 }
 0x150   : > { %v1301_v43 = vadd.f32 %v2479_v60, %v1201_v59  ;;  %v1500_v37 = vadd.f32 %v1468_v22, %v1399_v58  ;;  %v856_v16 = vmul.f32 %v2225_v53, %v820_v9  ;;  %v1154_v62 = vmul.f32 %v2255_v24, %v820_v9  ;;  %v2649_v52 = vpop.f32.mrb[30].mxu0  ;;  %3318 = vst [vmem:[#allocation44_spill] sm:$0xff] %v2651_v39  ;;  %v3322_v51 = vld [vmem:[#allocation31_spill] sm:$0xff] }
 0x151   : > { %v1723_v13 = vadd.f32 %v2527_v29, %v1684_v49  ;;  %1786 = vst [vmem:[%s2547_s13 + $0x10] sm:$0xff] %v1754_v6  ;;  %v1699_v4 = vadd.f32 %v1667_v36, %v1599_v45  ;;  %v1453_v33 = vmul.f32 %v2257_v26, %v820_v9  ;;  %v872_v63 = vmul.f32 %v2225_v53, %v836_v2 }
 0x152   : > { %v2645_v60 = vadd.f32 %v1071_v18, %v1003_v54  ;;  %v1400_v58 = vadd.f32 %v1368_v5, %v1300_v38  ;;  %v1600_v14 = vadd.f32 %v2483_v50, %v1500_v37  ;;  %v1668_v17 = vmul.f32 %v2321_v27, %v1035_v12  ;;  %3317 = vst [vmem:[#allocation43_spill] sm:$0xff] %v2649_v52  ;;  %v657_v18 = vpop.f32.mrb[31].mxu0  ;;  %v721_v54 = vpop.f32.mrb[31].mxu1  ;;  %v1020_v5 = vld [vmem:[#allocation2 + $0x62] sm:$0xff] }
 0x153   : > { %v1755_v45 = vmax.f32 %v2352_v15, %v1723_v13  ;;  %v2654_v21 = vadd.f32 %v1369_v46, %v1301_v43  ;;  %v1738_v44 = vadd.f32 %v2527_v29, %v1699_v4  ;;  %v1186_v9 = vadd.f32 %v1154_v62, %v1086_v57  ;;  %v1021_v57 = vld [vmem:[#allocation2 + $0x6a] sm:$0xff] }
 0x154   : > { %v1700_v38 = vadd.f32 %v1668_v17, %v1600_v14  ;;  %v1485_v50 = vadd.f32 %v1453_v33, %v1384_v32  ;;  %v1170_v59 = vmul.f32 %v2255_v24, %v836_v2  ;;  %v1469_v12 = vmul.f32 %v2257_v26, %v836_v2  ;;  %v3321_v13 = vld [vmem:[#allocation30_spill] sm:$0xff]  ;;  %v3323_v14 = vld [vmem:[#allocation4_spill] sm:$0xff] }
 0x155   : > { %1787 = vst [vmem:[%s2547_s13 + $0x18] sm:$0xff] %v1755_v45  ;;  %v1770_v22 = vmax.f32 %v2269_v34, %v1738_v44  ;;  %v988_v15 = vadd.f32 %v2487_v7, %v856_v16  ;;  %v1004_v49 = vadd.f32 %v2506_v40, %v872_v63  ;;  %v857_v6 = vmul.f32 %v2225_v53, %v821_v25  ;;  %v3319_v34 = vld [vmem:[#allocation5_spill] sm:$0xff]  ;;  %v3320_v16 = vld [vmem:[#allocation15_spill] sm:$0xff]  ;;  %v837_v63 = vld [vmem:[#allocation2 + $0x128] sm:$0xff] }
 0x156   : > { %v1739_v46 = vadd.f32 %v2527_v29, %v1700_v38  ;;  %v1202_v36 = vadd.f32 %v1170_v59, %v1102_v31  ;;  %v1501_v43 = vadd.f32 %v1469_v12, %v1400_v58  ;;  %v957_v32 = vmul.f32 %v2227_v56, %v2443_v19  ;;  %v1036_v45 = vld [vmem:[#allocation2 + $0x122] sm:$0xff]  ;;  %v1037_v12 = vld [vmem:[#allocation2 + $0x12a] sm:$0xff] }
 0x157   : > { %1802 = vst [vmem:[%s2547_s13 + $0x90] sm:$0xff] %v1770_v22  ;;  %v1286_v2 = vadd.f32 %v2491_v11, %v1186_v9  ;;  %v1569_v37 = vmul.f32 %v3319_v34, %v2440_v1  ;;  %v1056_v7 = vmul.f32 %v2236_v61, %v1020_v5  ;;  %v1155_v40 = vmul.f32 %v2255_v24, %v821_v25 }
 0x158   : > { %v1771_v62 = vmax.f32 %v3320_v16, %v1739_v46  ;;  %v1585_v4 = vadd.f32 %v3321_v13, %v1485_v50  ;;  %v989_v31 = vadd.f32 %v957_v32, %v857_v6  ;;  %v1057_v33 = vmul.f32 %v2236_v61, %v1021_v57 }
 0x159   : > { %v1302_v41 = vadd.f32 %v3322_v51, %v1202_v36  ;;  %v1601_v58 = vadd.f32 %v1569_v37, %v1501_v43  ;;  %v1187_v11 = vadd.f32 %v1155_v40, %v2619_v55  ;;  %v1255_v17 = vmul.f32 %v3323_v14, %v2443_v19 }
 0x15a   : > { %1803 = vst [vmem:[%s2547_s13 + $0x98] sm:$0xff] %v1771_v62  ;;  %v2681_v44 = vadd.f32 %v1056_v7, %v988_v15  ;;  %v1354_v9 = vmul.f32 %v2259_v28, %v1020_v5  ;;  %v1454_v18 = vmul.f32 %v2257_v26, %v821_v25  ;;  %v1653_v54 = vmul.f32 %v2321_v27, %v1020_v5  ;;  %v3324_v5 = vld [vmem:[#allocation24_spill] sm:$0xff] }
 0x15b   : > { %v2686_v38 = vadd.f32 %v1057_v33, %v989_v31  ;;  %v1287_v50 = vadd.f32 %v1255_v17, %v1187_v11  ;;  %v1355_v59 = vmul.f32 %v2259_v28, %v1021_v57  ;;  %v873_v55 = vmul.f32 %v2225_v53, %v837_v63 }
 0x15c   : > { %v1486_v22 = vadd.f32 %v1454_v18, %v2626_v3  ;;  %v1554_v15 = vmul.f32 %v3319_v34, %v2443_v19  ;;  %v1685_v6 = vadd.f32 %v1653_v54, %v1585_v4  ;;  %v1072_v46 = vmul.f32 %v2236_v61, %v1036_v45  ;;  %v3325_v4 = vld [vmem:[#allocation16_spill] sm:$0xff] }
 0x15d   : > { %v2694_v36 = vadd.f32 %v1354_v9, %v1286_v2  ;;  %v1654_v25 = vmul.f32 %v2321_v27, %v1021_v57  ;;  %v973_v43 = vmul.f32 %v2227_v56, %v3324_v5  ;;  %v1171_v32 = vmul.f32 %v2255_v24, %v837_v63  ;;  %v3326_v54 = vld [vmem:[#allocation28_spill] sm:$0xff] }
 0x15e   : > { %v2700_v37 = vadd.f32 %v1355_v59, %v1287_v50  ;;  %v1586_v7 = vadd.f32 %v1554_v15, %v1486_v22  ;;  %v1724_v3 = vadd.f32 %v2527_v29, %v1685_v6  ;;  %v1073_v40 = vmul.f32 %v2236_v61, %v1037_v12  ;;  %v3327_v50 = vld [vmem:[#allocation3_spill] sm:$0xff]  ;;  %v3330_v6 = vld [vmem:[#allocation32_spill] sm:$0xff] }
 0x15f   : > { %v1005_v16 = vadd.f32 %v973_v43, %v873_v55  ;;  %v1203_v62 = vadd.f32 %v1171_v32, %v2645_v60  ;;  %v1271_v2 = vmul.f32 %v3323_v14, %v3324_v5  ;;  %v1470_v57 = vmul.f32 %v2257_v26, %v837_v63 }
 0x160   : > { %v1686_v13 = vadd.f32 %v1654_v25, %v1586_v7  ;;  %v1756_v31 = vmax.f32 %v3325_v4, %v1724_v3  ;;  %v2709_v33 = vadd.f32 %v1072_v46, %v1004_v49  ;;  %v1370_v51 = vmul.f32 %v2259_v28, %v1036_v45  ;;  %v3328_v49 = vld [vmem:[#allocation29_spill] sm:$0xff]  ;;  %v3331_v46 = vld [vmem:[#allocation18_spill] sm:$0xff] }
 0x161   : > { %v1303_v11 = vadd.f32 %v1271_v2, %v1203_v62  ;;  %v1502_v17 = vadd.f32 %v1470_v57, %v2654_v21  ;;  %v1570_v9 = vmul.f32 %v3319_v34, %v3324_v5  ;;  %v1669_v60 = vmul.f32 %v2321_v27, %v1036_v45 }
 0x162   : > { %v1725_v18 = vadd.f32 %v2527_v29, %v1686_v13  ;;  %1788 = vst [vmem:[%s2547_s13 + $0x20] sm:$0xff] %v1756_v31  ;;  %v1371_v63 = vmul.f32 %v2259_v28, %v1037_v12  ;;  %v2721_v59 = vadd.f32 %v3327_v50, %v3326_v54  ;;  %v2725_v55 = vadd.f32 %v3327_v50, %v3328_v49  ;;  %v3332_v13 = vld [vmem:[#allocation17_spill] sm:$0xff]  ;;  %v3338_v54 = vld [vmem:[#allocation22_spill] sm:$0xff] }
 0x163   : > { %v1602_v21 = vadd.f32 %v1570_v9, %v1502_v17  ;;  %v1670_v22 = vmul.f32 %v2321_v27, %v1037_v12  ;;  %v1701_v15 = vadd.f32 %v1669_v60, %v1601_v58  ;;  %v2730_v45 = vadd.f32 %v3327_v50, %v3330_v6  ;;  %v3333_v31 = vld [vmem:[#allocation33_spill] sm:$0xff]  ;;  %v3336_v60 = vld [vmem:[#allocation35_spill] sm:$0xff] }
 0x164   : > { %3329 = vst [vmem:[#allocation5_spill] sm:$0xff] %v2725_v55  ;;  %v1757_v25 = vmax.f32 %v3331_v46, %v1725_v18  ;;  %v2733_v43 = vadd.f32 %v1073_v40, %v1005_v16  ;;  %v1402_v32 = vadd.f32 %v1370_v51, %v1302_v41  ;;  %v2735_v7 = vadd.f32 %v1371_v63, %v1303_v11 }
 0x165   : > { %786 = vst [vmem:[#allocation2 + $0x79] sm:$0xff] %v2721_v59  ;;  %802 = vst [vmem:[#allocation2 + $0x139] sm:$0xff] %v2725_v55  ;;  %v1702_v3 = vadd.f32 %v1670_v22, %v1602_v21  ;;  %v1740_v62 = vadd.f32 %v2527_v29, %v1701_v15  ;;  %v958_v58 = vmul.f32 %v2227_v56, %v2721_v59 }
 0x166   : > { %v1256_v12 = vmul.f32 %v3323_v14, %v2721_v59  ;;  %787 = vst [vmem:[#allocation2 + $0x81] sm:$0xff] %v2730_v45  ;;  %1789 = vst [vmem:[%s2547_s13 + $0x28] sm:$0xff] %v1757_v25  ;;  %v1555_v41 = vmul.f32 %v3319_v34, %v2721_v59  ;;  %v974_v40 = vmul.f32 %v2227_v56, %v2725_v55 }
 0x167   : > { %v1272_v16 = vmul.f32 %v3323_v14, %v2725_v55  ;;  %v1571_v2 = vmul.f32 %v3319_v34, %v2725_v55  ;;  %v1741_v57 = vadd.f32 %v2527_v29, %v1702_v3  ;;  %v1772_v4 = vmax.f32 %v3332_v13, %v1740_v62 }
 0x168   : > { %v2758_v51 = vadd.f32 %v3327_v50, %v3333_v31  ;;  %v2762_v11 = vadd.f32 %v3327_v50, %v2556_v42  ;;  %v2766_v17 = vadd.f32 %v3327_v50, %v2558_v23  ;;  %v2770_v9 = vadd.f32 %v3327_v50, %v2573_v30 }
 0x169   : > { %v2774_v18 = vadd.f32 %v3327_v50, %v3336_v60  ;;  %v2778_v63 = vadd.f32 %v3327_v50, %v2602_v0  ;;  %v1773_v42 = vmax.f32 %v3338_v54, %v1741_v57  ;;  %1804 = vst [vmem:[%s2547_s13 + $0xa0] sm:$0xff] %v1772_v4  ;;  %v959_v23 = vmul.f32 %v2227_v56, %v2730_v45 }
 0x16a   : > { %3334 = vst [vmem:[#allocation15_spill] sm:$0xff] %v2758_v51  ;;  %3335 = vst [vmem:[#allocation30_spill] sm:$0xff] %v2762_v11  ;;  %v1257_v49 = vmul.f32 %v3323_v14, %v2730_v45  ;;  %v2788_v30 = vmul.f32 %v3319_v34, %v2730_v45  ;;  %v2794_v0 = vmul.f32 %v2227_v56, %v2758_v51 }
 0x16b   : > { %3337 = vst [vmem:[#allocation31_spill] sm:$0xff] %v2778_v63  ;;  %803 = vst [vmem:[#allocation2 + $0x141] sm:$0xff] %v2758_v51  ;;  %v2798_v50 = vmul.f32 %v3323_v14, %v2758_v51  ;;  %v2802_v21 = vmul.f32 %v3319_v34, %v2758_v51  ;;  %v2806_v22 = vmul.f32 %v2227_v56, %v2762_v11 }
 0x16c   : > { %788 = vst [vmem:[#allocation2 + $0x91] sm:$0xff] %v2762_v11  ;;  %804 = vst [vmem:[#allocation2 + $0x151] sm:$0xff] %v2766_v17  ;;  %v822_v15 = vld [vmem:[#allocation2 + $0x78] sm:$0xff]  ;;  %v2815_v46 = vmul.f32 %v3323_v14, %v2762_v11  ;;  %v2819_v25 = vmul.f32 %v3319_v34, %v2762_v11  ;;  %v2823_v3 = vmul.f32 %v2227_v56, %v2766_v17 }
 0x16d   : > { %789 = vst [vmem:[#allocation2 + $0x99] sm:$0xff] %v2770_v9  ;;  %805 = vst [vmem:[#allocation2 + $0x159] sm:$0xff] %v2774_v18  ;;  %v838_v6 = vld [vmem:[#allocation2 + $0x138] sm:$0xff]  ;;  %v2827_v62 = vmul.f32 %v3323_v14, %v2766_v17  ;;  %v858_v57 = vmul.f32 %v2225_v53, %v822_v15  ;;  %v1156_v13 = vmul.f32 %v2255_v24, %v822_v15  ;;  %v823_v60 = vld [vmem:[#allocation2 + $0x80] sm:$0xff] }
 0x16e   : > { %790 = vst [vmem:[#allocation2 + $0xa9] sm:$0xff] %v2778_v63  ;;  %1805 = vst [vmem:[%s2547_s13 + $0xa8] sm:$0xff] %v1773_v42  ;;  %v1455_v4 = vmul.f32 %v2257_v26, %v822_v15  ;;  %v874_v31 = vmul.f32 %v2225_v53, %v838_v6  ;;  %v1022_v54 = vld [vmem:[#allocation2 + $0x7a] sm:$0xff]  ;;  %v1172_v42 = vmul.f32 %v2255_v24, %v838_v6  ;;  %v1023_v10 = vld [vmem:[#allocation2 + $0x82] sm:$0xff] }
 0x16f   : > { %v1471_v8 = vmul.f32 %v2257_v26, %v838_v6  ;;  %v859_v11 = vmul.f32 %v2225_v53, %v823_v60  ;;  %v1058_v39 = vmul.f32 %v2236_v61, %v1022_v54  ;;  %v990_v52 = vadd.f32 %v958_v58, %v858_v57 }
 0x170   : > { %v1188_v48 = vadd.f32 %v1156_v13, %v2681_v44  ;;  %v1487_v51 = vadd.f32 %v1455_v4, %v2694_v36  ;;  %v2841_v15 = vmul.f32 %v3319_v34, %v2766_v17  ;;  %v1204_v35 = vadd.f32 %v1172_v42, %v2709_v33 }
 0x171   : > { %v1503_v55 = vadd.f32 %v1471_v8, %v1402_v32  ;;  %v991_v20 = vadd.f32 %v959_v23, %v859_v11  ;;  %v2846_v6 = vmul.f32 %v2227_v56, %v2770_v9  ;;  %v1006_v63 = vadd.f32 %v974_v40, %v874_v31 }
 0x172   : > { %v1587_v47 = vadd.f32 %v1555_v41, %v1487_v51  ;;  %v1157_v58 = vmul.f32 %v2255_v24, %v823_v60  ;;  %v839_v44 = vld [vmem:[#allocation2 + $0x140] sm:$0xff]  ;;  %v2851_v36 = vmul.f32 %v3323_v14, %v2770_v9  ;;  %v1288_v13 = vadd.f32 %v1256_v12, %v1188_v48 }
 0x173   : > { %v1038_v57 = vld [vmem:[#allocation2 + $0x13a] sm:$0xff]  ;;  %v1603_v4 = vadd.f32 %v1571_v2, %v1503_v55  ;;  %v1059_v33 = vmul.f32 %v2236_v61, %v1023_v10  ;;  %v1090_v8 = vadd.f32 %v1058_v39, %v990_v52  ;;  %v1304_v32 = vadd.f32 %v1272_v16, %v1204_v35  ;;  %v1039_v42 = vld [vmem:[#allocation2 + $0x142] sm:$0xff] }
 0x174   : > { %v1189_v11 = vadd.f32 %v1157_v58, %v2686_v38  ;;  %v1456_v23 = vmul.f32 %v2257_v26, %v823_v60  ;;  %v1655_v41 = vmul.f32 %v2321_v27, %v1022_v54  ;;  %v1356_v51 = vmul.f32 %v2259_v28, %v1022_v54  ;;  %v824_v58 = vld [vmem:[#allocation2 + $0x90] sm:$0xff] }
 0x175   : > { %v2857_v40 = vadd.f32 %v1059_v33, %v991_v20  ;;  %v875_v31 = vmul.f32 %v2225_v53, %v839_v44  ;;  %v1074_v48 = vmul.f32 %v2236_v61, %v1038_v57  ;;  %v1357_v12 = vmul.f32 %v2259_v28, %v1023_v10 }
 0x176   : > { %v1289_v55 = vadd.f32 %v1257_v49, %v1189_v11  ;;  %v1488_v35 = vadd.f32 %v1456_v23, %v2700_v37  ;;  %v1687_v52 = vadd.f32 %v1655_v41, %v1587_v47  ;;  %v1388_v39 = vadd.f32 %v1356_v51, %v1288_v13  ;;  %v3339_v11 = vld [vmem:[#allocation23_spill] sm:$0xff] }
 0x177   : > { %v1656_v38 = vmul.f32 %v2321_v27, %v1023_v10  ;;  %v1173_v16 = vmul.f32 %v2255_v24, %v839_v44  ;;  %v1372_v20 = vmul.f32 %v2259_v28, %v1038_v57  ;;  %v1007_v54 = vadd.f32 %v2794_v0, %v875_v31  ;;  %v840_v51 = vld [vmem:[#allocation2 + $0x150] sm:$0xff] }
 0x178   : > { %v1588_v2 = vadd.f32 %v2788_v30, %v1488_v35  ;;  %v1726_v60 = vadd.f32 %v2527_v29, %v1687_v52  ;;  %v1075_v49 = vmul.f32 %v2236_v61, %v1039_v42  ;;  %v2871_v33 = vadd.f32 %v1357_v12, %v1289_v55  ;;  %v825_v52 = vld [vmem:[#allocation2 + $0x98] sm:$0xff] }
 0x179   : > { %v1106_v47 = vadd.f32 %v1074_v48, %v1006_v63  ;;  %v1205_v37 = vadd.f32 %v1173_v16, %v2733_v43  ;;  %v1472_v10 = vmul.f32 %v2257_v26, %v839_v44  ;;  %v1373_v30 = vmul.f32 %v2259_v28, %v1039_v42 }
 0x17a   : > { %v1688_v13 = vadd.f32 %v1656_v38, %v1588_v2  ;;  %v1758_v23 = vmax.f32 %v3339_v11, %v1726_v60  ;;  %v1671_v41 = vmul.f32 %v2321_v27, %v1038_v57  ;;  %v1404_v0 = vadd.f32 %v1372_v20, %v1304_v32  ;;  %v1024_v38 = vld [vmem:[#allocation2 + $0x92] sm:$0xff] }
 0x17b   : > { %v1504_v31 = vadd.f32 %v1472_v10, %v2735_v7  ;;  %v860_v35 = vmul.f32 %v2225_v53, %v824_v58  ;;  %v1158_v55 = vmul.f32 %v2255_v24, %v824_v58  ;;  %v1672_v43 = vmul.f32 %v2321_v27, %v1039_v42 }
 0x17c   : > { %v1727_v63 = vadd.f32 %v2527_v29, %v1688_v13  ;;  %1790 = vst [vmem:[%s2547_s13 + $0x30] sm:$0xff] %v1758_v23  ;;  %v1703_v44 = vadd.f32 %v1671_v41, %v1603_v4  ;;  %v1457_v48 = vmul.f32 %v2257_v26, %v824_v58  ;;  %v1305_v12 = vadd.f32 %v2798_v50, %v1205_v37 }
 0x17d   : > { %v1604_v57 = vadd.f32 %v2802_v21, %v1504_v31  ;;  %v1190_v32 = vadd.f32 %v1158_v55, %v1090_v8  ;;  %v876_v7 = vmul.f32 %v2225_v53, %v840_v51  ;;  %v992_v2 = vadd.f32 %v2806_v22, %v860_v35  ;;  %v1025_v8 = vld [vmem:[#allocation2 + $0x9a] sm:$0xff] }
 0x17e   : > { %v1759_v16 = vmax.f32 %v2443_v19, %v1727_v63  ;;  %v1742_v20 = vadd.f32 %v2527_v29, %v1703_v44  ;;  %v1489_v42 = vadd.f32 %v1457_v48, %v1388_v39  ;;  %v1174_v50 = vmul.f32 %v2255_v24, %v840_v51  ;;  %v1041_v63 = vld [vmem:[#allocation2 + $0x15a] sm:$0xff] }
 0x17f   : > { %v1704_v4 = vadd.f32 %v1672_v43, %v1604_v57  ;;  %v1290_v60 = vadd.f32 %v2815_v46, %v1190_v32  ;;  %v1473_v21 = vmul.f32 %v2257_v26, %v840_v51  ;;  %v861_v19 = vmul.f32 %v2225_v53, %v825_v52  ;;  %v841_v51 = vld [vmem:[#allocation2 + $0x158] sm:$0xff] }
 0x180   : > { %1791 = vst [vmem:[%s2547_s13 + $0x38] sm:$0xff] %v1759_v16  ;;  %v1774_v58 = vmax.f32 %v2440_v1, %v1742_v20  ;;  %v1589_v37 = vadd.f32 %v2819_v25, %v1489_v42  ;;  %v1060_v10 = vmul.f32 %v2236_v61, %v1024_v38  ;;  %v1107_v22 = vadd.f32 %v1075_v49, %v1007_v54 }
 0x181   : > { %v1743_v39 = vadd.f32 %v2527_v29, %v1704_v4  ;;  %v1206_v13 = vadd.f32 %v1174_v50, %v1106_v47  ;;  %v1505_v11 = vadd.f32 %v1473_v21, %v1404_v0  ;;  %v1405_v46 = vadd.f32 %v1373_v30, %v1305_v12  ;;  %v1040_v47 = vld [vmem:[#allocation2 + $0x152] sm:$0xff]  ;;  %v826_v21 = vld [vmem:[#allocation2 + $0xa8] sm:$0xff] }
 0x182   : > { %1806 = vst [vmem:[%s2547_s13 + $0xb0] sm:$0xff] %v1774_v58  ;;  %v1008_v23 = vadd.f32 %v2823_v3, %v876_v7  ;;  %v1061_v41 = vmul.f32 %v2236_v61, %v1025_v8  ;;  %v1159_v1 = vmul.f32 %v2255_v24, %v825_v52  ;;  %v993_v49 = vadd.f32 %v2846_v6, %v861_v19 }
 0x183   : > { %v1775_v25 = vmax.f32 %v3324_v5, %v1743_v39  ;;  %v1306_v31 = vadd.f32 %v2827_v62, %v1206_v13  ;;  %v1605_v54 = vadd.f32 %v2841_v15, %v1505_v11  ;;  %v1092_v0 = vadd.f32 %v1060_v10, %v992_v2 }
 0x184   : > { %v1191_v30 = vadd.f32 %v1159_v1, %v2857_v40  ;;  %v1358_v35 = vmul.f32 %v2259_v28, %v1024_v38  ;;  %v1458_v3 = vmul.f32 %v2257_v26, %v825_v52  ;;  %v1359_v55 = vmul.f32 %v2259_v28, %v1025_v8 }
 0x185   : > { %1807 = vst [vmem:[%s2547_s13 + $0xb8] sm:$0xff] %v1775_v25  ;;  %v1558_v5 = vmul.f32 %v3319_v34, %v2770_v9  ;;  %v1657_v62 = vmul.f32 %v2321_v27, %v1024_v38  ;;  %v877_v15 = vmul.f32 %v2225_v53, %v841_v51  ;;  %v977_v40 = vmul.f32 %v2227_v56, %v2774_v18 }
 0x186   : > { %v1291_v6 = vadd.f32 %v2851_v36, %v1191_v30  ;;  %v1490_v43 = vadd.f32 %v1458_v3, %v2871_v33  ;;  %v1076_v44 = vmul.f32 %v2236_v61, %v1040_v47  ;;  %v2922_v48 = vadd.f32 %v1061_v41, %v993_v49  ;;  %v3341_v3 = vld [vmem:[#allocation38_spill] sm:$0xff] }
 0x187   : > { %v1390_v12 = vadd.f32 %v1358_v35, %v1290_v60  ;;  %v1689_v57 = vadd.f32 %v1657_v62, %v1589_v37  ;;  %v1175_v32 = vmul.f32 %v2255_v24, %v841_v51  ;;  %v1658_v52 = vmul.f32 %v2321_v27, %v1025_v8 }
 0x188   : > { %v1590_v7 = vadd.f32 %v1558_v5, %v1490_v43  ;;  %v1009_v38 = vadd.f32 %v977_v40, %v877_v15  ;;  %v1077_v16 = vmul.f32 %v2236_v61, %v1041_v63  ;;  %v1275_v20 = vmul.f32 %v3323_v14, %v2774_v18  ;;  %v3343_v5 = vld [vmem:[#allocation39_spill] sm:$0xff]  ;;  %v3344_v15 = vld [vmem:[#allocation5_spill] sm:$0xff] }
 0x189   : > { %v1728_v36 = vadd.f32 %v2527_v29, %v1689_v57  ;;  %v1207_v33 = vadd.f32 %v1175_v32, %v1107_v22  ;;  %v1374_v2 = vmul.f32 %v2259_v28, %v1040_v47  ;;  %v2931_v42 = vadd.f32 %v1359_v55, %v1291_v6  ;;  %v3345_v6 = vld [vmem:[#allocation40_spill] sm:$0xff]  ;;  %v3347_v40 = vld [vmem:[#allocation41_spill] sm:$0xff] }
 0x18a   : > { %v1690_v4 = vadd.f32 %v1658_v52, %v1590_v7  ;;  %v2933_v60 = vadd.f32 %v1076_v44, %v1008_v23  ;;  %v1474_v50 = vmul.f32 %v2257_v26, %v841_v51  ;;  %v1375_v37 = vmul.f32 %v2259_v28, %v1041_v63 }
 0x18b   : > { %v1760_v8 = vmax.f32 %v2721_v59, %v1728_v36  ;;  %v1307_v58 = vadd.f32 %v1275_v20, %v1207_v33  ;;  %v1673_v19 = vmul.f32 %v2321_v27, %v1040_v47  ;;  %v2940_v22 = vadd.f32 %v1077_v16, %v1009_v38  ;;  %v3340_v47 = vld [vmem:[#allocation31_spill] sm:$0xff] }
 0x18c   : > { %v1729_v10 = vadd.f32 %v2527_v29, %v1690_v4  ;;  %v1506_v39 = vadd.f32 %v1474_v50, %v1405_v46  ;;  %v1574_v13 = vmul.f32 %v3319_v34, %v2774_v18  ;;  %v2945_v11 = vadd.f32 %v1374_v2, %v1306_v31  ;;  %v3348_v33 = vld [vmem:[#allocation15_spill] sm:$0xff] }
 0x18d   : > { %1792 = vst [vmem:[%s2547_s13 + $0x40] sm:$0xff] %v1760_v8  ;;  %v1674_v23 = vmul.f32 %v2321_v27, %v1041_v63  ;;  %v1705_v59 = vadd.f32 %v1673_v19, %v1605_v54  ;;  %v1160_v41 = vmul.f32 %v2255_v24, %v826_v21  ;;  %v862_v25 = vmul.f32 %v2225_v53, %v826_v21 }
 0x18e   : > { %v1761_v1 = vmax.f32 %v2730_v45, %v1729_v10  ;;  %v1606_v51 = vadd.f32 %v1574_v13, %v1506_v39  ;;  %v1459_v49 = vmul.f32 %v2257_v26, %v826_v21  ;;  %v962_v30 = vmul.f32 %v2227_v56, %v3340_v47  ;;  %v2045_v45 = vld [vmem:[%s3248_s2] ss:$0 sm:$0xff]  ;;  %v3351_v10 = vld [vmem:[#allocation43_spill] sm:$0xff] }
 0x18f   : > { %v1744_v46 = vadd.f32 %v2527_v29, %v1705_v59  ;;  %v1192_v35 = vadd.f32 %v1160_v41, %v1092_v0  ;;  %v1260_v31 = vmul.f32 %v3323_v14, %v3340_v47  ;;  %v2962_v55 = vadd.f32 %v2045_v45, %v3341_v3  ;;  %v1543_v21 = vld [vmem:[#allocation2 + $0x199] sm:$0xff] }
 0x190   : > { %1793 = vst [vmem:[%s2547_s13 + $0x48] sm:$0xff] %v1761_v1  ;;  %v1706_v27 = vadd.f32 %v1674_v23, %v1606_v51  ;;  %v1491_v54 = vadd.f32 %v1459_v49, %v1390_v12  ;;  %v2965_v62 = vadd.f32 %v2045_v45, %v3343_v5  ;;  %v1559_v0 = vmul.f32 %v3319_v34, %v3340_v47  ;;  %v3353_v41 = vld [vmem:[#allocation44_spill] sm:$0xff]  ;;  %v1544_v51 = vld [vmem:[#allocation2 + $0x1a1] sm:$0xff] }
 0x191   : > { %3342 = vst [vmem:[#allocation4_spill] sm:$0xff] %v2962_v55  ;;  %v1776_v63 = vmax.f32 %v3344_v15, %v1744_v46  ;;  %v2971_v43 = vadd.f32 %v2045_v45, %v3345_v6  ;;  %v2974_v44 = vadd.f32 %v2045_v45, %v3347_v40  ;;  %v2976_v12 = vadd.f32 %v1375_v37, %v1307_v58  ;;  %v3349_v37 = vld [vmem:[#allocation42_spill] sm:$0xff] }
 0x192   : > { %v1745_v57 = vadd.f32 %v2527_v29, %v1706_v27  ;;  %v994_v32 = vadd.f32 %v962_v30, %v862_v25  ;;  %v1292_v7 = vadd.f32 %v1260_v31, %v1192_v35  ;;  %806 = vst [vmem:[#allocation2 + $0x169] sm:$0xff] %v2962_v55  ;;  %791 = vst [vmem:[#allocation2 + $0xb1] sm:$0xff] %v2965_v62  ;;  %v1643_v25 = vld [vmem:[#allocation2 + $0x19a] sm:$0xff]  ;;  %v3080_v40 = vld [vmem:[%s3249_s3 + $0x8] ss:$0 sm:$0xff] }
 0x193   : > { %3346 = vst [vmem:[#allocation24_spill] sm:$0xff] %v2971_v43  ;;  %1808 = vst [vmem:[%s2547_s13 + $0xc0] sm:$0xff] %v1776_v63  ;;  %v2982_v52 = vadd.f32 %v1559_v0, %v1491_v54  ;;  %v978_v38 = vmul.f32 %v2227_v56, %v2962_v55  ;;  %v1276_v16 = vmul.f32 %v3323_v14, %v2962_v55  ;;  %v2046_v30 = vld [vmem:[#allocation2] sm:$0xff] }
 0x194   : > { %v1575_v36 = vmul.f32 %v3319_v34, %v2962_v55  ;;  %807 = vst [vmem:[#allocation2 + $0x171] sm:$0xff] %v2971_v43  ;;  %792 = vst [vmem:[#allocation2 + $0xc1] sm:$0xff] %v2974_v44  ;;  %v1777_v20 = vmax.f32 %v3348_v33, %v1745_v57  ;;  %v1261_v2 = vmul.f32 %v3323_v14, %v2965_v62 }
 0x195   : > { %v1560_v4 = vmul.f32 %v3319_v34, %v2965_v62  ;;  %v2999_v50 = vmul.f32 %v3323_v14, %v2971_v43  ;;  %v3003_v8 = vmul.f32 %v3319_v34, %v2971_v43  ;;  %v3007_v58 = vmul.f32 %v2227_v56, %v2974_v44 }
 0x196   : > { %v3010_v19 = vadd.f32 %v2045_v45, %v3349_v37  ;;  %v3013_v39 = vadd.f32 %v2045_v45, %v3351_v10  ;;  %1809 = vst [vmem:[%s2547_s13 + $0xc8] sm:$0xff] %v1777_v20  ;;  %v3018_v13 = vmul.f32 %v3323_v14, %v2974_v44  ;;  %v3022_v23 = vmul.f32 %v3319_v34, %v2974_v44 }
 0x197   : > { %v3026_v59 = vmul.f32 %v2227_v56, %v2965_v62  ;;  %v3029_v1 = vadd.f32 %v2045_v45, %v3353_v41  ;;  %v3039_v46 = vmul.f32 %v2227_v56, %v2971_v43  ;;  %v3042_v35 = vmul.f32 %v2046_v30, %v2257_v26 }
 0x198   : > { %3350 = vst [vmem:[#allocation16_spill] sm:$0xff] %v3010_v19  ;;  %3352 = vst [vmem:[#allocation28_spill] sm:$0xff] %v3013_v39  ;;  %v3034_v49 = vmul.f32 %v3323_v14, %v3010_v19  ;;  %v3045_v31 = vmul.f32 %v3319_v34, %v1543_v21  ;;  %v3049_v27 = vmul.f32 %v3319_v34, %v3010_v19 }
 0x199   : > { %3354 = vst [vmem:[#allocation3_spill] sm:$0xff] %v3029_v1  ;;  %808 = vst [vmem:[#allocation2 + $0x181] sm:$0xff] %v3010_v19  ;;  %v3053_v54 = vmul.f32 %v2227_v56, %v3013_v39  ;;  %v3057_v45 = vmul.f32 %v3323_v14, %v3013_v39  ;;  %v3061_v3 = vmul.f32 %v3319_v34, %v3013_v39  ;;  %v842_v5 = vld [vmem:[#allocation2 + $0x168] sm:$0xff]  ;;  %v3064_v63 = vld [vmem:[#allocation2 + $0xb0] sm:$0xff] }
 0x19a   : > { %793 = vst [vmem:[#allocation2 + $0xc9] sm:$0xff] %v3013_v39  ;;  %3355 = vst [vmem:[#allocation29_spill] sm:$0xff] %v3042_v35  ;;  %v1026_v15 = vld [vmem:[#allocation2 + $0xaa] sm:$0xff]  ;;  %v3068_v0 = vmul.f32 %v3323_v14, %v3029_v1  ;;  %v3072_v56 = vmul.f32 %v3319_v34, %v3029_v1  ;;  %v3075_v6 = vmul.f32 %v3319_v34, %v1544_v51  ;;  %v3089_v37 = vld [vmem:[#allocation2 + $0xb2] sm:$0xff] }
 0x19b   : > { %3356 = vst [vmem:[#allocation32_spill] sm:$0xff] %v3045_v31  ;;  %809 = vst [vmem:[#allocation2 + $0x189] sm:$0xff] %v3029_v1  ;;  %v3083_v57 = vmul.f32 %v3080_v40, %v1643_v25  ;;  %v878_v33 = vmul.f32 %v2225_v53, %v842_v5  ;;  %v1176_v14 = vmul.f32 %v2255_v24, %v842_v5  ;;  %v1042_v25 = vld [vmem:[#allocation2 + $0x16a] sm:$0xff] }
 0x19c   : > { %3357 = vst [vmem:[#allocation18_spill] sm:$0xff] %v3072_v56  ;;  %3358 = vst [vmem:[#allocation17_spill] sm:$0xff] %v3075_v6  ;;  %v1475_v20 = vmul.f32 %v2257_v26, %v842_v5  ;;  %v1062_v21 = vmul.f32 %v2236_v61, %v1026_v15  ;;  %v1161_v34 = vmul.f32 %v2255_v24, %v3064_v63  ;;  %v3100_v19 = vld [vmem:[#allocation2 + $0x170] sm:$0xff] }
 0x19d   : > { %3359 = vst [vmem:[#allocation33_spill] sm:$0xff] %v3083_v57  ;;  %v1360_v10 = vmul.f32 %v2259_v28, %v1026_v15  ;;  %v1361_v41 = vmul.f32 %v2259_v28, %v3089_v37  ;;  %v1460_v51 = vmul.f32 %v2257_v26, %v3064_v63  ;;  %v1010_v30 = vadd.f32 %v978_v38, %v878_v33  ;;  %v3105_v56 = vld [vmem:[#allocation2 + $0x172] sm:$0xff] }
 0x19e   : > { %v1208_v1 = vadd.f32 %v1176_v14, %v2933_v60  ;;  %v1507_v5 = vadd.f32 %v1475_v20, %v2945_v11  ;;  %v1094_v43 = vadd.f32 %v1062_v21, %v994_v32  ;;  %v1193_v55 = vadd.f32 %v1161_v34, %v2922_v48  ;;  %v3360_v34 = vld [vmem:[#allocation30_spill] sm:$0xff] }
 0x19f   : > { %v1392_v39 = vadd.f32 %v1360_v10, %v1292_v7  ;;  %v1492_v57 = vadd.f32 %v1460_v51, %v2931_v42  ;;  %v1659_v6 = vmul.f32 %v3080_v40, %v1026_v15  ;;  %v1660_v38 = vmul.f32 %v3080_v40, %v3089_v37 }
 0x1a0   : > { %v1308_v31 = vadd.f32 %v1276_v16, %v1208_v1  ;;  %v1607_v35 = vadd.f32 %v1575_v36, %v1507_v5  ;;  %v1078_v60 = vmul.f32 %v2236_v61, %v1042_v25  ;;  %v1293_v11 = vadd.f32 %v1261_v2, %v1193_v55  ;;  %v828_v36 = vld [vmem:[#allocation2 + $0xc0] sm:$0xff] }
 0x1a1   : > { %v1592_v32 = vadd.f32 %v1560_v4, %v1492_v57  ;;  %v1691_v33 = vadd.f32 %v1659_v6, %v2982_v52  ;;  %v1177_v48 = vmul.f32 %v2255_v24, %v3100_v19  ;;  %v1376_v42 = vmul.f32 %v2259_v28, %v1042_v25  ;;  %v1142_v20 = vld [vmem:[#allocation2 + $0x180] sm:$0xff] }
 0x1a2   : > { %v1110_v7 = vadd.f32 %v1078_v60, %v1010_v30  ;;  %v1377_v15 = vmul.f32 %v2259_v28, %v3105_v56  ;;  %v1476_v16 = vmul.f32 %v2257_v26, %v3100_v19  ;;  %v3118_v1 = vadd.f32 %v1361_v41, %v1293_v11  ;;  %v829_v30 = vld [vmem:[#allocation2 + $0xc8] sm:$0xff] }
 0x1a3   : > { %v1692_v14 = vadd.f32 %v1660_v38, %v1592_v32  ;;  %v1730_v55 = vadd.f32 %v2527_v29, %v1691_v33  ;;  %v1209_v52 = vadd.f32 %v1177_v48, %v2940_v22  ;;  %v1408_v2 = vadd.f32 %v1376_v42, %v1308_v31  ;;  %v1028_v42 = vld [vmem:[#allocation2 + $0xc2] sm:$0xff] }
 0x1a4   : > { %v1508_v4 = vadd.f32 %v1476_v16, %v2976_v12  ;;  %v1675_v6 = vmul.f32 %v3080_v40, %v1042_v25  ;;  %v1676_v57 = vmul.f32 %v3080_v40, %v3105_v56  ;;  %v864_v51 = vmul.f32 %v2225_v53, %v828_v36 }
 0x1a5   : > { %v1731_v21 = vadd.f32 %v2527_v29, %v1692_v14  ;;  %v1762_v10 = vmax.f32 %v3360_v34, %v1730_v55  ;;  %v1309_v41 = vadd.f32 %v2999_v50, %v1209_v52  ;;  %v1162_v12 = vmul.f32 %v2255_v24, %v828_v36 }
 0x1a6   : > { %v1608_v22 = vadd.f32 %v3003_v8, %v1508_v4  ;;  %v1707_v31 = vadd.f32 %v1675_v6, %v1607_v35  ;;  %v1461_v25 = vmul.f32 %v2257_v26, %v828_v36  ;;  %v996_v29 = vadd.f32 %v3007_v58, %v864_v51  ;;  %v3142_v8 = vld [vmem:[%s3250_s4] ss:$0 sm:$0xff]  ;;  %v3362_v51 = vld [vmem:[#allocation11_spill] sm:$0xff] }
 0x1a7   : > { %v1763_v5 = vmax.f32 %v2770_v9, %v1731_v21  ;;  %1794 = vst [vmem:[%s2547_s13 + $0x50] sm:$0xff] %v1762_v10  ;;  %v3135_v38 = vadd.f32 %v1377_v15, %v1309_v41  ;;  %v1178_v50 = vmul.f32 %v2255_v24, %v1142_v20  ;;  %v1194_v11 = vadd.f32 %v1162_v12, %v1094_v43  ;;  %v1029_v15 = vld [vmem:[#allocation2 + $0xca] sm:$0xff]  ;;  %v3361_v10 = vld [vmem:[#allocation8_spill] sm:$0xff] }
 0x1a8   : > { %v1708_v60 = vadd.f32 %v1676_v57, %v1608_v22  ;;  %v1746_v35 = vadd.f32 %v3142_v8, %v1707_v31  ;;  %v1493_v32 = vadd.f32 %v1461_v25, %v1392_v39  ;;  %v1477_v33 = vmul.f32 %v2257_v26, %v1142_v20  ;;  %v1143_v12 = vld [vmem:[#allocation2 + $0x188] sm:$0xff]  ;;  %v3363_v25 = vld [vmem:[#allocation9_spill] sm:$0xff] }
 0x1a9   : > { %1795 = vst [vmem:[%s2547_s13 + $0x58] sm:$0xff] %v1763_v5  ;;  %v1210_v9 = vadd.f32 %v1178_v50, %v1110_v7  ;;  %v863_v58 = vmul.f32 %v3064_v63, %v2225_v53  ;;  %v865_v48 = vmul.f32 %v2225_v53, %v829_v30  ;;  %v1294_v43 = vadd.f32 %v3018_v13, %v1194_v11 }
 0x1aa   : > { %v1747_v16 = vadd.f32 %v3142_v8, %v1708_v60  ;;  %v1778_v36 = vmax.f32 %v2766_v17, %v1746_v35  ;;  %v1593_v39 = vadd.f32 %v3022_v23, %v1493_v32  ;;  %v1509_v14 = vadd.f32 %v1477_v33, %v1408_v2  ;;  %v3364_v35 = vld [vmem:[#allocation6_spill] sm:$0xff]  ;;  %v3366_v33 = vld [vmem:[#allocation7_spill] sm:$0xff] }
 0x1ab   : > { %v1310_v7 = vadd.f32 %v3034_v49, %v1210_v9  ;;  %v995_v55 = vadd.f32 %v3026_v59, %v863_v58  ;;  %v997_v63 = vadd.f32 %v3053_v54, %v865_v48  ;;  %v1063_v4 = vmul.f32 %v3089_v37, %v2236_v61  ;;  %v1342_v9 = vld [vmem:[#allocation2 + $0x182] sm:$0xff] }
 0x1ac   : > { %v1779_v52 = vmax.f32 %v2774_v18, %v1747_v16  ;;  %1810 = vst [vmem:[%s2547_s13 + $0xd0] sm:$0xff] %v1778_v36  ;;  %v1064_v17 = vmul.f32 %v2236_v61, %v1028_v42  ;;  %v1065_v6 = vmul.f32 %v2236_v61, %v1029_v15  ;;  %v3164_v13 = vadd.f32 %v3049_v27, %v1509_v14  ;;  %v1343_v36 = vld [vmem:[#allocation2 + $0x18a] sm:$0xff] }
 0x1ad   : > { %v1163_v23 = vmul.f32 %v2255_v24, %v829_v30  ;;  %v1362_v49 = vmul.f32 %v2259_v28, %v1028_v42  ;;  %v1363_v59 = vmul.f32 %v2259_v28, %v1029_v15  ;;  %v1095_v54 = vadd.f32 %v1063_v4, %v995_v55  ;;  %v3371_v4 = vld [vmem:[#allocation19_spill] sm:$0xff] }
 0x1ae   : > { %1811 = vst [vmem:[%s2547_s13 + $0xd8] sm:$0xff] %v1779_v52  ;;  %v1096_v18 = vadd.f32 %v1064_v17, %v996_v29  ;;  %v1097_v2 = vadd.f32 %v1065_v6, %v997_v63  ;;  %v1462_v57 = vmul.f32 %v2257_v26, %v829_v30  ;;  %v1661_v20 = vmul.f32 %v3080_v40, %v1028_v42  ;;  %v3370_v63 = vld [vmem:[#allocation25_spill] sm:$0xff]  ;;  %v3372_v6 = vld [vmem:[#allocation34_spill] sm:$0xff] }
 0x1af   : > { %v1394_v37 = vadd.f32 %v1362_v49, %v1294_v43  ;;  %v1662_v21 = vmul.f32 %v3080_v40, %v1029_v15  ;;  %v879_v27 = vmul.f32 %v3100_v19, %v2225_v53  ;;  %v1195_v34 = vadd.f32 %v1163_v23, %v1095_v54  ;;  %v3365_v19 = vld [vmem:[#allocation10_spill] sm:$0xff]  ;;  %v3367_v15 = vld [vmem:[#allocation12_spill] sm:$0xff] }
 0x1b0   : > { %v1196_v41 = vadd.f32 %v3361_v10, %v1096_v18  ;;  %v1197_v22 = vadd.f32 %v3362_v51, %v1097_v2  ;;  %v1494_v31 = vadd.f32 %v1462_v57, %v3118_v1  ;;  %v1693_v29 = vadd.f32 %v1661_v20, %v1593_v39  ;;  %v3369_v43 = vld [vmem:[#allocation14_spill] sm:$0xff]  ;;  %v3374_v57 = vld [vmem:[#allocation20_spill] sm:$0xff]  ;;  %v3375_v20 = vld [vmem:[#allocation21_spill] sm:$0xff] }
 0x1b1   : > { %v1495_v5 = vadd.f32 %v3363_v25, %v1394_v37  ;;  %v1011_v30 = vadd.f32 %v3039_v46, %v879_v27  ;;  %v1079_v50 = vmul.f32 %v3105_v56, %v2236_v61  ;;  %v1295_v60 = vadd.f32 %v3057_v45, %v1195_v34  ;;  %v3368_v56 = vld [vmem:[#allocation13_spill] sm:$0xff]  ;;  %v3373_v18 = vld [vmem:[#allocation26_spill] sm:$0xff]  ;;  %v3378_v25 = vld [vmem:[#allocation36_spill] sm:$0xff] }
 0x1b2   : > { %v1296_v53 = vadd.f32 %v3364_v35, %v1196_v41  ;;  %v1297_v11 = vadd.f32 %v3365_v19, %v1197_v22  ;;  %v1594_v32 = vadd.f32 %v3061_v3, %v1494_v31  ;;  %v1732_v58 = vadd.f32 %v3142_v8, %v1693_v29  ;;  %v1644_v34 = vld [vmem:[#allocation2 + $0x1a2] sm:$0xff]  ;;  %v3377_v31 = vld [vmem:[#allocation27_spill] sm:$0xff] }
 0x1b3   : > { %v1595_v1 = vadd.f32 %v3366_v33, %v1495_v5  ;;  %v1111_v48 = vadd.f32 %v1079_v50, %v1011_v30  ;;  %v1179_v46 = vmul.f32 %v2255_v24, %v1143_v12  ;;  %v1395_v42 = vadd.f32 %v1363_v59, %v1295_v60  ;;  %v3376_v22 = vld [vmem:[#allocation29_spill] sm:$0xff] }
 0x1b4   : > { %v1396_v61 = vadd.f32 %v3367_v15, %v1296_v53  ;;  %v1397_v45 = vadd.f32 %v3368_v56, %v1297_v11  ;;  %v1694_v16 = vadd.f32 %v1662_v21, %v1594_v32  ;;  %v1764_v3 = vmax.f32 %v3340_v47, %v1732_v58  ;;  %v3379_v5 = vld [vmem:[#allocation37_spill] sm:$0xff]  ;;  %v3381_v11 = vld [vmem:[#allocation18_spill] sm:$0xff] }
 0x1b5   : > { %v1695_v39 = vadd.f32 %v3369_v43, %v1595_v1  ;;  %v1211_v14 = vadd.f32 %v1179_v46, %v1111_v48  ;;  %v1378_v55 = vmul.f32 %v2259_v28, %v1342_v9  ;;  %v1496_v52 = vadd.f32 %v3370_v63, %v1395_v42  ;;  %v3383_v1 = vld [vmem:[#allocation33_spill] sm:$0xff]  ;;  %v3384_v48 = vld [vmem:[#allocation28_spill] sm:$0xff] }
 0x1b6   : > { %v1497_v17 = vadd.f32 %v3371_v4, %v1396_v61  ;;  %v1498_v24 = vadd.f32 %v3372_v6, %v1397_v45  ;;  %v1733_v23 = vadd.f32 %v3142_v8, %v1694_v16  ;;  %1796 = vst [vmem:[%s2547_s13 + $0x60] sm:$0xff] %v1764_v3  ;;  %v1379_v54 = vmul.f32 %v2259_v28, %v1343_v36  ;;  %v2049_v42 = vld [vmem:[#allocation2 + $0xd9] sm:$0xff]  ;;  %v2050_v61 = vld [vmem:[#allocation2 + $0xe1] sm:$0xff]  ;;  %v3388_v4 = vld [vmem:[#allocation3_spill] sm:$0xff] }
 0x1b7   : > { %v1734_v49 = vadd.f32 %v3142_v8, %v1695_v39  ;;  %v1311_v59 = vadd.f32 %v3068_v0, %v1211_v14  ;;  %v1410_v47 = vadd.f32 %v1378_v55, %v1310_v7  ;;  %v1596_v2 = vadd.f32 %v3373_v18, %v1496_v52  ;;  %v3386_v14 = vld [vmem:[#allocation16_spill] sm:$0xff] }
 0x1b8   : > { %v1597_v37 = vadd.f32 %v3374_v57, %v1497_v17  ;;  %v1598_v21 = vadd.f32 %v3375_v20, %v1498_v24  ;;  %v1765_v27 = vmax.f32 %v2965_v62, %v1733_v23  ;;  %v1478_v51 = vmul.f32 %v2257_v26, %v1143_v12  ;;  %v3387_v63 = vld [vmem:[#allocation24_spill] sm:$0xff] }
 0x1b9   : > { %v1766_v10 = vmax.f32 %v2974_v44, %v1734_v49  ;;  %v1411_v41 = vadd.f32 %v1379_v54, %v1311_v59  ;;  %v1511_v0 = vadd.f32 %v3376_v22, %v1410_v47  ;;  %v1696_v28 = vadd.f32 %v3377_v31, %v1596_v2  ;;  %v3380_v44 = vld [vmem:[#allocation32_spill] sm:$0xff] }
 0x1ba   : > { %v1697_v7 = vadd.f32 %v3378_v25, %v1597_v37  ;;  %v1698_v29 = vadd.f32 %v3379_v5, %v1598_v21  ;;  %1797 = vst [vmem:[%s2547_s13 + $0x68] sm:$0xff] %v1765_v27  ;;  %v1677_v30 = vmul.f32 %v3080_v40, %v1342_v9  ;;  %v1510_v62 = vadd.f32 %v1478_v51, %v3135_v38  ;;  %v3382_v38 = vld [vmem:[#allocation17_spill] sm:$0xff] }
 0x1bb   : > { %1798 = vst [vmem:[%s2547_s13 + $0x70] sm:$0xff] %v1766_v10  ;;  %v1512_v50 = vadd.f32 %v3376_v22, %v1411_v41  ;;  %v1611_v60 = vadd.f32 %v3380_v44, %v1511_v0  ;;  %v1680_v26 = vmul.f32 %v3080_v40, %v1644_v34  ;;  %v1735_v12 = vadd.f32 %v3142_v8, %v1696_v28 }
 0x1bc   : > { %v1736_v35 = vadd.f32 %v3142_v8, %v1697_v7  ;;  %v1737_v53 = vadd.f32 %v3142_v8, %v1698_v29  ;;  %v1709_v19 = vadd.f32 %v1677_v30, %v3164_v13  ;;  %v1610_v32 = vadd.f32 %v3381_v11, %v1510_v62 }
 0x1bd   : > { %v1612_v9 = vadd.f32 %v3382_v38, %v1512_v50  ;;  %v1678_v33 = vmul.f32 %v3080_v40, %v1343_v36  ;;  %v1711_v58 = vadd.f32 %v3383_v1, %v1611_v60  ;;  %v1767_v46 = vmax.f32 %v3384_v48, %v1735_v12  ;;  %v3385_v40 = vld [vmem:[#allocation4_spill] sm:$0xff] }
 0x1be   : > { %v1768_v15 = vmax.f32 %v2049_v42, %v1736_v35  ;;  %v1769_v56 = vmax.f32 %v2050_v61, %v1737_v53  ;;  %v1748_v13 = vadd.f32 %v3142_v8, %v1709_v19 }
 0x1bf   : > { %v1710_v45 = vadd.f32 %v1678_v33, %v1610_v32  ;;  %v1712_v16 = vadd.f32 %v1680_v26, %v1612_v9  ;;  %v1750_v43 = vadd.f32 %v3142_v8, %v1711_v58  ;;  %1799 = vst [vmem:[%s2547_s13 + $0x78] sm:$0xff] %v1767_v46 }
 0x1c0   : > { %1800 = vst [vmem:[%s2547_s13 + $0x80] sm:$0xff] %v1768_v15  ;;  %1801 = vst [vmem:[%s2547_s13 + $0x88] sm:$0xff] %v1769_v56  ;;  %v1780_v36 = vmax.f32 %v3385_v40, %v1748_v13 }
 0x1c1   : > { %v1749_v39 = vadd.f32 %v3142_v8, %v1710_v45  ;;  %v1751_v3 = vadd.f32 %v3142_v8, %v1712_v16  ;;  %v1782_v55 = vmax.f32 %v3386_v14, %v1750_v43 }
 0x1c2   : > { %1812 = vst [vmem:[%s2547_s13 + $0xe0] sm:$0xff] %v1780_v36 }
 0x1c3   : > { %v1781_v52 = vmax.f32 %v3387_v63, %v1749_v39  ;;  %v1783_v17 = vmax.f32 %v3388_v4, %v1751_v3  ;;  %1814 = vst [vmem:[%s2547_s13 + $0xf0] sm:$0xff] %v1782_v55 }
 0x1c5   : > { %1813 = vst [vmem:[%s2547_s13 + $0xe8] sm:$0xff] %v1781_v52  ;;  %1815 = vst [vmem:[%s2547_s13 + $0xf8] sm:$0xff] %v1783_v17 }
 0x1c6 PF: > { %s15_s18 = sadd.s32 1, %s2057_s18  }
 0x1c7   : > { %p12_p4 = scmp.ge.s32.totalorder %s15_s18, 4  }
 0x1c9   :  { %14 = sbr.rel (!%p12_p4) target bundleno = 1 (0x1), region = 72 }

// kernel: feature_extract_pallas.5
= control target key start
LH: loop header
LB: loop body
LE: loop exit
PB: predicated region body
PF: predicated region fallthrough
CT: control target
= control target key end

     0   :  { %s2043_s18 = smov 0   ;;  %s3160_s0 = inlined_call_operand.vmem [shape: bf16[2,256,144], index: 0, kind: input, shape index: {}]   ;;  %s3161_s1 = inlined_call_operand.vmem [shape: bf16[144,128], index: 1, kind: input, shape index: {}]   ;;  %s3162_s2 = inlined_call_operand.vmem [shape: f32[1,128], index: 2, kind: input, shape index: {}]   ;;  %s3163_s3 = inlined_call_operand.vmem [shape: f32[9,128], index: 3, kind: input, shape index: {}]   ;;  %s3164_s4 = inlined_call_operand.vmem [shape: f32[1,128], index: 4, kind: input, shape index: {}]   ;;  %s3165_s5 = inlined_call_operand.vmem [shape: f32[2,16,16,128], index: 5, kind: output, shape index: {}]  }
   0x1 LB: > { %s1839_s19 = sadd.s32 4294967295, %s2009_s18   ;;  %p1843_p0 = scmp.ge.s32.totalorder %s2009_s18, 1  ;;  %s2009_s18 = sphi %s2043_s18, %s15_s18  }
   0x2   : > { %p187_p1 = scmp.lt.s32.totalorder %s2009_s18, 3 }
   0x4   : > { %p188_p2 = pnand %p1843_p0, %p187_p1 }
   0x6   : > { %191 = sbr.rel (%p188_p2) target bundleno = 438 (0x1b6), region = 40 }
   0xd   : > { %v1940_v0 = vld [vmem:[%s3161_s1] sm:$0xff]   ;;  %v2011_v1 = vmov 0   ;;  %p215_p3 = scmp.lt.s32.totalorder %s1839_s19, 1  ;;  %v1941_v2 = vld [vmem:[%s3161_s1 + $0x8] sm:$0xff]   ;;  %v1942_v3 = vld [vmem:[%s3161_s1 + $0x10] sm:$0xff]   ;;  %vm481_vm0 = vcmask 130048   ;;  %v812_v43 = vlaneseq }
   0xe   : > { %530 = vmatprep.subr.bf16.mxu0 %v2011_v1  ;;  %1912 = vmatprep.subr.bf16.mxu1 %v2011_v1  ;;  %v1943_v4 = vld [vmem:[%s3161_s1 + $0x18] sm:$0xff]   ;;  %v1944_v7 = vld [vmem:[%s3161_s1 + $0x20] sm:$0xff]   ;;  %v1945_v8 = vld [vmem:[%s3161_s1 + $0x28] sm:$0xff]   ;;  %v2012_v42 = vmov 0.0  }
   0xf   : > { %531 = vmatpush1.bf16.msra.mxu0 %v1940_v0  ;;  %1921 = vmatpush1.bf16.msra.mxu1 %v1940_v0  ;;  %s3304_s19 = smov (!%p215_p3, %s1839_s19), 1  ;;  %v1946_v9 = vld [vmem:[%s3161_s1 + $0x30] sm:$0xff]   ;;  %v1947_v10 = vld [vmem:[%s3161_s1 + $0x38] sm:$0xff]   ;;  %v1948_v11 = vld [vmem:[%s3161_s1 + $0x40] sm:$0xff]   ;;  %691 = vst [vmem:[#allocation2] sm:$0xff] %v2012_v42  ;;  %v813_v44 = vshrl.u32 %v812_v43, 7 }
  0x10   : > { %532 = vmatprep.subr.bf16.mxu0 %v2011_v1  ;;  %1913 = vmatprep.subr.bf16.mxu1 %v2011_v1  ;;  %s1910_s24 = sshll.u32 %s3304_s19, 8  ;;  %692 = vst [vmem:[#allocation2 + $0x8] sm:$0xff] %v2012_v42  ;;  %694 = vst [vmem:[#allocation2 + $0x18] sm:$0xff] %v2012_v42  ;;  %v778_v47 = vld [vmem:[%s3163_s3] sm:$0xff] }
  0x11   : > { %s2068_s29 = scalar_lea.vmem %s3160_s0, %s1910_s24  ;;  %695 = vst [vmem:[#allocation2 + $0x20] sm:$0xff] %v2012_v42  ;;  %693 = vst [vmem:[#allocation2 + $0x10] sm:$0x3] %v2012_v42  ;;  %v814_v45 = vsub.s32 0, %v813_v44  ;;  %v914_v46 = vsub.s32 1, %v813_v44  ;;  %v1014_v49 = vsub.s32 2, %v813_v44  ;;  %s2461_s30 = scalar_lea.vmem %s3165_s5, %s1910_s24 }
  0x12   : > { %v1951_v5 = vld [vmem:[%s2068_s29 + $0x4] ss:$8 sps:$4 sm:$0xff]   ;;  %v1949_v12 = vld [vmem:[%s2068_s29] ss:$8 sps:$4 sm:$0xff]   ;;  %v1955_v14 = vld [vmem:[%s2068_s29 + $0x14] ss:$8 sps:$4 sm:$0xff]  }
  0x13   : > { %533 = vmatpush1.bf16.msra.mxu0 %v1941_v2  ;;  %1922 = vmatpush1.bf16.msra.mxu1 %v1941_v2  ;;  %v1954_v6 = vld [vmem:[%s2068_s29 + $0x84] ss:$8 sps:$4 sm:$0xff]   ;;  %v1952_v13 = vld [vmem:[%s2068_s29 + $0x80] ss:$8 sps:$4 sm:$0xff]   ;;  %v1957_v15 = vld [vmem:[%s2068_s29 + $0x94] ss:$8 sps:$4 sm:$0xff]   ;;  %v2139_v48 = vrot.slane %v778_v47, %v814_v45  ;;  %v2141_v51 = vrot.slane %v778_v47, %v914_v46  ;;  %v2150_v56 = vrot.slane %v778_v47, %v1014_v49 }
  0x14   : > { %534 = vmatprep.subr.bf16.mxu0 %v2011_v1  ;;  %1914 = vmatprep.subr.bf16.mxu1 %v2011_v1  ;;  %v1959_v16 = vld [vmem:[%s2068_s29 + $0x10] ss:$8 sps:$4 sm:$0xff]   ;;  %v1961_v18 = vld [vmem:[%s2068_s29 + $0x24] ss:$8 sps:$4 sm:$0xff]   ;;  %v1965_v20 = vld [vmem:[%s2068_s29 + $0x20] ss:$8 sps:$4 sm:$0xff]  }
  0x15   : > { %1890 = vmatprep.mubr.msk.bf16.mxu0 %vm481_vm0, %v1951_v5  ;;  %1898 = vmatprep.mubr.msk.bf16.mxu1 %vm481_vm0, %v1954_v6  ;;  %v1960_v17 = vld [vmem:[%s2068_s29 + $0x90] ss:$8 sps:$4 sm:$0xff]   ;;  %v1963_v19 = vld [vmem:[%s2068_s29 + $0xa4] ss:$8 sps:$4 sm:$0xff]   ;;  %v1966_v21 = vld [vmem:[%s2068_s29 + $0xa0] ss:$8 sps:$4 sm:$0xff]  }
  0x16   : > { %v1967_v22 = vld [vmem:[%s2068_s29 + $0x34] ss:$8 sps:$4 sm:$0xff]   ;;  %v1971_v24 = vld [vmem:[%s2068_s29 + $0x30] ss:$8 sps:$4 sm:$0xff]   ;;  %v1973_v26 = vld [vmem:[%s2068_s29 + $0x44] ss:$8 sps:$4 sm:$0xff]  }
  0x17   : > { %535 = vmatpush1.bf16.msra.mxu0 %v1942_v3  ;;  %1923 = vmatpush1.bf16.msra.mxu1 %v1942_v3  ;;  %v1969_v23 = vld [vmem:[%s2068_s29 + $0xb4] ss:$8 sps:$4 sm:$0xff]   ;;  %v1972_v25 = vld [vmem:[%s2068_s29 + $0xb0] ss:$8 sps:$4 sm:$0xff]   ;;  %v1975_v27 = vld [vmem:[%s2068_s29 + $0xc4] ss:$8 sps:$4 sm:$0xff]  }
  0x18   : > { %536 = vmatprep.subr.bf16.mxu0 %v2011_v1  ;;  %1915 = vmatprep.subr.bf16.mxu1 %v2011_v1  ;;  %v1977_v28 = vld [vmem:[%s2068_s29 + $0x40] ss:$8 sps:$4 sm:$0xff]   ;;  %v1979_v30 = vld [vmem:[%s2068_s29 + $0x54] ss:$8 sps:$4 sm:$0xff]   ;;  %v1983_v32 = vld [vmem:[%s2068_s29 + $0x50] ss:$8 sps:$4 sm:$0xff]  }
  0x19   : > { %v1978_v29 = vld [vmem:[%s2068_s29 + $0xc0] ss:$8 sps:$4 sm:$0xff]   ;;  %v1981_v31 = vld [vmem:[%s2068_s29 + $0xd4] ss:$8 sps:$4 sm:$0xff]   ;;  %v1984_v33 = vld [vmem:[%s2068_s29 + $0xd0] ss:$8 sps:$4 sm:$0xff]  }
  0x1a   : > { %v1985_v34 = vld [vmem:[%s2068_s29 + $0x64] ss:$8 sps:$4 sm:$0xff]   ;;  %v1989_v36 = vld [vmem:[%s2068_s29 + $0x60] ss:$8 sps:$4 sm:$0xff]   ;;  %v1991_v38 = vld [vmem:[%s2068_s29 + $0x74] ss:$8 sps:$4 sm:$0xff]  }
  0x1b   : > { %537 = vmatpush1.bf16.msra.mxu0 %v1943_v4  ;;  %1924 = vmatpush1.bf16.msra.mxu1 %v1943_v4  ;;  %v1987_v35 = vld [vmem:[%s2068_s29 + $0xe4] ss:$8 sps:$4 sm:$0xff]   ;;  %v1990_v37 = vld [vmem:[%s2068_s29 + $0xe0] ss:$8 sps:$4 sm:$0xff]   ;;  %v1993_v39 = vld [vmem:[%s2068_s29 + $0xf4] ss:$8 sps:$4 sm:$0xff]  }
  0x1c   : > { %538 = vmatprep.subr.bf16.mxu0 %v2011_v1  ;;  %1916 = vmatprep.subr.bf16.mxu1 %v2011_v1  ;;  %v1995_v40 = vld [vmem:[%s2068_s29 + $0x70] ss:$8 sps:$4 sm:$0xff]   ;;  %696 = vst [vmem:[#allocation2 + $0x28] sm:$0x3] %v2012_v42  ;;  %697 = vst [vmem:[#allocation2 + $0x30] sm:$0xff] %v2012_v42  ;;  %v880_v50 = vld [vmem:[#allocation2 + $0x1] sm:$0xff] }
  0x1d   : > { %v1996_v41 = vld [vmem:[%s2068_s29 + $0xf0] ss:$8 sps:$4 sm:$0xff]   ;;  %698 = vst [vmem:[#allocation2 + $0x38] sm:$0xff] %v2012_v42  ;;  %699 = vst [vmem:[#allocation2 + $0x40] sm:$0x3] %v2012_v42  ;;  %v816_v54 = vmul.f32 0.0, %v2139_v48  ;;  %v916_v55 = vmul.f32 %v2141_v51, %v880_v50 }
  0x1e   : > { %700 = vst [vmem:[#allocation2 + $0x48] sm:$0xff] %v2012_v42  ;;  %701 = vst [vmem:[#allocation2 + $0x50] sm:$0xff] %v2012_v42  ;;  %v881_v52 = vld [vmem:[#allocation2 + $0x9] sm:$0xff]  ;;  %v2146_v53 = vld [vmem:[%s3162_s2] ss:$0 sm:$0xff]  ;;  %v1214_v62 = vsub.s32 4, %v813_v44 }
  0x1f   : > { %539 = vmatpush1.bf16.msra.mxu0 %v1944_v7  ;;  %1925 = vmatpush1.bf16.msra.mxu1 %v1944_v7  ;;  %702 = vst [vmem:[#allocation2 + $0x58] sm:$0x3] %v2012_v42  ;;  %703 = vst [vmem:[#allocation2 + $0x60] sm:$0xff] %v2012_v42  ;;  %v980_v58 = vld [vmem:[#allocation2 + $0x2] sm:$0xff]  ;;  %v917_v60 = vmul.f32 %v2141_v51, %v881_v52  ;;  %v981_v2 = vld [vmem:[#allocation2 + $0xa] sm:$0xff]  ;;  %v1114_v3 = vsub.s32 3, %v813_v44  ;;  %v948_v7 = vadd.f32 %v916_v55, %v816_v54 }
  0x20   : > { %540 = vmatprep.subr.bf16.mxu0 %v2011_v1  ;;  %1917 = vmatprep.subr.bf16.mxu1 %v2011_v1  ;;  %704 = vst [vmem:[#allocation2 + $0x68] sm:$0xff] %v2012_v42  ;;  %705 = vst [vmem:[#allocation2 + $0x70] sm:$0x3] %v2012_v42  ;;  %v1515_v4 = vsub.s32 7, %v813_v44 }
  0x21   : > { %706 = vst [vmem:[#allocation2 + $0x78] sm:$0xff] %v2012_v42  ;;  %707 = vst [vmem:[#allocation2 + $0x80] sm:$0xff] %v2012_v42 }
  0x22   : > { %708 = vst [vmem:[#allocation2 + $0x88] sm:$0x3] %v2012_v42  ;;  %709 = vst [vmem:[#allocation2 + $0x90] sm:$0xff] %v2012_v42 }
  0x23   : > { %541 = vmatpush1.bf16.msra.mxu0 %v1945_v8  ;;  %1926 = vmatpush1.bf16.msra.mxu1 %v1945_v8  ;;  %710 = vst [vmem:[#allocation2 + $0x98] sm:$0xff] %v2012_v42  ;;  %711 = vst [vmem:[#allocation2 + $0xa0] sm:$0x3] %v2012_v42  ;;  %v1016_v8 = vmul.f32 %v2150_v56, %v980_v58 }
  0x24   : > { %542 = vmatprep.subr.bf16.mxu0 %v2011_v1  ;;  %1918 = vmatprep.subr.bf16.mxu1 %v2011_v1  ;;  %712 = vst [vmem:[#allocation2 + $0xa8] sm:$0xff] %v2012_v42  ;;  %713 = vst [vmem:[#allocation2 + $0xb0] sm:$0xff] %v2012_v42 }
  0x25   : > { %714 = vst [vmem:[#allocation2 + $0xb8] sm:$0x3] %v2012_v42  ;;  %715 = vst [vmem:[#allocation2 + $0xc0] sm:$0xff] %v2012_v42 }
  0x26   : > { %716 = vst [vmem:[#allocation2 + $0xc8] sm:$0xff] %v2012_v42  ;;  %717 = vst [vmem:[#allocation2 + $0xd0] sm:$0x3] %v2012_v42 }
  0x27   : > { %543 = vmatpush1.bf16.msra.mxu0 %v1946_v9  ;;  %1927 = vmatpush1.bf16.msra.mxu1 %v1946_v9  ;;  %718 = vst [vmem:[#allocation2 + $0xd8] sm:$0xff] %v2012_v42  ;;  %719 = vst [vmem:[#allocation2 + $0xe0] sm:$0xff] %v2012_v42  ;;  %v1415_v9 = vsub.s32 6, %v813_v44 }
  0x28   : > { %544 = vmatprep.subr.bf16.mxu0 %v2011_v1  ;;  %1919 = vmatprep.subr.bf16.mxu1 %v2011_v1  ;;  %720 = vst [vmem:[#allocation2 + $0xe8] sm:$0x3] %v2012_v42  ;;  %721 = vst [vmem:[#allocation2 + $0xf0] sm:$0xff] %v2012_v42 }
  0x29   : > { %722 = vst [vmem:[#allocation2 + $0xf8] sm:$0xff] %v2012_v42  ;;  %723 = vst [vmem:[#allocation2 + $0x100] sm:$0x3] %v2012_v42 }
  0x2a   : > { %724 = vst [vmem:[#allocation2 + $0x108] sm:$0xff] %v2012_v42  ;;  %725 = vst [vmem:[#allocation2 + $0x110] sm:$0xff] %v2012_v42 }
  0x2b   : > { %545 = vmatpush1.bf16.msra.mxu0 %v1947_v10  ;;  %1928 = vmatpush1.bf16.msra.mxu1 %v1947_v10  ;;  %726 = vst [vmem:[#allocation2 + $0x118] sm:$0x3] %v2012_v42  ;;  %727 = vst [vmem:[#allocation2 + $0x120] sm:$0xff] %v2012_v42  ;;  %v1314_v10 = vsub.s32 5, %v813_v44 }
  0x2c   : > { %546 = vmatprep.subr.bf16.mxu0 %v2011_v1  ;;  %1920 = vmatprep.subr.bf16.mxu1 %v2011_v1  ;;  %728 = vst [vmem:[#allocation2 + $0x128] sm:$0xff] %v2012_v42  ;;  %729 = vst [vmem:[#allocation2 + $0x130] sm:$0x3] %v2012_v42 }
  0x2d   : > { %730 = vst [vmem:[#allocation2 + $0x138] sm:$0xff] %v2012_v42  ;;  %731 = vst [vmem:[#allocation2 + $0x140] sm:$0xff] %v2012_v42 }
  0x2e   : > { %732 = vst [vmem:[#allocation2 + $0x148] sm:$0x3] %v2012_v42  ;;  %733 = vst [vmem:[#allocation2 + $0x150] sm:$0xff] %v2012_v42 }
  0x2f   : > { %547 = vmatpush1.bf16.msra.mxu0 %v1948_v11  ;;  %1929 = vmatpush1.bf16.msra.mxu1 %v1948_v11  ;;  %734 = vst [vmem:[#allocation2 + $0x158] sm:$0xff] %v2012_v42  ;;  %735 = vst [vmem:[#allocation2 + $0x160] sm:$0x3] %v2012_v42 }
  0x30   : > { %736 = vst [vmem:[#allocation2 + $0x168] sm:$0xff] %v2012_v42  ;;  %737 = vst [vmem:[#allocation2 + $0x170] sm:$0xff] %v2012_v42 }
  0x31   : > { %738 = vst [vmem:[#allocation2 + $0x178] sm:$0x3] %v2012_v42  ;;  %739 = vst [vmem:[#allocation2 + $0x180] sm:$0xff] %v2012_v42 }
  0x32   : > { %563 = vmatmul.mubr.bf16.vlgmr.msra.gmra.mrb[0].mxu0 %v1949_v12  ;;  %627 = vmatmul.mubr.bf16.vlgmr.msra.gmra.mrb[0].mxu1 %v1952_v13  ;;  %740 = vst [vmem:[#allocation2 + $0x188] sm:$0xff] %v2012_v42  ;;  %741 = vst [vmem:[#allocation2 + $0x190] sm:$0x3] %v2012_v42 }
  0x33   : > { %1891 = vmatprep.mubr.msk.bf16.mxu0 %vm481_vm0, %v1955_v14  ;;  %1899 = vmatprep.mubr.msk.bf16.mxu1 %vm481_vm0, %v1957_v15  ;;  %742 = vst [vmem:[#allocation2 + $0x198] sm:$0xff] %v2012_v42  ;;  %743 = vst [vmem:[#allocation2 + $0x1a0] sm:$0xff] %v2012_v42  ;;  %v949_v14 = vadd.f32 %v917_v60, %v816_v54  ;;  %v1017_v15 = vmul.f32 %v2150_v56, %v981_v2 }
  0x34   : > { %744 = vst [vmem:[#allocation2 + $0x1a8] sm:$0x3] %v2012_v42  ;;  %3191 = vst [vmem:[#allocation3_spill] sm:$0xff] %v2146_v53 }
  0x3a   : > { %571 = vmatmul.mubr.bf16.gmra.mrb[4].mxu0 %v1959_v16  ;;  %635 = vmatmul.mubr.bf16.gmra.mrb[4].mxu1 %v1960_v17  ;;  %v2164_v17 = vrot.slane %v778_v47, %v1214_v62 }
  0x3b   : > { %1892 = vmatprep.mubr.msk.bf16.mxu0 %vm481_vm0, %v1961_v18  ;;  %1900 = vmatprep.mubr.msk.bf16.mxu1 %vm481_vm0, %v1963_v19  ;;  %v2166_v18 = vrot.slane %v778_v47, %v1515_v4  ;;  %v2169_v19 = vrot.slane %v778_v47, %v1114_v3 }
  0x3c   : > { %3192 = vst [vmem:[#allocation4_spill] sm:$0xff] %v2164_v17 }
  0x3d   : > { %3193 = vst [vmem:[#allocation5_spill] sm:$0xff] %v2166_v18 }
  0x42   : > { %579 = vmatmul.mubr.bf16.gmra.mrb[8].mxu0 %v1965_v20  ;;  %643 = vmatmul.mubr.bf16.gmra.mrb[8].mxu1 %v1966_v21  ;;  %v1048_v20 = vadd.f32 %v1016_v8, %v948_v7  ;;  %v2171_v21 = vrot.slane %v778_v47, %v1415_v9 }
  0x43   : > { %1893 = vmatprep.mubr.msk.bf16.mxu0 %vm481_vm0, %v1967_v22  ;;  %1901 = vmatprep.mubr.msk.bf16.mxu1 %vm481_vm0, %v1969_v23  ;;  %v1049_v22 = vadd.f32 %v1017_v15, %v949_v14  ;;  %v2173_v23 = vrot.slane %v778_v47, %v1314_v10 }
  0x4a   : > { %587 = vmatmul.mubr.bf16.gmra.mrb[12].mxu0 %v1971_v24  ;;  %651 = vmatmul.mubr.bf16.gmra.mrb[12].mxu1 %v1972_v25 }
  0x4b   : > { %1894 = vmatprep.mubr.msk.bf16.mxu0 %vm481_vm0, %v1973_v26  ;;  %1902 = vmatprep.mubr.msk.bf16.mxu1 %vm481_vm0, %v1975_v27 }
  0x52   : > { %595 = vmatmul.mubr.bf16.gmra.mrb[16].mxu0 %v1977_v28  ;;  %659 = vmatmul.mubr.bf16.gmra.mrb[16].mxu1 %v1978_v29 }
  0x53   : > { %1895 = vmatprep.mubr.msk.bf16.mxu0 %vm481_vm0, %v1979_v30  ;;  %1903 = vmatprep.mubr.msk.bf16.mxu1 %vm481_vm0, %v1981_v31 }
  0x5a   : > { %603 = vmatmul.mubr.bf16.gmra.mrb[20].mxu0 %v1983_v32  ;;  %667 = vmatmul.mubr.bf16.gmra.mrb[20].mxu1 %v1984_v33 }
  0x5b   : > { %1896 = vmatprep.mubr.msk.bf16.mxu0 %vm481_vm0, %v1985_v34  ;;  %1904 = vmatprep.mubr.msk.bf16.mxu1 %vm481_vm0, %v1987_v35 }
  0x62   : > { %611 = vmatmul.mubr.bf16.gmra.mrb[24].mxu0 %v1989_v36  ;;  %675 = vmatmul.mubr.bf16.gmra.mrb[24].mxu1 %v1990_v37 }
  0x63   : > { %1897 = vmatprep.mubr.msk.bf16.mxu0 %vm481_vm0, %v1991_v38  ;;  %1905 = vmatprep.mubr.msk.bf16.mxu1 %vm481_vm0, %v1993_v39 }
  0x6a   : > { %619 = vmatmul.mubr.bf16.gmra.mrb[28].mxu0 %v1995_v40  ;;  %683 = vmatmul.mubr.bf16.gmra.mrb[28].mxu1 %v1996_v41 }
 0x105   : > { %v564_v57 = vpop.f32.mrb[0].mxu0  ;;  %v628_v59 = vpop.f32.mrb[0].mxu1 }
 0x106   : > { %v2154_v61 = vadd.f32 %v2146_v53, %v564_v57  ;;  %v629_v63 = vadd.f32 %v2146_v53, %v628_v59  ;;  %v566_v0 = vpop.f32.mrb[1].mxu0  ;;  %v630_v1 = vpop.f32.mrb[1].mxu1 }
 0x107   : > { %v567_v5 = vpop.f32.mrb[2].mxu0  ;;  %v631_v6 = vpop.f32.mrb[2].mxu1 }
 0x108   : > { %746 = vst [vmem:[#allocation2 + $0x19] sm:$0xff] %v2154_v61  ;;  %762 = vst [vmem:[#allocation2 + $0xd9] sm:$0xff] %v629_v63  ;;  %v569_v11 = vpop.f32.mrb[3].mxu0  ;;  %v633_v12 = vpop.f32.mrb[3].mxu1  ;;  %v2160_v13 = vadd.f32 %v2146_v53, %v567_v5  ;;  %v632_v16 = vadd.f32 %v2146_v53, %v631_v6  ;;  %v918_v26 = vmul.f32 %v2141_v51, %v2154_v61 }
 0x109   : > { %v1216_v27 = vmul.f32 %v2164_v17, %v2154_v61  ;;  %v934_v34 = vmul.f32 %v2141_v51, %v629_v63  ;;  %v2187_v35 = vmul.f32 %v2164_v17, %v629_v63  ;;  %v2190_v36 = vmul.f32 %v2166_v18, %v629_v63 }
 0x10a   : > { %747 = vst [vmem:[#allocation2 + $0x21] sm:$0xff] %v2160_v13  ;;  %763 = vst [vmem:[#allocation2 + $0xe1] sm:$0xff] %v632_v16  ;;  %v919_v37 = vmul.f32 %v2141_v51, %v2160_v13  ;;  %v1217_v43 = vmul.f32 %v2164_v17, %v2160_v13  ;;  %v935_v49 = vmul.f32 %v2141_v51, %v632_v16 }
 0x10b   : > { %3194 = vst [vmem:[#allocation6_spill] sm:$0xff] %v2187_v35  ;;  %3195 = vst [vmem:[#allocation7_spill] sm:$0xff] %v2190_v36  ;;  %v2213_v50 = vmul.f32 %v2164_v17, %v632_v16 }
 0x10d   : > { %v572_v24 = vpop.f32.mrb[4].mxu0  ;;  %v636_v25 = vpop.f32.mrb[4].mxu1  ;;  %3198 = vst [vmem:[#allocation10_spill] sm:$0xff] %v2213_v50 }
 0x10e   : > { %v2180_v28 = vadd.f32 %v2146_v53, %v572_v24  ;;  %v2183_v29 = vadd.f32 %v2146_v53, %v636_v25  ;;  %v574_v30 = vpop.f32.mrb[5].mxu0  ;;  %v638_v31 = vpop.f32.mrb[5].mxu1 }
 0x10f   : > { %v782_v32 = vld [vmem:[#allocation2 + $0x18] sm:$0xff]  ;;  %v2194_v38 = vpop.f32.mrb[6].mxu0  ;;  %v2196_v39 = vpop.f32.mrb[6].mxu1 }
 0x110   : > { %v798_v33 = vld [vmem:[#allocation2 + $0xd8] sm:$0xff]  ;;  %v818_v40 = vmul.f32 %v2139_v48, %v782_v32  ;;  %v1116_v41 = vmul.f32 %v2169_v19, %v782_v32  ;;  %748 = vst [vmem:[#allocation2 + $0x31] sm:$0xff] %v2180_v28  ;;  %764 = vst [vmem:[#allocation2 + $0xf1] sm:$0xff] %v2183_v29  ;;  %v577_v44 = vpop.f32.mrb[7].mxu0  ;;  %v641_v45 = vpop.f32.mrb[7].mxu1  ;;  %v920_v58 = vmul.f32 %v2141_v51, %v2180_v28 }
 0x111   : > { %v834_v42 = vmul.f32 %v2139_v48, %v798_v33  ;;  %v2206_v46 = vmul.f32 %v2169_v19, %v798_v33  ;;  %v2209_v47 = vmul.f32 %v2171_v21, %v798_v33  ;;  %v783_v54 = vld [vmem:[#allocation2 + $0x20] sm:$0xff]  ;;  %v1218_v59 = vmul.f32 %v2164_v17, %v2180_v28 }
 0x112   : > { %v1148_v52 = vadd.f32 %v1116_v41, %v1048_v20  ;;  %v982_v55 = vld [vmem:[#allocation2 + $0x1a] sm:$0xff]  ;;  %v983_v57 = vld [vmem:[#allocation2 + $0x22] sm:$0xff]  ;;  %v1517_v60 = vmul.f32 %v2166_v18, %v2180_v28  ;;  %v950_v62 = vadd.f32 %v918_v26, %v818_v40  ;;  %v819_v63 = vmul.f32 %v2139_v48, %v783_v54 }
 0x113   : > { %3196 = vst [vmem:[#allocation8_spill] sm:$0xff] %v2206_v46  ;;  %3197 = vst [vmem:[#allocation9_spill] sm:$0xff] %v2209_v47  ;;  %v1018_v0 = vmul.f32 %v2150_v56, %v982_v55  ;;  %v1117_v1 = vmul.f32 %v2169_v19, %v783_v54  ;;  %v799_v2 = vld [vmem:[#allocation2 + $0xe0] sm:$0xff]  ;;  %v966_v6 = vadd.f32 %v934_v34, %v834_v42 }
 0x114   : > { %v998_v3 = vld [vmem:[#allocation2 + $0xda] sm:$0xff]  ;;  %v999_v4 = vld [vmem:[#allocation2 + $0xe2] sm:$0xff]  ;;  %v1248_v5 = vadd.f32 %v1216_v27, %v1148_v52  ;;  %v835_v7 = vmul.f32 %v2139_v48, %v799_v2  ;;  %v936_v8 = vmul.f32 %v2141_v51, %v2183_v29  ;;  %v951_v9 = vadd.f32 %v919_v37, %v819_v63 }
 0x115   : > { %v1149_v10 = vadd.f32 %v1117_v1, %v1049_v22  ;;  %v1316_v11 = vmul.f32 %v2173_v23, %v982_v55  ;;  %v1034_v12 = vmul.f32 %v2150_v56, %v998_v3  ;;  %v580_v14 = vpop.f32.mrb[8].mxu0  ;;  %v644_v15 = vpop.f32.mrb[8].mxu1  ;;  %v1019_v16 = vmul.f32 %v2150_v56, %v983_v57  ;;  %v2235_v22 = vld [vmem:[%s3163_s3 + $0x8] ss:$0 sm:$0xff] }
 0x116   : > { %v1317_v20 = vmul.f32 %v2173_v23, %v983_v57  ;;  %v967_v24 = vadd.f32 %v935_v49, %v835_v7  ;;  %v1035_v25 = vmul.f32 %v2150_v56, %v999_v4  ;;  %v582_v26 = vpop.f32.mrb[9].mxu0  ;;  %v646_v27 = vpop.f32.mrb[9].mxu1  ;;  %v1050_v30 = vadd.f32 %v1018_v0, %v950_v62 }
 0x117   : > { %v1249_v31 = vadd.f32 %v1217_v43, %v1149_v10  ;;  %v1348_v32 = vadd.f32 %v1316_v11, %v1248_v5  ;;  %v2238_v33 = vmul.f32 %v2169_v19, %v799_v2  ;;  %v784_v34 = vld [vmem:[#allocation2 + $0x30] sm:$0xff]  ;;  %v583_v40 = vpop.f32.mrb[10].mxu0  ;;  %v647_v41 = vpop.f32.mrb[10].mxu1  ;;  %v2240_v42 = vadd.f32 %v1019_v16, %v951_v9 }
 0x118   : > { %v800_v37 = vld [vmem:[#allocation2 + $0xf0] sm:$0xff]  ;;  %v1066_v44 = vadd.f32 %v1034_v12, %v966_v6  ;;  %v2243_v45 = vmul.f32 %v2173_v23, %v998_v3  ;;  %v820_v43 = vmul.f32 %v2139_v48, %v784_v34  ;;  %v585_v49 = vpop.f32.mrb[11].mxu0  ;;  %v649_v52 = vpop.f32.mrb[11].mxu1  ;;  %v2246_v54 = vadd.f32 %v1035_v25, %v967_v24 }
 0x119   : > { %3199 = vst [vmem:[#allocation11_spill] sm:$0xff] %v2238_v33  ;;  %v2249_v55 = vmul.f32 %v2173_v23, %v999_v4  ;;  %v1118_v57 = vmul.f32 %v2169_v19, %v784_v34  ;;  %v1417_v62 = vmul.f32 %v2171_v21, %v784_v34  ;;  %v2253_v63 = vadd.f32 %v1317_v20, %v1249_v31 }
 0x11a   : > { %3200 = vst [vmem:[#allocation12_spill] sm:$0xff] %v2243_v45  ;;  %v2256_v0 = vmul.f32 %v2235_v22, %v998_v3  ;;  %v836_v1 = vmul.f32 %v2139_v48, %v800_v37  ;;  %v1134_v2 = vmul.f32 %v2169_v19, %v800_v37  ;;  %v2260_v5 = vadd.f32 %v920_v58, %v820_v43 }
 0x11b   : > { %3201 = vst [vmem:[#allocation13_spill] sm:$0xff] %v2249_v55  ;;  %v1150_v6 = vadd.f32 %v1118_v57, %v1050_v30  ;;  %v1449_v7 = vadd.f32 %v1417_v62, %v1348_v32  ;;  %v1234_v4 = vmul.f32 %v2164_v17, %v2183_v29  ;;  %v2266_v10 = vadd.f32 %v2146_v53, %v2194_v38 }
 0x11c   : > { %3202 = vst [vmem:[#allocation14_spill] sm:$0xff] %v2256_v0  ;;  %v1166_v9 = vadd.f32 %v1134_v2, %v1066_v44  ;;  %v2270_v3 = vadd.f32 %v2146_v53, %v2196_v39  ;;  %v2273_v11 = vadd.f32 %v2146_v53, %v580_v14  ;;  %v2280_v16 = vadd.f32 %v2146_v53, %v644_v15  ;;  %v1396_v2 = vld [vmem:[#allocation2 + $0xe0] sm:$0xff] }
 0x11d   : > { %v2275_v12 = vadd.f32 %v1218_v59, %v1150_v6  ;;  %v2277_v58 = vadd.f32 %v1517_v60, %v1449_v7  ;;  %v2283_v20 = vadd.f32 %v2146_v53, %v583_v40  ;;  %v588_v24 = vpop.f32.mrb[12].mxu0  ;;  %v652_v38 = vpop.f32.mrb[12].mxu1  ;;  %v2285_v25 = vadd.f32 %v936_v8, %v836_v1  ;;  %749 = vst [vmem:[#allocation2 + $0x39] sm:$0xff] %v2266_v10  ;;  %v1496_v6 = vld [vmem:[#allocation2 + $0xe1] sm:$0xff] }
 0x11e   : > { %3203 = vst [vmem:[#allocation15_spill] sm:$0xff] %v2270_v3  ;;  %3204 = vst [vmem:[#allocation16_spill] sm:$0xff] %v2273_v11  ;;  %v2287_v26 = vadd.f32 %v1234_v4, %v1166_v9  ;;  %v2290_v39 = vmul.f32 %v2171_v21, %v800_v37  ;;  %v2294_v59 = vmul.f32 %v2166_v18, %v2183_v29  ;;  %v590_v60 = vpop.f32.mrb[13].mxu0  ;;  %v654_v14 = vpop.f32.mrb[13].mxu1  ;;  %v1596_v7 = vld [vmem:[#allocation2 + $0xe2] sm:$0xff] }
 0x11f   : > { %3205 = vst [vmem:[#allocation17_spill] sm:$0xff] %v2280_v16  ;;  %3206 = vst [vmem:[#allocation18_spill] sm:$0xff] %v2283_v20  ;;  %v921_v8 = vmul.f32 %v2141_v51, %v2266_v10  ;;  %v2303_v15 = vmul.f32 %v2164_v17, %v2266_v10  ;;  %v2307_v27 = vmul.f32 %v2166_v18, %v2266_v10  ;;  %v591_v31 = vpop.f32.mrb[14].mxu0  ;;  %v655_v32 = vpop.f32.mrb[14].mxu1 }
 0x120   : > { %3207 = vst [vmem:[#allocation19_spill] sm:$0xff] %v2290_v39  ;;  %3208 = vst [vmem:[#allocation20_spill] sm:$0xff] %v2294_v59  ;;  %v2311_v30 = vmul.f32 %v2141_v51, %v2270_v3  ;;  %v2317_v34 = vmul.f32 %v2164_v17, %v2270_v3  ;;  %v2321_v37 = vmul.f32 %v2166_v18, %v2270_v3  ;;  %v593_v43 = vpop.f32.mrb[15].mxu0  ;;  %v657_v49 = vpop.f32.mrb[15].mxu1 }
 0x121   : > { %765 = vst [vmem:[#allocation2 + $0xf9] sm:$0xff] %v2270_v3  ;;  %750 = vst [vmem:[#allocation2 + $0x49] sm:$0xff] %v2273_v11  ;;  %v2325_v40 = vmul.f32 %v2141_v51, %v2273_v11  ;;  %v2329_v44 = vmul.f32 %v2164_v17, %v2273_v11  ;;  %v2333_v52 = vmul.f32 %v2166_v18, %v2273_v11 }
 0x122   : > { %766 = vst [vmem:[#allocation2 + $0x109] sm:$0xff] %v2280_v16  ;;  %751 = vst [vmem:[#allocation2 + $0x51] sm:$0xff] %v2283_v20  ;;  %v2337_v57 = vmul.f32 %v2141_v51, %v2280_v16  ;;  %v2341_v62 = vmul.f32 %v2164_v17, %v2280_v16  ;;  %v2345_v1 = vmul.f32 %v2166_v18, %v2280_v16 }
 0x123   : > { %3209 = vst [vmem:[#allocation21_spill] sm:$0xff] %v2321_v37  ;;  %v2348_v4 = vadd.f32 %v2146_v53, %v647_v41  ;;  %v2351_v9 = vadd.f32 %v2146_v53, %v588_v24  ;;  %v2354_v60 = vadd.f32 %v2146_v53, %v652_v38  ;;  %v2357_v14 = vadd.f32 %v2146_v53, %v591_v31 }
 0x124   : > { %v2361_v43 = vmul.f32 %v2141_v51, %v2283_v20  ;;  %v2365_v49 = vmul.f32 %v2164_v17, %v2283_v20  ;;  %v2369_v41 = vmul.f32 %v2166_v18, %v2283_v20  ;;  %v2372_v24 = vadd.f32 %v2146_v53, %v655_v32  ;;  %v785_v59 = vld [vmem:[#allocation2 + $0x38] sm:$0xff] }
 0x125   : > { %3210 = vst [vmem:[#allocation22_spill] sm:$0xff] %v2348_v4  ;;  %3211 = vst [vmem:[#allocation23_spill] sm:$0xff] %v2351_v9  ;;  %v2377_v38 = vmul.f32 %v2141_v51, %v2348_v4  ;;  %v2383_v31 = vmul.f32 %v2171_v21, %v1396_v2  ;;  %v2386_v37 = vmul.f32 %v2166_v18, %v1496_v6  ;;  %v984_v39 = vld [vmem:[#allocation2 + $0x32] sm:$0xff]  ;;  %v985_v0 = vld [vmem:[#allocation2 + $0x3a] sm:$0xff] }
 0x126   : > { %3212 = vst [vmem:[#allocation24_spill] sm:$0xff] %v2372_v24  ;;  %767 = vst [vmem:[#allocation2 + $0x111] sm:$0xff] %v2348_v4  ;;  %v2389_v32 = vmul.f32 %v2235_v22, %v1596_v7  ;;  %v2393_v55 = vmul.f32 %v2164_v17, %v2348_v4  ;;  %v2397_v45 = vmul.f32 %v2166_v18, %v2348_v4  ;;  %v2408_v7 = vpop.f32.mrb[16].mxu0 }
 0x127   : > { %752 = vst [vmem:[#allocation2 + $0x61] sm:$0xff] %v2351_v9  ;;  %768 = vst [vmem:[#allocation2 + $0x121] sm:$0xff] %v2354_v60  ;;  %v2401_v2 = vmul.f32 %v2141_v51, %v2351_v9  ;;  %v2405_v6 = vmul.f32 %v2164_v17, %v2351_v9  ;;  %v2416_v50 = vmul.f32 %v2166_v18, %v2351_v9  ;;  %v598_v47 = vpop.f32.mrb[17].mxu0 }
 0x128   : > { %753 = vst [vmem:[#allocation2 + $0x69] sm:$0xff] %v2357_v14  ;;  %3213 = vst [vmem:[#allocation25_spill] sm:$0xff] %v2383_v31  ;;  %v1119_v31 = vmul.f32 %v2169_v19, %v785_v59  ;;  %v801_v36 = vld [vmem:[#allocation2 + $0xf8] sm:$0xff]  ;;  %v2420_v35 = vmul.f32 %v2141_v51, %v2354_v60  ;;  %v1020_v46 = vmul.f32 %v2150_v56, %v984_v39  ;;  %v2431_v9 = vpop.f32.mrb[18].mxu0 }
 0x129   : > { %3214 = vst [vmem:[#allocation26_spill] sm:$0xff] %v2386_v37  ;;  %3215 = vst [vmem:[#allocation27_spill] sm:$0xff] %v2389_v32  ;;  %v2410_v32 = vpop.f32.mrb[16].mxu1  ;;  %v821_v37 = vmul.f32 %v2139_v48, %v785_v59  ;;  %v1418_v4 = vmul.f32 %v2171_v21, %v785_v59  ;;  %v1617_v16 = vmul.f32 %v2235_v22, %v984_v39  ;;  %v1000_v20 = vld [vmem:[#allocation2 + $0xf2] sm:$0xff] }
 0x12a   : > { %769 = vst [vmem:[#allocation2 + $0x129] sm:$0xff] %v2372_v24  ;;  %3216 = vst [vmem:[#allocation28_spill] sm:$0xff] %v2408_v7  ;;  %v662_v33 = vpop.f32.mrb[17].mxu1  ;;  %v2429_v53 = vmul.f32 %v2164_v17, %v2354_v60  ;;  %v1021_v47 = vmul.f32 %v2150_v56, %v985_v0  ;;  %v1318_v59 = vmul.f32 %v2173_v23, %v984_v39  ;;  %v2441_v24 = vld [vmem:[%s3164_s4] ss:$0 sm:$0xff] }
 0x12b   : > { %3217 = vst [vmem:[#allocation29_spill] sm:$0xff] %v2410_v32  ;;  %3218 = vst [vmem:[#allocation30_spill] sm:$0xff] %v2416_v50  ;;  %v2425_v32 = vld [vmem:[#allocation2 + $0xfa] sm:$0xff]  ;;  %v2433_v7 = vpop.f32.mrb[18].mxu1  ;;  %v953_v11 = vadd.f32 %v921_v8, %v821_v37  ;;  %v1151_v33 = vadd.f32 %v1119_v31, %v2240_v42  ;;  %v601_v50 = vpop.f32.mrb[19].mxu0  ;;  %v1649_v8 = vadd.f32 %v1617_v16, %v2277_v58 }
 0x12c   : > { %3219 = vst [vmem:[#allocation31_spill] sm:$0xff] %v2429_v53  ;;  %3220 = vst [vmem:[#allocation32_spill] sm:$0xff] %v2431_v9  ;;  %v665_v17 = vpop.f32.mrb[19].mxu1  ;;  %v1319_v53 = vmul.f32 %v2173_v23, %v985_v0  ;;  %v1450_v9 = vadd.f32 %v1418_v4, %v2253_v63  ;;  %v837_v37 = vmul.f32 %v2139_v48, %v801_v36 }
 0x12d   : > { %3221 = vst [vmem:[#allocation33_spill] sm:$0xff] %v2433_v7  ;;  %v1251_v42 = vadd.f32 %v2303_v15, %v1151_v33  ;;  %v1618_v39 = vmul.f32 %v2235_v22, %v985_v0  ;;  %v1036_v31 = vmul.f32 %v2150_v56, %v1000_v20  ;;  %v1037_v7 = vmul.f32 %v2150_v56, %v2425_v32  ;;  %v2472_v18 = vpop.f32.mrb[20].mxu1 }
 0x12e   : > { %v1550_v50 = vadd.f32 %v2307_v27, %v1450_v9  ;;  %v1688_v17 = vadd.f32 %v2441_v24, %v1649_v8  ;;  %v969_v3 = vadd.f32 %v2311_v30, %v837_v37  ;;  %v1135_v63 = vmul.f32 %v2169_v19, %v801_v36  ;;  %v786_v27 = vld [vmem:[#allocation2 + $0x48] sm:$0xff]  ;;  %v2470_v37 = vpop.f32.mrb[20].mxu0 }
 0x12f   : > { %v1052_v0 = vadd.f32 %v1020_v46, %v2260_v5  ;;  %v1053_v58 = vadd.f32 %v1021_v47, %v953_v11  ;;  %v1350_v16 = vadd.f32 %v1318_v59, %v2275_v12  ;;  %v1334_v15 = vmul.f32 %v2173_v23, %v1000_v20  ;;  %v802_v8 = vld [vmem:[#allocation2 + $0x108] sm:$0xff]  ;;  %v606_v12 = vpop.f32.mrb[21].mxu0  ;;  %v670_v47 = vpop.f32.mrb[21].mxu1 }
 0x130   : > { %v2466_v4 = vadd.f32 %v1319_v53, %v1251_v42  ;;  %v1650_v30 = vadd.f32 %v1618_v39, %v1550_v50  ;;  %v1720_v9 = vmax.f32 %v2154_v61, %v1688_v17  ;;  %v1167_v33 = vadd.f32 %v1135_v63, %v2246_v54  ;;  %v986_v50 = vld [vmem:[#allocation2 + $0x4a] sm:$0xff] }
 0x131   : > { %v1068_v46 = vadd.f32 %v1036_v31, %v2285_v25  ;;  %v2475_v5 = vadd.f32 %v1037_v7, %v969_v3  ;;  %v1335_v11 = vmul.f32 %v2173_v23, %v2425_v32  ;;  %v1366_v53 = vadd.f32 %v1334_v15, %v2287_v26  ;;  %v2487_v25 = vpop.f32.mrb[22].mxu0  ;;  %v2489_v3 = vpop.f32.mrb[22].mxu1 }
 0x132   : > { %v1689_v61 = vadd.f32 %v2441_v24, %v1650_v30  ;;  %1752 = vst [vmem:[%s2461_s30] sm:$0xff] %v1720_v9  ;;  %v2483_v54 = vmul.f32 %v2171_v21, %v801_v36  ;;  %v822_v59 = vmul.f32 %v2139_v48, %v786_v27  ;;  %v1120_v42 = vmul.f32 %v2169_v19, %v786_v27  ;;  %v787_v36 = vld [vmem:[#allocation2 + $0x50] sm:$0xff]  ;;  %v609_v17 = vpop.f32.mrb[23].mxu0  ;;  %v673_v63 = vpop.f32.mrb[23].mxu1 }
 0x133   : > { %3223 = vst [vmem:[#allocation35_spill] sm:$0xff] %v2489_v3  ;;  %v2492_v7 = vmul.f32 %v2235_v22, %v1000_v20  ;;  %v1419_v26 = vmul.f32 %v2171_v21, %v786_v27  ;;  %v1136_v39 = vmul.f32 %v2169_v19, %v802_v8  ;;  %v1435_v31 = vmul.f32 %v2171_v21, %v802_v8 }
 0x134   : > { %3222 = vst [vmem:[#allocation34_spill] sm:$0xff] %v2483_v54  ;;  %v1721_v15 = vmax.f32 %v2160_v13, %v1689_v61  ;;  %v1267_v30 = vadd.f32 %v2317_v34, %v1167_v33  ;;  %v1152_v9 = vadd.f32 %v1120_v42, %v1052_v0  ;;  %v838_v12 = vmul.f32 %v2139_v48, %v802_v8  ;;  %v987_v54 = vld [vmem:[#allocation2 + $0x52] sm:$0xff] }
 0x135   : > { %3224 = vst [vmem:[#allocation36_spill] sm:$0xff] %v2492_v7  ;;  %v954_v20 = vadd.f32 %v2325_v40, %v822_v59  ;;  %v1451_v47 = vadd.f32 %v1419_v26, %v1350_v16  ;;  %v1168_v27 = vadd.f32 %v1136_v39, %v1068_v46  ;;  %v1467_v7 = vadd.f32 %v1435_v31, %v1366_v53  ;;  %v803_v8 = vld [vmem:[#allocation2 + $0x110] sm:$0xff]  ;;  %v2516_v59 = vpop.f32.mrb[24].mxu0  ;;  %v2518_v42 = vpop.f32.mrb[24].mxu1 }
 0x136   : > { %1753 = vst [vmem:[%s2461_s30 + $0x8] sm:$0xff] %v1721_v15  ;;  %v2504_v3 = vmul.f32 %v2235_v22, %v2425_v32  ;;  %v1252_v17 = vadd.f32 %v2329_v44, %v1152_v9  ;;  %v823_v13 = vmul.f32 %v2139_v48, %v787_v36  ;;  %v1022_v34 = vmul.f32 %v2150_v56, %v986_v50  ;;  %v1002_v46 = vld [vmem:[#allocation2 + $0x10a] sm:$0xff]  ;;  %v614_v39 = vpop.f32.mrb[25].mxu0  ;;  %v678_v31 = vpop.f32.mrb[25].mxu1 }
 0x137   : > { %v1551_v0 = vadd.f32 %v2333_v52, %v1451_v47  ;;  %v1268_v33 = vadd.f32 %v2341_v62, %v1168_v27  ;;  %v1567_v40 = vadd.f32 %v2345_v1, %v1467_v7  ;;  %v1121_v16 = vmul.f32 %v2169_v19, %v787_v36  ;;  %3226 = vst [vmem:[#allocation38_spill] sm:$0xff] %v2518_v42  ;;  %v1003_v7 = vld [vmem:[#allocation2 + $0x112] sm:$0xff]  ;;  %v2526_v15 = vpop.f32.mrb[26].mxu0 }
 0x138   : > { %3225 = vst [vmem:[#allocation37_spill] sm:$0xff] %v2504_v3  ;;  %v1367_v53 = vadd.f32 %v1335_v11, %v1267_v30  ;;  %v970_v32 = vadd.f32 %v2337_v57, %v838_v12  ;;  %v955_v61 = vadd.f32 %v2361_v43, %v823_v13  ;;  %v1023_v44 = vmul.f32 %v2150_v56, %v987_v54  ;;  %v2528_v30 = vpop.f32.mrb[26].mxu1 }
 0x139   : > { %v1054_v52 = vadd.f32 %v1022_v34, %v954_v20  ;;  %v1153_v26 = vadd.f32 %v1121_v16, %v1053_v58  ;;  %v1420_v62 = vmul.f32 %v2171_v21, %v787_v36  ;;  %v1619_v1 = vmul.f32 %v2235_v22, %v986_v50  ;;  %3227 = vst [vmem:[#allocation39_spill] sm:$0xff] %v2526_v15  ;;  %v617_v20 = vpop.f32.mrb[27].mxu0  ;;  %v681_v47 = vpop.f32.mrb[27].mxu1 }
 0x13a   : > { %v1320_v11 = vmul.f32 %v2173_v23, %v986_v50  ;;  %v1321_v57 = vmul.f32 %v2173_v23, %v987_v54  ;;  %v839_v43 = vmul.f32 %v2139_v48, %v803_v8  ;;  %v1038_v63 = vmul.f32 %v2150_v56, %v1002_v46  ;;  %3228 = vst [vmem:[#allocation40_spill] sm:$0xff] %v2528_v30  ;;  %v789_v20 = vld [vmem:[#allocation2 + $0x68] sm:$0xff] }
 0x13b   : > { %v1253_v58 = vadd.f32 %v2365_v49, %v1153_v26  ;;  %v1452_v36 = vadd.f32 %v1420_v62, %v2466_v4  ;;  %v1620_v9 = vmul.f32 %v2235_v22, %v987_v54  ;;  %v1651_v12 = vadd.f32 %v1619_v1, %v1551_v0  ;;  %v788_v4 = vld [vmem:[#allocation2 + $0x60] sm:$0xff] }
 0x13c   : > { %v2533_v50 = vadd.f32 %v1023_v44, %v955_v61  ;;  %v1352_v27 = vadd.f32 %v1320_v11, %v1252_v17  ;;  %v1039_v13 = vmul.f32 %v2150_v56, %v1003_v7  ;;  %v1137_v34 = vmul.f32 %v2169_v19, %v803_v8  ;;  %v804_v61 = vld [vmem:[#allocation2 + $0x120] sm:$0xff] }
 0x13d   : > { %v1552_v16 = vadd.f32 %v2369_v41, %v1452_v36  ;;  %v1690_v39 = vadd.f32 %v2441_v24, %v1651_v12  ;;  %v971_v49 = vadd.f32 %v2377_v38, %v839_v43  ;;  %v1070_v26 = vadd.f32 %v1038_v63, %v970_v32  ;;  %v2553_v43 = vpop.f32.mrb[28].mxu1 }
 0x13e   : > { %v2540_v62 = vadd.f32 %v1321_v57, %v1253_v58  ;;  %v1169_v54 = vadd.f32 %v1137_v34, %v2475_v5  ;;  %v1336_v0 = vmul.f32 %v2173_v23, %v1002_v46  ;;  %v1436_v17 = vmul.f32 %v2171_v21, %v803_v8  ;;  %v2551_v5 = vpop.f32.mrb[28].mxu0  ;;  %3230 = vst [vmem:[#allocation42_spill] sm:$0xff] %v2553_v43  ;;  %v686_v36 = vpop.f32.mrb[29].mxu1 }
 0x13f   : > { %v1652_v44 = vadd.f32 %v1620_v9, %v1552_v16  ;;  %v1722_v1 = vmax.f32 %v2180_v28, %v1690_v39  ;;  %v1337_v41 = vmul.f32 %v2173_v23, %v1003_v7  ;;  %v1635_v31 = vmul.f32 %v2235_v22, %v1002_v46  ;;  %3229 = vst [vmem:[#allocation41_spill] sm:$0xff] %v2551_v5  ;;  %v622_v46 = vpop.f32.mrb[29].mxu0  ;;  %v2565_v34 = vpop.f32.mrb[30].mxu1 }
 0x140   : > { %v1269_v38 = vadd.f32 %v2393_v55, %v1169_v54  ;;  %v1468_v32 = vadd.f32 %v1436_v17, %v1367_v53  ;;  %v824_v11 = vmul.f32 %v2139_v48, %v788_v4  ;;  %v1122_v57 = vmul.f32 %v2169_v19, %v788_v4  ;;  %v2563_v47 = vpop.f32.mrb[30].mxu0  ;;  %3232 = vst [vmem:[#allocation44_spill] sm:$0xff] %v2565_v34  ;;  %v3236_v46 = vld [vmem:[#allocation31_spill] sm:$0xff] }
 0x141   : > { %v1691_v8 = vadd.f32 %v2441_v24, %v1652_v44  ;;  %1754 = vst [vmem:[%s2461_s30 + $0x10] sm:$0xff] %v1722_v1  ;;  %v1667_v63 = vadd.f32 %v1635_v31, %v1567_v40  ;;  %v1421_v28 = vmul.f32 %v2171_v21, %v788_v4  ;;  %v840_v58 = vmul.f32 %v2139_v48, %v804_v61 }
 0x142   : > { %v2559_v55 = vadd.f32 %v1039_v13, %v971_v49  ;;  %v1368_v53 = vadd.f32 %v1336_v0, %v1268_v33  ;;  %v1568_v9 = vadd.f32 %v2397_v45, %v1468_v32  ;;  %v1636_v12 = vmul.f32 %v2235_v22, %v1003_v7  ;;  %3231 = vst [vmem:[#allocation43_spill] sm:$0xff] %v2563_v47  ;;  %v625_v13 = vpop.f32.mrb[31].mxu0  ;;  %v689_v49 = vpop.f32.mrb[31].mxu1  ;;  %v988_v0 = vld [vmem:[#allocation2 + $0x62] sm:$0xff] }
 0x143   : > { %v1723_v40 = vmax.f32 %v2266_v10, %v1691_v8  ;;  %v2568_v16 = vadd.f32 %v1337_v41, %v1269_v38  ;;  %v1706_v39 = vadd.f32 %v2441_v24, %v1667_v63  ;;  %v1154_v4 = vadd.f32 %v1122_v57, %v1054_v52  ;;  %v989_v52 = vld [vmem:[#allocation2 + $0x6a] sm:$0xff] }
 0x144   : > { %v1668_v33 = vadd.f32 %v1636_v12, %v1568_v9  ;;  %v1453_v45 = vadd.f32 %v1421_v28, %v1352_v27  ;;  %v1138_v54 = vmul.f32 %v2169_v19, %v804_v61  ;;  %v1437_v7 = vmul.f32 %v2171_v21, %v804_v61  ;;  %v3235_v8 = vld [vmem:[#allocation30_spill] sm:$0xff]  ;;  %v3237_v9 = vld [vmem:[#allocation4_spill] sm:$0xff] }
 0x145   : > { %1755 = vst [vmem:[%s2461_s30 + $0x18] sm:$0xff] %v1723_v40  ;;  %v1738_v17 = vmax.f32 %v2183_v29, %v1706_v39  ;;  %v956_v10 = vadd.f32 %v2401_v2, %v824_v11  ;;  %v972_v44 = vadd.f32 %v2420_v35, %v840_v58  ;;  %v825_v1 = vmul.f32 %v2139_v48, %v789_v20  ;;  %v3233_v29 = vld [vmem:[#allocation5_spill] sm:$0xff]  ;;  %v3234_v11 = vld [vmem:[#allocation15_spill] sm:$0xff]  ;;  %v805_v58 = vld [vmem:[#allocation2 + $0x128] sm:$0xff] }
 0x146   : > { %v1707_v41 = vadd.f32 %v2441_v24, %v1668_v33  ;;  %v1170_v31 = vadd.f32 %v1138_v54, %v1070_v26  ;;  %v1469_v38 = vadd.f32 %v1437_v7, %v1368_v53  ;;  %v925_v27 = vmul.f32 %v2141_v51, %v2357_v14  ;;  %v1004_v40 = vld [vmem:[#allocation2 + $0x122] sm:$0xff]  ;;  %v1005_v7 = vld [vmem:[#allocation2 + $0x12a] sm:$0xff] }
 0x147   : > { %1770 = vst [vmem:[%s2461_s30 + $0x90] sm:$0xff] %v1738_v17  ;;  %v1254_v61 = vadd.f32 %v2405_v6, %v1154_v4  ;;  %v1537_v32 = vmul.f32 %v3233_v29, %v2354_v60  ;;  %v1024_v2 = vmul.f32 %v2150_v56, %v988_v0  ;;  %v1123_v35 = vmul.f32 %v2169_v19, %v789_v20 }
 0x148   : > { %v1739_v57 = vmax.f32 %v3234_v11, %v1707_v41  ;;  %v1553_v63 = vadd.f32 %v3235_v8, %v1453_v45  ;;  %v957_v26 = vadd.f32 %v925_v27, %v825_v1  ;;  %v1025_v28 = vmul.f32 %v2150_v56, %v989_v52 }
 0x149   : > { %v1270_v36 = vadd.f32 %v3236_v46, %v1170_v31  ;;  %v1569_v53 = vadd.f32 %v1537_v32, %v1469_v38  ;;  %v1155_v6 = vadd.f32 %v1123_v35, %v2533_v50  ;;  %v1223_v12 = vmul.f32 %v3237_v9, %v2357_v14 }
 0x14a   : > { %1771 = vst [vmem:[%s2461_s30 + $0x98] sm:$0xff] %v1739_v57  ;;  %v2595_v39 = vadd.f32 %v1024_v2, %v956_v10  ;;  %v1322_v4 = vmul.f32 %v2173_v23, %v988_v0  ;;  %v1422_v13 = vmul.f32 %v2171_v21, %v789_v20  ;;  %v1621_v49 = vmul.f32 %v2235_v22, %v988_v0  ;;  %v3238_v0 = vld [vmem:[#allocation24_spill] sm:$0xff] }
 0x14b   : > { %v2600_v33 = vadd.f32 %v1025_v28, %v957_v26  ;;  %v1255_v45 = vadd.f32 %v1223_v12, %v1155_v6  ;;  %v1323_v54 = vmul.f32 %v2173_v23, %v989_v52  ;;  %v841_v50 = vmul.f32 %v2139_v48, %v805_v58 }
 0x14c   : > { %v1454_v17 = vadd.f32 %v1422_v13, %v2540_v62  ;;  %v1522_v10 = vmul.f32 %v3233_v29, %v2357_v14  ;;  %v1653_v1 = vadd.f32 %v1621_v49, %v1553_v63  ;;  %v1040_v41 = vmul.f32 %v2150_v56, %v1004_v40  ;;  %v3239_v63 = vld [vmem:[#allocation16_spill] sm:$0xff] }
 0x14d   : > { %v2608_v31 = vadd.f32 %v1322_v4, %v1254_v61  ;;  %v1622_v20 = vmul.f32 %v2235_v22, %v989_v52  ;;  %v941_v38 = vmul.f32 %v2141_v51, %v3238_v0  ;;  %v1139_v27 = vmul.f32 %v2169_v19, %v805_v58  ;;  %v3240_v49 = vld [vmem:[#allocation28_spill] sm:$0xff] }
 0x14e   : > { %v2614_v32 = vadd.f32 %v1323_v54, %v1255_v45  ;;  %v1554_v2 = vadd.f32 %v1522_v10, %v1454_v17  ;;  %v1692_v62 = vadd.f32 %v2441_v24, %v1653_v1  ;;  %v1041_v35 = vmul.f32 %v2150_v56, %v1005_v7  ;;  %v3241_v45 = vld [vmem:[#allocation3_spill] sm:$0xff]  ;;  %v3244_v1 = vld [vmem:[#allocation32_spill] sm:$0xff] }
 0x14f   : > { %v973_v11 = vadd.f32 %v941_v38, %v841_v50  ;;  %v1171_v57 = vadd.f32 %v1139_v27, %v2559_v55  ;;  %v1239_v61 = vmul.f32 %v3237_v9, %v3238_v0  ;;  %v1438_v52 = vmul.f32 %v2171_v21, %v805_v58 }
 0x150   : > { %v1654_v8 = vadd.f32 %v1622_v20, %v1554_v2  ;;  %v1724_v26 = vmax.f32 %v3239_v63, %v1692_v62  ;;  %v2623_v28 = vadd.f32 %v1040_v41, %v972_v44  ;;  %v1338_v46 = vmul.f32 %v2173_v23, %v1004_v40  ;;  %v3242_v44 = vld [vmem:[#allocation29_spill] sm:$0xff]  ;;  %v3245_v41 = vld [vmem:[#allocation18_spill] sm:$0xff] }
 0x151   : > { %v1271_v6 = vadd.f32 %v1239_v61, %v1171_v57  ;;  %v1470_v12 = vadd.f32 %v1438_v52, %v2568_v16  ;;  %v1538_v4 = vmul.f32 %v3233_v29, %v3238_v0  ;;  %v1637_v55 = vmul.f32 %v2235_v22, %v1004_v40 }
 0x152   : > { %v1693_v13 = vadd.f32 %v2441_v24, %v1654_v8  ;;  %1756 = vst [vmem:[%s2461_s30 + $0x20] sm:$0xff] %v1724_v26  ;;  %v1339_v58 = vmul.f32 %v2173_v23, %v1005_v7  ;;  %v2635_v54 = vadd.f32 %v3241_v45, %v3240_v49  ;;  %v2639_v50 = vadd.f32 %v3241_v45, %v3242_v44  ;;  %v3246_v8 = vld [vmem:[#allocation17_spill] sm:$0xff]  ;;  %v3252_v49 = vld [vmem:[#allocation22_spill] sm:$0xff] }
 0x153   : > { %v1570_v16 = vadd.f32 %v1538_v4, %v1470_v12  ;;  %v1638_v17 = vmul.f32 %v2235_v22, %v1005_v7  ;;  %v1669_v10 = vadd.f32 %v1637_v55, %v1569_v53  ;;  %v2644_v40 = vadd.f32 %v3241_v45, %v3244_v1  ;;  %v3247_v26 = vld [vmem:[#allocation33_spill] sm:$0xff]  ;;  %v3250_v55 = vld [vmem:[#allocation35_spill] sm:$0xff] }
 0x154   : > { %3243 = vst [vmem:[#allocation5_spill] sm:$0xff] %v2639_v50  ;;  %v1725_v20 = vmax.f32 %v3245_v41, %v1693_v13  ;;  %v2647_v38 = vadd.f32 %v1041_v35, %v973_v11  ;;  %v1370_v27 = vadd.f32 %v1338_v46, %v1270_v36  ;;  %v2649_v2 = vadd.f32 %v1339_v58, %v1271_v6 }
 0x155   : > { %754 = vst [vmem:[#allocation2 + $0x79] sm:$0xff] %v2635_v54  ;;  %770 = vst [vmem:[#allocation2 + $0x139] sm:$0xff] %v2639_v50  ;;  %v1670_v62 = vadd.f32 %v1638_v17, %v1570_v16  ;;  %v1708_v57 = vadd.f32 %v2441_v24, %v1669_v10  ;;  %v926_v53 = vmul.f32 %v2141_v51, %v2635_v54 }
 0x156   : > { %v1224_v7 = vmul.f32 %v3237_v9, %v2635_v54  ;;  %755 = vst [vmem:[#allocation2 + $0x81] sm:$0xff] %v2644_v40  ;;  %1757 = vst [vmem:[%s2461_s30 + $0x28] sm:$0xff] %v1725_v20  ;;  %v1523_v36 = vmul.f32 %v3233_v29, %v2635_v54  ;;  %v942_v35 = vmul.f32 %v2141_v51, %v2639_v50 }
 0x157   : > { %v1240_v11 = vmul.f32 %v3237_v9, %v2639_v50  ;;  %v1539_v61 = vmul.f32 %v3233_v29, %v2639_v50  ;;  %v1709_v52 = vadd.f32 %v2441_v24, %v1670_v62  ;;  %v1740_v63 = vmax.f32 %v3246_v8, %v1708_v57 }
 0x158   : > { %v2672_v46 = vadd.f32 %v3241_v45, %v3247_v26  ;;  %v2676_v6 = vadd.f32 %v3241_v45, %v2470_v37  ;;  %v2680_v12 = vadd.f32 %v3241_v45, %v2472_v18  ;;  %v2684_v4 = vadd.f32 %v3241_v45, %v2487_v25 }
 0x159   : > { %v2688_v13 = vadd.f32 %v3241_v45, %v3250_v55  ;;  %v2692_v58 = vadd.f32 %v3241_v45, %v2516_v59  ;;  %v1741_v37 = vmax.f32 %v3252_v49, %v1709_v52  ;;  %1772 = vst [vmem:[%s2461_s30 + $0xa0] sm:$0xff] %v1740_v63  ;;  %v927_v18 = vmul.f32 %v2141_v51, %v2644_v40 }
 0x15a   : > { %3248 = vst [vmem:[#allocation15_spill] sm:$0xff] %v2672_v46  ;;  %3249 = vst [vmem:[#allocation30_spill] sm:$0xff] %v2676_v6  ;;  %v1225_v44 = vmul.f32 %v3237_v9, %v2644_v40  ;;  %v2702_v25 = vmul.f32 %v3233_v29, %v2644_v40  ;;  %v2708_v59 = vmul.f32 %v2141_v51, %v2672_v46 }
 0x15b   : > { %3251 = vst [vmem:[#allocation31_spill] sm:$0xff] %v2692_v58  ;;  %771 = vst [vmem:[#allocation2 + $0x141] sm:$0xff] %v2672_v46  ;;  %v2712_v45 = vmul.f32 %v3237_v9, %v2672_v46  ;;  %v2716_v16 = vmul.f32 %v3233_v29, %v2672_v46  ;;  %v2720_v17 = vmul.f32 %v2141_v51, %v2676_v6 }
 0x15c   : > { %756 = vst [vmem:[#allocation2 + $0x91] sm:$0xff] %v2676_v6  ;;  %772 = vst [vmem:[#allocation2 + $0x151] sm:$0xff] %v2680_v12  ;;  %v790_v10 = vld [vmem:[#allocation2 + $0x78] sm:$0xff]  ;;  %v2729_v41 = vmul.f32 %v3237_v9, %v2676_v6  ;;  %v2733_v20 = vmul.f32 %v3233_v29, %v2676_v6  ;;  %v2737_v62 = vmul.f32 %v2141_v51, %v2680_v12 }
 0x15d   : > { %757 = vst [vmem:[#allocation2 + $0x99] sm:$0xff] %v2684_v4  ;;  %773 = vst [vmem:[#allocation2 + $0x159] sm:$0xff] %v2688_v13  ;;  %v806_v1 = vld [vmem:[#allocation2 + $0x138] sm:$0xff]  ;;  %v2741_v57 = vmul.f32 %v3237_v9, %v2680_v12  ;;  %v826_v52 = vmul.f32 %v2139_v48, %v790_v10  ;;  %v1124_v8 = vmul.f32 %v2169_v19, %v790_v10  ;;  %v791_v55 = vld [vmem:[#allocation2 + $0x80] sm:$0xff] }
 0x15e   : > { %758 = vst [vmem:[#allocation2 + $0xa9] sm:$0xff] %v2692_v58  ;;  %1773 = vst [vmem:[%s2461_s30 + $0xa8] sm:$0xff] %v1741_v37  ;;  %v1423_v63 = vmul.f32 %v2171_v21, %v790_v10  ;;  %v842_v26 = vmul.f32 %v2139_v48, %v806_v1  ;;  %v990_v49 = vld [vmem:[#allocation2 + $0x7a] sm:$0xff]  ;;  %v1140_v37 = vmul.f32 %v2169_v19, %v806_v1  ;;  %v991_v5 = vld [vmem:[#allocation2 + $0x82] sm:$0xff] }
 0x15f   : > { %v1439_v3 = vmul.f32 %v2171_v21, %v806_v1  ;;  %v827_v6 = vmul.f32 %v2139_v48, %v791_v55  ;;  %v1026_v34 = vmul.f32 %v2150_v56, %v990_v49  ;;  %v958_v47 = vadd.f32 %v926_v53, %v826_v52 }
 0x160   : > { %v1156_v43 = vadd.f32 %v1124_v8, %v2595_v39  ;;  %v1455_v46 = vadd.f32 %v1423_v63, %v2608_v31  ;;  %v2755_v10 = vmul.f32 %v3233_v29, %v2680_v12  ;;  %v1172_v30 = vadd.f32 %v1140_v37, %v2623_v28 }
 0x161   : > { %v1471_v50 = vadd.f32 %v1439_v3, %v1370_v27  ;;  %v959_v15 = vadd.f32 %v927_v18, %v827_v6  ;;  %v2760_v1 = vmul.f32 %v2141_v51, %v2684_v4  ;;  %v974_v58 = vadd.f32 %v942_v35, %v842_v26 }
 0x162   : > { %v1555_v42 = vadd.f32 %v1523_v36, %v1455_v46  ;;  %v1125_v53 = vmul.f32 %v2169_v19, %v791_v55  ;;  %v807_v39 = vld [vmem:[#allocation2 + $0x140] sm:$0xff]  ;;  %v2765_v31 = vmul.f32 %v3237_v9, %v2684_v4  ;;  %v1256_v8 = vadd.f32 %v1224_v7, %v1156_v43 }
 0x163   : > { %v1006_v52 = vld [vmem:[#allocation2 + $0x13a] sm:$0xff]  ;;  %v1571_v63 = vadd.f32 %v1539_v61, %v1471_v50  ;;  %v1027_v28 = vmul.f32 %v2150_v56, %v991_v5  ;;  %v1058_v3 = vadd.f32 %v1026_v34, %v958_v47  ;;  %v1272_v27 = vadd.f32 %v1240_v11, %v1172_v30  ;;  %v1007_v37 = vld [vmem:[#allocation2 + $0x142] sm:$0xff] }
 0x164   : > { %v1157_v6 = vadd.f32 %v1125_v53, %v2600_v33  ;;  %v1424_v18 = vmul.f32 %v2171_v21, %v791_v55  ;;  %v1623_v36 = vmul.f32 %v2235_v22, %v990_v49  ;;  %v1324_v46 = vmul.f32 %v2173_v23, %v990_v49  ;;  %v792_v53 = vld [vmem:[#allocation2 + $0x90] sm:$0xff] }
 0x165   : > { %v2771_v35 = vadd.f32 %v1027_v28, %v959_v15  ;;  %v843_v26 = vmul.f32 %v2139_v48, %v807_v39  ;;  %v1042_v43 = vmul.f32 %v2150_v56, %v1006_v52  ;;  %v1325_v7 = vmul.f32 %v2173_v23, %v991_v5 }
 0x166   : > { %v1257_v50 = vadd.f32 %v1225_v44, %v1157_v6  ;;  %v1456_v30 = vadd.f32 %v1424_v18, %v2614_v32  ;;  %v1655_v47 = vadd.f32 %v1623_v36, %v1555_v42  ;;  %v1356_v34 = vadd.f32 %v1324_v46, %v1256_v8  ;;  %v3253_v6 = vld [vmem:[#allocation23_spill] sm:$0xff] }
 0x167   : > { %v1624_v33 = vmul.f32 %v2235_v22, %v991_v5  ;;  %v1141_v11 = vmul.f32 %v2169_v19, %v807_v39  ;;  %v1340_v15 = vmul.f32 %v2173_v23, %v1006_v52  ;;  %v975_v49 = vadd.f32 %v2708_v59, %v843_v26  ;;  %v808_v46 = vld [vmem:[#allocation2 + $0x150] sm:$0xff] }
 0x168   : > { %v1556_v61 = vadd.f32 %v2702_v25, %v1456_v30  ;;  %v1694_v55 = vadd.f32 %v2441_v24, %v1655_v47  ;;  %v1043_v44 = vmul.f32 %v2150_v56, %v1007_v37  ;;  %v2785_v28 = vadd.f32 %v1325_v7, %v1257_v50  ;;  %v793_v47 = vld [vmem:[#allocation2 + $0x98] sm:$0xff] }
 0x169   : > { %v1074_v42 = vadd.f32 %v1042_v43, %v974_v58  ;;  %v1173_v32 = vadd.f32 %v1141_v11, %v2647_v38  ;;  %v1440_v5 = vmul.f32 %v2171_v21, %v807_v39  ;;  %v1341_v25 = vmul.f32 %v2173_v23, %v1007_v37 }
 0x16a   : > { %v1656_v8 = vadd.f32 %v1624_v33, %v1556_v61  ;;  %v1726_v18 = vmax.f32 %v3253_v6, %v1694_v55  ;;  %v1639_v36 = vmul.f32 %v2235_v22, %v1006_v52  ;;  %v1372_v59 = vadd.f32 %v1340_v15, %v1272_v27  ;;  %v992_v33 = vld [vmem:[#allocation2 + $0x92] sm:$0xff] }
 0x16b   : > { %v1472_v26 = vadd.f32 %v1440_v5, %v2649_v2  ;;  %v828_v30 = vmul.f32 %v2139_v48, %v792_v53  ;;  %v1126_v50 = vmul.f32 %v2169_v19, %v792_v53  ;;  %v1640_v38 = vmul.f32 %v2235_v22, %v1007_v37 }
 0x16c   : > { %v1695_v58 = vadd.f32 %v2441_v24, %v1656_v8  ;;  %1758 = vst [vmem:[%s2461_s30 + $0x30] sm:$0xff] %v1726_v18  ;;  %v1671_v39 = vadd.f32 %v1639_v36, %v1571_v63  ;;  %v1425_v43 = vmul.f32 %v2171_v21, %v792_v53  ;;  %v1273_v7 = vadd.f32 %v2712_v45, %v1173_v32 }
 0x16d   : > { %v1572_v52 = vadd.f32 %v2716_v16, %v1472_v26  ;;  %v1158_v27 = vadd.f32 %v1126_v50, %v1058_v3  ;;  %v844_v2 = vmul.f32 %v2139_v48, %v808_v46  ;;  %v960_v61 = vadd.f32 %v2720_v17, %v828_v30  ;;  %v993_v3 = vld [vmem:[#allocation2 + $0x9a] sm:$0xff] }
 0x16e   : > { %v1727_v11 = vmax.f32 %v2357_v14, %v1695_v58  ;;  %v1710_v15 = vadd.f32 %v2441_v24, %v1671_v39  ;;  %v1457_v37 = vadd.f32 %v1425_v43, %v1356_v34  ;;  %v1142_v45 = vmul.f32 %v2169_v19, %v808_v46  ;;  %v1009_v58 = vld [vmem:[#allocation2 + $0x15a] sm:$0xff] }
 0x16f   : > { %v1672_v63 = vadd.f32 %v1640_v38, %v1572_v52  ;;  %v1258_v55 = vadd.f32 %v2729_v41, %v1158_v27  ;;  %v1441_v16 = vmul.f32 %v2171_v21, %v808_v46  ;;  %v829_v14 = vmul.f32 %v2139_v48, %v793_v47  ;;  %v809_v46 = vld [vmem:[#allocation2 + $0x158] sm:$0xff] }
 0x170   : > { %1759 = vst [vmem:[%s2461_s30 + $0x38] sm:$0xff] %v1727_v11  ;;  %v1742_v53 = vmax.f32 %v2354_v60, %v1710_v15  ;;  %v1557_v32 = vadd.f32 %v2733_v20, %v1457_v37  ;;  %v1028_v5 = vmul.f32 %v2150_v56, %v992_v33  ;;  %v1075_v17 = vadd.f32 %v1043_v44, %v975_v49 }
 0x171   : > { %v1711_v34 = vadd.f32 %v2441_v24, %v1672_v63  ;;  %v1174_v8 = vadd.f32 %v1142_v45, %v1074_v42  ;;  %v1473_v6 = vadd.f32 %v1441_v16, %v1372_v59  ;;  %v1373_v41 = vadd.f32 %v1341_v25, %v1273_v7  ;;  %v1008_v42 = vld [vmem:[#allocation2 + $0x152] sm:$0xff]  ;;  %v794_v16 = vld [vmem:[#allocation2 + $0xa8] sm:$0xff] }
 0x172   : > { %1774 = vst [vmem:[%s2461_s30 + $0xb0] sm:$0xff] %v1742_v53  ;;  %v976_v18 = vadd.f32 %v2737_v62, %v844_v2  ;;  %v1029_v36 = vmul.f32 %v2150_v56, %v993_v3  ;;  %v1127_v60 = vmul.f32 %v2169_v19, %v793_v47  ;;  %v961_v44 = vadd.f32 %v2760_v1, %v829_v14 }
 0x173   : > { %v1743_v20 = vmax.f32 %v3238_v0, %v1711_v34  ;;  %v1274_v26 = vadd.f32 %v2741_v57, %v1174_v8  ;;  %v1573_v49 = vadd.f32 %v2755_v10, %v1473_v6  ;;  %v1060_v59 = vadd.f32 %v1028_v5, %v960_v61 }
 0x174   : > { %v1159_v25 = vadd.f32 %v1127_v60, %v2771_v35  ;;  %v1326_v30 = vmul.f32 %v2173_v23, %v992_v33  ;;  %v1426_v62 = vmul.f32 %v2171_v21, %v793_v47  ;;  %v1327_v50 = vmul.f32 %v2173_v23, %v993_v3 }
 0x175   : > { %1775 = vst [vmem:[%s2461_s30 + $0xb8] sm:$0xff] %v1743_v20  ;;  %v1526_v0 = vmul.f32 %v3233_v29, %v2684_v4  ;;  %v1625_v57 = vmul.f32 %v2235_v22, %v992_v33  ;;  %v845_v10 = vmul.f32 %v2139_v48, %v809_v46  ;;  %v945_v35 = vmul.f32 %v2141_v51, %v2688_v13 }
 0x176   : > { %v1259_v1 = vadd.f32 %v2765_v31, %v1159_v25  ;;  %v1458_v38 = vadd.f32 %v1426_v62, %v2785_v28  ;;  %v1044_v39 = vmul.f32 %v2150_v56, %v1008_v42  ;;  %v2836_v43 = vadd.f32 %v1029_v36, %v961_v44  ;;  %v3255_v62 = vld [vmem:[#allocation38_spill] sm:$0xff] }
 0x177   : > { %v1358_v7 = vadd.f32 %v1326_v30, %v1258_v55  ;;  %v1657_v52 = vadd.f32 %v1625_v57, %v1557_v32  ;;  %v1143_v27 = vmul.f32 %v2169_v19, %v809_v46  ;;  %v1626_v47 = vmul.f32 %v2235_v22, %v993_v3 }
 0x178   : > { %v1558_v2 = vadd.f32 %v1526_v0, %v1458_v38  ;;  %v977_v33 = vadd.f32 %v945_v35, %v845_v10  ;;  %v1045_v11 = vmul.f32 %v2150_v56, %v1009_v58  ;;  %v1243_v15 = vmul.f32 %v3237_v9, %v2688_v13  ;;  %v3257_v0 = vld [vmem:[#allocation39_spill] sm:$0xff]  ;;  %v3258_v10 = vld [vmem:[#allocation5_spill] sm:$0xff] }
 0x179   : > { %v1696_v31 = vadd.f32 %v2441_v24, %v1657_v52  ;;  %v1175_v28 = vadd.f32 %v1143_v27, %v1075_v17  ;;  %v1342_v61 = vmul.f32 %v2173_v23, %v1008_v42  ;;  %v2845_v37 = vadd.f32 %v1327_v50, %v1259_v1  ;;  %v3259_v1 = vld [vmem:[#allocation40_spill] sm:$0xff]  ;;  %v3261_v35 = vld [vmem:[#allocation41_spill] sm:$0xff] }
 0x17a   : > { %v1658_v63 = vadd.f32 %v1626_v47, %v1558_v2  ;;  %v2847_v55 = vadd.f32 %v1044_v39, %v976_v18  ;;  %v1442_v45 = vmul.f32 %v2171_v21, %v809_v46  ;;  %v1343_v32 = vmul.f32 %v2173_v23, %v1009_v58 }
 0x17b   : > { %v1728_v3 = vmax.f32 %v2635_v54, %v1696_v31  ;;  %v1275_v53 = vadd.f32 %v1243_v15, %v1175_v28  ;;  %v1641_v14 = vmul.f32 %v2235_v22, %v1008_v42  ;;  %v2854_v17 = vadd.f32 %v1045_v11, %v977_v33  ;;  %v3254_v42 = vld [vmem:[#allocation31_spill] sm:$0xff] }
 0x17c   : > { %v1697_v5 = vadd.f32 %v2441_v24, %v1658_v63  ;;  %v1474_v34 = vadd.f32 %v1442_v45, %v1373_v41  ;;  %v1542_v8 = vmul.f32 %v3233_v29, %v2688_v13  ;;  %v2859_v6 = vadd.f32 %v1342_v61, %v1274_v26  ;;  %v3262_v28 = vld [vmem:[#allocation15_spill] sm:$0xff] }
 0x17d   : > { %1760 = vst [vmem:[%s2461_s30 + $0x40] sm:$0xff] %v1728_v3  ;;  %v1642_v18 = vmul.f32 %v2235_v22, %v1009_v58  ;;  %v1673_v54 = vadd.f32 %v1641_v14, %v1573_v49  ;;  %v1128_v36 = vmul.f32 %v2169_v19, %v794_v16  ;;  %v830_v20 = vmul.f32 %v2139_v48, %v794_v16 }
 0x17e   : > { %v1729_v60 = vmax.f32 %v2644_v40, %v1697_v5  ;;  %v1574_v46 = vadd.f32 %v1542_v8, %v1474_v34  ;;  %v1427_v44 = vmul.f32 %v2171_v21, %v794_v16  ;;  %v930_v25 = vmul.f32 %v2141_v51, %v3254_v42  ;;  %v1997_v40 = vld [vmem:[%s3162_s2] ss:$0 sm:$0xff]  ;;  %v3265_v5 = vld [vmem:[#allocation43_spill] sm:$0xff] }
 0x17f   : > { %v1712_v41 = vadd.f32 %v2441_v24, %v1673_v54  ;;  %v1160_v30 = vadd.f32 %v1128_v36, %v1060_v59  ;;  %v1228_v26 = vmul.f32 %v3237_v9, %v3254_v42  ;;  %v2876_v50 = vadd.f32 %v1997_v40, %v3255_v62  ;;  %v1511_v16 = vld [vmem:[#allocation2 + $0x199] sm:$0xff] }
 0x180   : > { %1761 = vst [vmem:[%s2461_s30 + $0x48] sm:$0xff] %v1729_v60  ;;  %v1674_v22 = vadd.f32 %v1642_v18, %v1574_v46  ;;  %v1459_v49 = vadd.f32 %v1427_v44, %v1358_v7  ;;  %v2879_v57 = vadd.f32 %v1997_v40, %v3257_v0  ;;  %v1527_v59 = vmul.f32 %v3233_v29, %v3254_v42  ;;  %v3267_v36 = vld [vmem:[#allocation44_spill] sm:$0xff]  ;;  %v1512_v46 = vld [vmem:[#allocation2 + $0x1a1] sm:$0xff] }
 0x181   : > { %3256 = vst [vmem:[#allocation4_spill] sm:$0xff] %v2876_v50  ;;  %v1744_v58 = vmax.f32 %v3258_v10, %v1712_v41  ;;  %v2885_v38 = vadd.f32 %v1997_v40, %v3259_v1  ;;  %v2888_v39 = vadd.f32 %v1997_v40, %v3261_v35  ;;  %v2890_v7 = vadd.f32 %v1343_v32, %v1275_v53  ;;  %v3263_v32 = vld [vmem:[#allocation42_spill] sm:$0xff] }
 0x182   : > { %v1713_v52 = vadd.f32 %v2441_v24, %v1674_v22  ;;  %v962_v27 = vadd.f32 %v930_v25, %v830_v20  ;;  %v1260_v2 = vadd.f32 %v1228_v26, %v1160_v30  ;;  %774 = vst [vmem:[#allocation2 + $0x169] sm:$0xff] %v2876_v50  ;;  %759 = vst [vmem:[#allocation2 + $0xb1] sm:$0xff] %v2879_v57  ;;  %v1611_v20 = vld [vmem:[#allocation2 + $0x19a] sm:$0xff]  ;;  %v2994_v35 = vld [vmem:[%s3163_s3 + $0x8] ss:$0 sm:$0xff] }
 0x183   : > { %3260 = vst [vmem:[#allocation24_spill] sm:$0xff] %v2885_v38  ;;  %1776 = vst [vmem:[%s2461_s30 + $0xc0] sm:$0xff] %v1744_v58  ;;  %v2896_v47 = vadd.f32 %v1527_v59, %v1459_v49  ;;  %v946_v33 = vmul.f32 %v2141_v51, %v2876_v50  ;;  %v1244_v11 = vmul.f32 %v3237_v9, %v2876_v50  ;;  %v1998_v25 = vld [vmem:[#allocation2] sm:$0xff] }
 0x184   : > { %v1543_v31 = vmul.f32 %v3233_v29, %v2876_v50  ;;  %775 = vst [vmem:[#allocation2 + $0x171] sm:$0xff] %v2885_v38  ;;  %760 = vst [vmem:[#allocation2 + $0xc1] sm:$0xff] %v2888_v39  ;;  %v1745_v15 = vmax.f32 %v3262_v28, %v1713_v52  ;;  %v1229_v61 = vmul.f32 %v3237_v9, %v2879_v57 }
 0x185   : > { %v1528_v63 = vmul.f32 %v3233_v29, %v2879_v57  ;;  %v2913_v45 = vmul.f32 %v3237_v9, %v2885_v38  ;;  %v2917_v3 = vmul.f32 %v3233_v29, %v2885_v38  ;;  %v2921_v53 = vmul.f32 %v2141_v51, %v2888_v39 }
 0x186   : > { %v2924_v14 = vadd.f32 %v1997_v40, %v3263_v32  ;;  %v2927_v34 = vadd.f32 %v1997_v40, %v3265_v5  ;;  %1777 = vst [vmem:[%s2461_s30 + $0xc8] sm:$0xff] %v1745_v15  ;;  %v2932_v8 = vmul.f32 %v3237_v9, %v2888_v39  ;;  %v2936_v18 = vmul.f32 %v3233_v29, %v2888_v39 }
 0x187   : > { %v2940_v54 = vmul.f32 %v2141_v51, %v2879_v57  ;;  %v2943_v60 = vadd.f32 %v1997_v40, %v3267_v36  ;;  %v2953_v41 = vmul.f32 %v2141_v51, %v2885_v38  ;;  %v2956_v30 = vmul.f32 %v1998_v25, %v2171_v21 }
 0x188   : > { %3264 = vst [vmem:[#allocation16_spill] sm:$0xff] %v2924_v14  ;;  %3266 = vst [vmem:[#allocation28_spill] sm:$0xff] %v2927_v34  ;;  %v2948_v44 = vmul.f32 %v3237_v9, %v2924_v14  ;;  %v2959_v26 = vmul.f32 %v3233_v29, %v1511_v16  ;;  %v2963_v22 = vmul.f32 %v3233_v29, %v2924_v14 }
 0x189   : > { %3268 = vst [vmem:[#allocation3_spill] sm:$0xff] %v2943_v60  ;;  %776 = vst [vmem:[#allocation2 + $0x181] sm:$0xff] %v2924_v14  ;;  %v2967_v49 = vmul.f32 %v2141_v51, %v2927_v34  ;;  %v2971_v40 = vmul.f32 %v3237_v9, %v2927_v34  ;;  %v2975_v62 = vmul.f32 %v3233_v29, %v2927_v34  ;;  %v810_v0 = vld [vmem:[#allocation2 + $0x168] sm:$0xff]  ;;  %v2978_v58 = vld [vmem:[#allocation2 + $0xb0] sm:$0xff] }
 0x18a   : > { %761 = vst [vmem:[#allocation2 + $0xc9] sm:$0xff] %v2927_v34  ;;  %3269 = vst [vmem:[#allocation29_spill] sm:$0xff] %v2956_v30  ;;  %v994_v10 = vld [vmem:[#allocation2 + $0xaa] sm:$0xff]  ;;  %v2982_v59 = vmul.f32 %v3237_v9, %v2943_v60  ;;  %v2986_v51 = vmul.f32 %v3233_v29, %v2943_v60  ;;  %v2989_v1 = vmul.f32 %v3233_v29, %v1512_v46  ;;  %v3003_v32 = vld [vmem:[#allocation2 + $0xb2] sm:$0xff] }
 0x18b   : > { %3270 = vst [vmem:[#allocation32_spill] sm:$0xff] %v2959_v26  ;;  %777 = vst [vmem:[#allocation2 + $0x189] sm:$0xff] %v2943_v60  ;;  %v2997_v52 = vmul.f32 %v2994_v35, %v1611_v20  ;;  %v846_v28 = vmul.f32 %v2139_v48, %v810_v0  ;;  %v1144_v9 = vmul.f32 %v2169_v19, %v810_v0  ;;  %v1010_v20 = vld [vmem:[#allocation2 + $0x16a] sm:$0xff] }
 0x18c   : > { %3271 = vst [vmem:[#allocation18_spill] sm:$0xff] %v2986_v51  ;;  %3272 = vst [vmem:[#allocation17_spill] sm:$0xff] %v2989_v1  ;;  %v1443_v15 = vmul.f32 %v2171_v21, %v810_v0  ;;  %v1030_v16 = vmul.f32 %v2150_v56, %v994_v10  ;;  %v1129_v29 = vmul.f32 %v2169_v19, %v2978_v58  ;;  %v3014_v14 = vld [vmem:[#allocation2 + $0x170] sm:$0xff] }
 0x18d   : > { %3273 = vst [vmem:[#allocation33_spill] sm:$0xff] %v2997_v52  ;;  %v1328_v5 = vmul.f32 %v2173_v23, %v994_v10  ;;  %v1329_v36 = vmul.f32 %v2173_v23, %v3003_v32  ;;  %v1428_v46 = vmul.f32 %v2171_v21, %v2978_v58  ;;  %v978_v25 = vadd.f32 %v946_v33, %v846_v28  ;;  %v3019_v51 = vld [vmem:[#allocation2 + $0x172] sm:$0xff] }
 0x18e   : > { %v1176_v60 = vadd.f32 %v1144_v9, %v2847_v55  ;;  %v1475_v0 = vadd.f32 %v1443_v15, %v2859_v6  ;;  %v1062_v38 = vadd.f32 %v1030_v16, %v962_v27  ;;  %v1161_v50 = vadd.f32 %v1129_v29, %v2836_v43  ;;  %v3274_v29 = vld [vmem:[#allocation30_spill] sm:$0xff] }
 0x18f   : > { %v1360_v34 = vadd.f32 %v1328_v5, %v1260_v2  ;;  %v1460_v52 = vadd.f32 %v1428_v46, %v2845_v37  ;;  %v1627_v1 = vmul.f32 %v2994_v35, %v994_v10  ;;  %v1628_v33 = vmul.f32 %v2994_v35, %v3003_v32 }
 0x190   : > { %v1276_v26 = vadd.f32 %v1244_v11, %v1176_v60  ;;  %v1575_v30 = vadd.f32 %v1543_v31, %v1475_v0  ;;  %v1046_v55 = vmul.f32 %v2150_v56, %v1010_v20  ;;  %v1261_v6 = vadd.f32 %v1229_v61, %v1161_v50  ;;  %v796_v31 = vld [vmem:[#allocation2 + $0xc0] sm:$0xff] }
 0x191   : > { %v1560_v27 = vadd.f32 %v1528_v63, %v1460_v52  ;;  %v1659_v28 = vadd.f32 %v1627_v1, %v2896_v47  ;;  %v1145_v43 = vmul.f32 %v2169_v19, %v3014_v14  ;;  %v1344_v37 = vmul.f32 %v2173_v23, %v1010_v20  ;;  %v1110_v15 = vld [vmem:[#allocation2 + $0x180] sm:$0xff] }
 0x192   : > { %v1078_v2 = vadd.f32 %v1046_v55, %v978_v25  ;;  %v1345_v10 = vmul.f32 %v2173_v23, %v3019_v51  ;;  %v1444_v11 = vmul.f32 %v2171_v21, %v3014_v14  ;;  %v3032_v60 = vadd.f32 %v1329_v36, %v1261_v6  ;;  %v797_v25 = vld [vmem:[#allocation2 + $0xc8] sm:$0xff] }
 0x193   : > { %v1660_v9 = vadd.f32 %v1628_v33, %v1560_v27  ;;  %v1698_v50 = vadd.f32 %v2441_v24, %v1659_v28  ;;  %v1177_v47 = vadd.f32 %v1145_v43, %v2854_v17  ;;  %v1376_v61 = vadd.f32 %v1344_v37, %v1276_v26  ;;  %v996_v37 = vld [vmem:[#allocation2 + $0xc2] sm:$0xff] }
 0x194   : > { %v1476_v63 = vadd.f32 %v1444_v11, %v2890_v7  ;;  %v1643_v1 = vmul.f32 %v2994_v35, %v1010_v20  ;;  %v1644_v52 = vmul.f32 %v2994_v35, %v3019_v51  ;;  %v832_v46 = vmul.f32 %v2139_v48, %v796_v31 }
 0x195   : > { %v1699_v16 = vadd.f32 %v2441_v24, %v1660_v9  ;;  %v1730_v5 = vmax.f32 %v3274_v29, %v1698_v50  ;;  %v1277_v36 = vadd.f32 %v2913_v45, %v1177_v47  ;;  %v1130_v7 = vmul.f32 %v2169_v19, %v796_v31 }
 0x196   : > { %v1576_v17 = vadd.f32 %v2917_v3, %v1476_v63  ;;  %v1675_v26 = vadd.f32 %v1643_v1, %v1575_v30  ;;  %v1429_v20 = vmul.f32 %v2171_v21, %v796_v31  ;;  %v964_v24 = vadd.f32 %v2921_v53, %v832_v46  ;;  %v3056_v3 = vld [vmem:[%s3164_s4] ss:$0 sm:$0xff]  ;;  %v3276_v46 = vld [vmem:[#allocation11_spill] sm:$0xff] }
 0x197   : > { %v1731_v0 = vmax.f32 %v2684_v4, %v1699_v16  ;;  %1762 = vst [vmem:[%s2461_s30 + $0x50] sm:$0xff] %v1730_v5  ;;  %v3049_v33 = vadd.f32 %v1345_v10, %v1277_v36  ;;  %v1146_v45 = vmul.f32 %v2169_v19, %v1110_v15  ;;  %v1162_v6 = vadd.f32 %v1130_v7, %v1062_v38  ;;  %v997_v10 = vld [vmem:[#allocation2 + $0xca] sm:$0xff]  ;;  %v3275_v5 = vld [vmem:[#allocation8_spill] sm:$0xff] }
 0x198   : > { %v1676_v55 = vadd.f32 %v1644_v52, %v1576_v17  ;;  %v1714_v30 = vadd.f32 %v3056_v3, %v1675_v26  ;;  %v1461_v27 = vadd.f32 %v1429_v20, %v1360_v34  ;;  %v1445_v28 = vmul.f32 %v2171_v21, %v1110_v15  ;;  %v1111_v7 = vld [vmem:[#allocation2 + $0x188] sm:$0xff]  ;;  %v3277_v20 = vld [vmem:[#allocation9_spill] sm:$0xff] }
 0x199   : > { %1763 = vst [vmem:[%s2461_s30 + $0x58] sm:$0xff] %v1731_v0  ;;  %v1178_v4 = vadd.f32 %v1146_v45, %v1078_v2  ;;  %v831_v53 = vmul.f32 %v2978_v58, %v2139_v48  ;;  %v833_v43 = vmul.f32 %v2139_v48, %v797_v25  ;;  %v1262_v38 = vadd.f32 %v2932_v8, %v1162_v6 }
 0x19a   : > { %v1715_v11 = vadd.f32 %v3056_v3, %v1676_v55  ;;  %v1746_v31 = vmax.f32 %v2680_v12, %v1714_v30  ;;  %v1561_v34 = vadd.f32 %v2936_v18, %v1461_v27  ;;  %v1477_v9 = vadd.f32 %v1445_v28, %v1376_v61  ;;  %v3278_v30 = vld [vmem:[#allocation6_spill] sm:$0xff]  ;;  %v3280_v28 = vld [vmem:[#allocation7_spill] sm:$0xff] }
 0x19b   : > { %v1278_v2 = vadd.f32 %v2948_v44, %v1178_v4  ;;  %v963_v50 = vadd.f32 %v2940_v54, %v831_v53  ;;  %v965_v58 = vadd.f32 %v2967_v49, %v833_v43  ;;  %v1031_v63 = vmul.f32 %v3003_v32, %v2150_v56  ;;  %v1310_v4 = vld [vmem:[#allocation2 + $0x182] sm:$0xff] }
 0x19c   : > { %v1747_v47 = vmax.f32 %v2688_v13, %v1715_v11  ;;  %1778 = vst [vmem:[%s2461_s30 + $0xd0] sm:$0xff] %v1746_v31  ;;  %v1032_v12 = vmul.f32 %v2150_v56, %v996_v37  ;;  %v1033_v1 = vmul.f32 %v2150_v56, %v997_v10  ;;  %v3078_v8 = vadd.f32 %v2963_v22, %v1477_v9  ;;  %v1311_v31 = vld [vmem:[#allocation2 + $0x18a] sm:$0xff] }
 0x19d   : > { %v1131_v18 = vmul.f32 %v2169_v19, %v797_v25  ;;  %v1330_v44 = vmul.f32 %v2173_v23, %v996_v37  ;;  %v1331_v54 = vmul.f32 %v2173_v23, %v997_v10  ;;  %v1063_v49 = vadd.f32 %v1031_v63, %v963_v50  ;;  %v3285_v63 = vld [vmem:[#allocation19_spill] sm:$0xff] }
 0x19e   : > { %1779 = vst [vmem:[%s2461_s30 + $0xd8] sm:$0xff] %v1747_v47  ;;  %v1064_v13 = vadd.f32 %v1032_v12, %v964_v24  ;;  %v1065_v61 = vadd.f32 %v1033_v1, %v965_v58  ;;  %v1430_v52 = vmul.f32 %v2171_v21, %v797_v25  ;;  %v1629_v15 = vmul.f32 %v2994_v35, %v996_v37  ;;  %v3284_v58 = vld [vmem:[#allocation25_spill] sm:$0xff]  ;;  %v3286_v1 = vld [vmem:[#allocation34_spill] sm:$0xff] }
 0x19f   : > { %v1362_v32 = vadd.f32 %v1330_v44, %v1262_v38  ;;  %v1630_v16 = vmul.f32 %v2994_v35, %v997_v10  ;;  %v847_v22 = vmul.f32 %v3014_v14, %v2139_v48  ;;  %v1163_v29 = vadd.f32 %v1131_v18, %v1063_v49  ;;  %v3279_v14 = vld [vmem:[#allocation10_spill] sm:$0xff]  ;;  %v3281_v10 = vld [vmem:[#allocation12_spill] sm:$0xff] }
 0x1a0   : > { %v1164_v36 = vadd.f32 %v3275_v5, %v1064_v13  ;;  %v1165_v17 = vadd.f32 %v3276_v46, %v1065_v61  ;;  %v1462_v26 = vadd.f32 %v1430_v52, %v3032_v60  ;;  %v1661_v24 = vadd.f32 %v1629_v15, %v1561_v34  ;;  %v3283_v38 = vld [vmem:[#allocation14_spill] sm:$0xff]  ;;  %v3288_v52 = vld [vmem:[#allocation20_spill] sm:$0xff]  ;;  %v3289_v15 = vld [vmem:[#allocation21_spill] sm:$0xff] }
 0x1a1   : > { %v1463_v0 = vadd.f32 %v3277_v20, %v1362_v32  ;;  %v979_v25 = vadd.f32 %v2953_v41, %v847_v22  ;;  %v1047_v45 = vmul.f32 %v3019_v51, %v2150_v56  ;;  %v1263_v55 = vadd.f32 %v2971_v40, %v1163_v29  ;;  %v3282_v51 = vld [vmem:[#allocation13_spill] sm:$0xff]  ;;  %v3287_v13 = vld [vmem:[#allocation26_spill] sm:$0xff]  ;;  %v3292_v20 = vld [vmem:[#allocation36_spill] sm:$0xff] }
 0x1a2   : > { %v1264_v48 = vadd.f32 %v3278_v30, %v1164_v36  ;;  %v1265_v6 = vadd.f32 %v3279_v14, %v1165_v17  ;;  %v1562_v27 = vadd.f32 %v2975_v62, %v1462_v26  ;;  %v1700_v53 = vadd.f32 %v3056_v3, %v1661_v24  ;;  %v1612_v29 = vld [vmem:[#allocation2 + $0x1a2] sm:$0xff]  ;;  %v3291_v26 = vld [vmem:[#allocation27_spill] sm:$0xff] }
 0x1a3   : > { %v1563_v60 = vadd.f32 %v3280_v28, %v1463_v0  ;;  %v1079_v43 = vadd.f32 %v1047_v45, %v979_v25  ;;  %v1147_v41 = vmul.f32 %v2169_v19, %v1111_v7  ;;  %v1363_v37 = vadd.f32 %v1331_v54, %v1263_v55  ;;  %v3290_v17 = vld [vmem:[#allocation29_spill] sm:$0xff] }
 0x1a4   : > { %v1364_v56 = vadd.f32 %v3281_v10, %v1264_v48  ;;  %v1365_v40 = vadd.f32 %v3282_v51, %v1265_v6  ;;  %v1662_v11 = vadd.f32 %v1630_v16, %v1562_v27  ;;  %v1732_v62 = vmax.f32 %v3254_v42, %v1700_v53  ;;  %v3293_v0 = vld [vmem:[#allocation37_spill] sm:$0xff]  ;;  %v3295_v6 = vld [vmem:[#allocation18_spill] sm:$0xff] }
 0x1a5   : > { %v1663_v34 = vadd.f32 %v3283_v38, %v1563_v60  ;;  %v1179_v9 = vadd.f32 %v1147_v41, %v1079_v43  ;;  %v1346_v50 = vmul.f32 %v2173_v23, %v1310_v4  ;;  %v1464_v47 = vadd.f32 %v3284_v58, %v1363_v37  ;;  %v3297_v60 = vld [vmem:[#allocation33_spill] sm:$0xff]  ;;  %v3298_v43 = vld [vmem:[#allocation28_spill] sm:$0xff] }
 0x1a6   : > { %v1465_v12 = vadd.f32 %v3285_v63, %v1364_v56  ;;  %v1466_v19 = vadd.f32 %v3286_v1, %v1365_v40  ;;  %v1701_v18 = vadd.f32 %v3056_v3, %v1662_v11  ;;  %1764 = vst [vmem:[%s2461_s30 + $0x60] sm:$0xff] %v1732_v62  ;;  %v1347_v49 = vmul.f32 %v2173_v23, %v1311_v31  ;;  %v2001_v37 = vld [vmem:[#allocation2 + $0xd9] sm:$0xff]  ;;  %v2002_v56 = vld [vmem:[#allocation2 + $0xe1] sm:$0xff]  ;;  %v3302_v63 = vld [vmem:[#allocation3_spill] sm:$0xff] }
 0x1a7   : > { %v1702_v44 = vadd.f32 %v3056_v3, %v1663_v34  ;;  %v1279_v54 = vadd.f32 %v2982_v59, %v1179_v9  ;;  %v1378_v42 = vadd.f32 %v1346_v50, %v1278_v2  ;;  %v1564_v61 = vadd.f32 %v3287_v13, %v1464_v47  ;;  %v3300_v9 = vld [vmem:[#allocation16_spill] sm:$0xff] }
 0x1a8   : > { %v1565_v32 = vadd.f32 %v3288_v52, %v1465_v12  ;;  %v1566_v16 = vadd.f32 %v3289_v15, %v1466_v19  ;;  %v1733_v22 = vmax.f32 %v2879_v57, %v1701_v18  ;;  %v1446_v46 = vmul.f32 %v2171_v21, %v1111_v7  ;;  %v3301_v58 = vld [vmem:[#allocation24_spill] sm:$0xff] }
 0x1a9   : > { %v1734_v5 = vmax.f32 %v2888_v39, %v1702_v44  ;;  %v1379_v36 = vadd.f32 %v1347_v49, %v1279_v54  ;;  %v1479_v59 = vadd.f32 %v3290_v17, %v1378_v42  ;;  %v1664_v23 = vadd.f32 %v3291_v26, %v1564_v61  ;;  %v3294_v39 = vld [vmem:[#allocation32_spill] sm:$0xff] }
 0x1aa   : > { %v1665_v2 = vadd.f32 %v3292_v20, %v1565_v32  ;;  %v1666_v24 = vadd.f32 %v3293_v0, %v1566_v16  ;;  %1765 = vst [vmem:[%s2461_s30 + $0x68] sm:$0xff] %v1733_v22  ;;  %v1645_v25 = vmul.f32 %v2994_v35, %v1310_v4  ;;  %v1478_v57 = vadd.f32 %v1446_v46, %v3049_v33  ;;  %v3296_v33 = vld [vmem:[#allocation17_spill] sm:$0xff] }
 0x1ab   : > { %1766 = vst [vmem:[%s2461_s30 + $0x70] sm:$0xff] %v1734_v5  ;;  %v1480_v45 = vadd.f32 %v3290_v17, %v1379_v36  ;;  %v1579_v55 = vadd.f32 %v3294_v39, %v1479_v59  ;;  %v1648_v21 = vmul.f32 %v2994_v35, %v1612_v29  ;;  %v1703_v7 = vadd.f32 %v3056_v3, %v1664_v23 }
 0x1ac   : > { %v1704_v30 = vadd.f32 %v3056_v3, %v1665_v2  ;;  %v1705_v48 = vadd.f32 %v3056_v3, %v1666_v24  ;;  %v1677_v14 = vadd.f32 %v1645_v25, %v3078_v8  ;;  %v1578_v27 = vadd.f32 %v3295_v6, %v1478_v57 }
 0x1ad   : > { %v1580_v4 = vadd.f32 %v3296_v33, %v1480_v45  ;;  %v1646_v28 = vmul.f32 %v2994_v35, %v1311_v31  ;;  %v1679_v53 = vadd.f32 %v3297_v60, %v1579_v55  ;;  %v1735_v41 = vmax.f32 %v3298_v43, %v1703_v7  ;;  %v3299_v35 = vld [vmem:[#allocation4_spill] sm:$0xff] }
 0x1ae   : > { %v1736_v10 = vmax.f32 %v2001_v37, %v1704_v30  ;;  %v1737_v51 = vmax.f32 %v2002_v56, %v1705_v48  ;;  %v1716_v8 = vadd.f32 %v3056_v3, %v1677_v14 }
 0x1af   : > { %v1678_v40 = vadd.f32 %v1646_v28, %v1578_v27  ;;  %v1680_v11 = vadd.f32 %v1648_v21, %v1580_v4  ;;  %v1718_v38 = vadd.f32 %v3056_v3, %v1679_v53  ;;  %1767 = vst [vmem:[%s2461_s30 + $0x78] sm:$0xff] %v1735_v41 }
 0x1b0   : > { %1768 = vst [vmem:[%s2461_s30 + $0x80] sm:$0xff] %v1736_v10  ;;  %1769 = vst [vmem:[%s2461_s30 + $0x88] sm:$0xff] %v1737_v51  ;;  %v1748_v31 = vmax.f32 %v3299_v35, %v1716_v8 }
 0x1b1   : > { %v1717_v34 = vadd.f32 %v3056_v3, %v1678_v40  ;;  %v1719_v62 = vadd.f32 %v3056_v3, %v1680_v11  ;;  %v1750_v50 = vmax.f32 %v3300_v9, %v1718_v38 }
 0x1b2   : > { %1780 = vst [vmem:[%s2461_s30 + $0xe0] sm:$0xff] %v1748_v31 }
 0x1b3   : > { %v1749_v47 = vmax.f32 %v3301_v58, %v1717_v34  ;;  %v1751_v12 = vmax.f32 %v3302_v63, %v1719_v62  ;;  %1782 = vst [vmem:[%s2461_s30 + $0xf0] sm:$0xff] %v1750_v50 }
 0x1b5   : > { %1781 = vst [vmem:[%s2461_s30 + $0xe8] sm:$0xff] %v1749_v47  ;;  %1783 = vst [vmem:[%s2461_s30 + $0xf8] sm:$0xff] %v1751_v12 }
 0x1b6 PF: > { %s15_s18 = sadd.s32 1, %s2009_s18  }
 0x1b7   : > { %p12_p4 = scmp.ge.s32.totalorder %s15_s18, 4  }
 0x1b9   :  { %14 = sbr.rel (!%p12_p4) target bundleno = 1 (0x1), region = 72 }

// kernel: feature_extract_pallas.7
= control target key start
LH: loop header
LB: loop body
LE: loop exit
PB: predicated region body
PF: predicated region fallthrough
CT: control target
= control target key end

     0   :  { %s1480_s12 = smov 0   ;;  %s1722_s0 = inlined_call_operand.vmem [shape: bf16[2,256,288], index: 0, kind: input, shape index: {}]   ;;  %s1723_s1 = inlined_call_operand.vmem [shape: bf16[288,128], index: 1, kind: input, shape index: {}]   ;;  %s1724_s2 = inlined_call_operand.vmem [shape: f32[1,128], index: 2, kind: input, shape index: {}]   ;;  %s1725_s3 = inlined_call_operand.vmem [shape: f32[2,16,16,128], index: 3, kind: output, shape index: {}]  }
   0x1 LB: > { %s1085_s13 = sadd.s32 4294967295, %s1458_s12   ;;  %p1089_p0 = scmp.ge.s32.totalorder %s1458_s12, 1  ;;  %s1458_s12 = sphi %s1480_s12, %s13_s12  }
   0x2   : > { %p137_p1 = scmp.lt.s32.totalorder %s1458_s12, 3 }
   0x4   : > { %p138_p2 = pnand %p1089_p0, %p137_p1 }
   0x5   : > { %v1370_v0 = vld [vmem:[%s1723_s1 + $0x40] sm:$0xff] (!%p138_p2)   ;;  %v1372_v2 = vld [vmem:[%s1723_s1 + $0x48] sm:$0xff] (!%p138_p2)   ;;  %p161_p3 = scmp.lt.s32.totalorder (!%p138_p2), %s1085_s13, 1  ;;  %v1374_v4 = vld [vmem:[%s1723_s1 + $0x50] sm:$0xff] (!%p138_p2)   ;;  %vm627_vm0 = vcmask (!%p138_p2), 261120  }
   0x6   : > { %141 = sbr.rel (%p138_p2) target bundleno = 348 (0x15c), region = 32  ;;  %v1371_v1 = vld [vmem:[%s1723_s1] sm:$0xff] (!%p138_p2)   ;;  %1179 = vmatprep.subr.bf16.mxu0 (!%p138_p2), %v1370_v0  ;;  %1345 = vmatprep.subr.bf16.mxu1 (!%p138_p2), %v1370_v0  ;;  %v1373_v3 = vld [vmem:[%s1723_s1 + $0x8] sm:$0xff] (!%p138_p2)   ;;  %v1375_v5 = vld [vmem:[%s1723_s1 + $0x10] sm:$0xff] (!%p138_p2)  }
   0x7   : > { %1180 = vmatpush3.bf16.msra.mxu0 (!%p138_p2), %v1371_v1  ;;  %1353 = vmatpush3.bf16.msra.mxu1 (!%p138_p2), %v1371_v1  ;;  %v1376_v6 = vld [vmem:[%s1723_s1 + $0x58] sm:$0xff] (!%p138_p2)   ;;  %v1378_v8 = vld [vmem:[%s1723_s1 + $0x60] sm:$0xff] (!%p138_p2)   ;;  %v1380_v10 = vld [vmem:[%s1723_s1 + $0x68] sm:$0xff] (!%p138_p2)  }
   0x8   : > { %1181 = vmatprep.subr.bf16.mxu0 (!%p138_p2), %v1372_v2  ;;  %1346 = vmatprep.subr.bf16.mxu1 (!%p138_p2), %v1372_v2  ;;  %v1377_v7 = vld [vmem:[%s1723_s1 + $0x18] sm:$0xff] (!%p138_p2)   ;;  %v1379_v9 = vld [vmem:[%s1723_s1 + $0x20] sm:$0xff] (!%p138_p2)   ;;  %v1381_v13 = vld [vmem:[%s1723_s1 + $0x28] sm:$0xff] (!%p138_p2)  }
   0x9   : > { %v1382_v14 = vld [vmem:[%s1723_s1 + $0x70] sm:$0xff] (!%p138_p2)   ;;  %v1384_v16 = vld [vmem:[%s1723_s1 + $0x78] sm:$0xff] (!%p138_p2)   ;;  %v1392_v18 = vld [vmem:[%s1723_s1 + $0x80] sm:$0xff] (!%p138_p2)  }
   0xa   : > { %v1383_v15 = vld [vmem:[%s1723_s1 + $0x30] sm:$0xff] (!%p138_p2)   ;;  %v1385_v17 = vld [vmem:[%s1723_s1 + $0x38] sm:$0xff] (!%p138_p2)   ;;  %v1405_v23 = vld [vmem:[%s1723_s1 + $0x88] sm:$0xff] (!%p138_p2)  }
   0xb   : > { %1182 = vmatpush3.bf16.msra.mxu0 (!%p138_p2), %v1373_v3  ;;  %1354 = vmatpush3.bf16.msra.mxu1 (!%p138_p2), %v1373_v3 }
   0xc   : > { %1183 = vmatprep.subr.bf16.mxu0 (!%p138_p2), %v1374_v4  ;;  %1347 = vmatprep.subr.bf16.mxu1 (!%p138_p2), %v1374_v4 }
   0xd   : > { %s1727_s13 = smov (!%p161_p3, %s1085_s13), 1 }
   0xe   : > { %s1361_s28 = smul.u32 384, %s1727_s13  ;;  %s1178_s29 = sshll.u32 %s1727_s13, 8 }
   0xf   : > { %1184 = vmatpush3.bf16.msra.mxu0 %v1375_v5  ;;  %1355 = vmatpush3.bf16.msra.mxu1 %v1375_v5  ;;  %s1640_s7 = scalar_lea.vmem %s1725_s3, %s1178_s29 }
  0x10   : > { %1185 = vmatprep.subr.bf16.mxu0 %v1376_v6  ;;  %1348 = vmatprep.subr.bf16.mxu1 %v1376_v6  ;;  %s1521_s8 = scalar_lea.vmem %s1722_s0, %s1361_s28 }
  0x11   : > { %v1388_v11 = vld [vmem:[%s1521_s8 + $0x4] ss:$12 sps:$4 sm:$0xff]   ;;  %v1386_v19 = vld [vmem:[%s1521_s8] ss:$12 sps:$4 sm:$0xff]   ;;  %v1393_v21 = vld [vmem:[%s1521_s8 + $0x1c] ss:$12 sps:$4 sm:$0xff]  }
  0x12   : > { %v1391_v12 = vld [vmem:[%s1521_s8 + $0x124] ss:$12 sps:$4 sm:$0xff]   ;;  %708 = vmatprep.mubr.bf16.mxu0 %v1388_v11  ;;  %v1389_v20 = vld [vmem:[%s1521_s8 + $0x120] ss:$12 sps:$4 sm:$0xff]   ;;  %v1395_v22 = vld [vmem:[%s1521_s8 + $0x13c] ss:$12 sps:$4 sm:$0xff]  }
  0x13   : > { %1186 = vmatpush3.bf16.msra.mxu0 %v1377_v7  ;;  %1356 = vmatpush3.bf16.msra.mxu1 %v1377_v7  ;;  %v1397_v24 = vld [vmem:[%s1521_s8 + $0x18] ss:$12 sps:$4 sm:$0xff]   ;;  %v1399_v26 = vld [vmem:[%s1521_s8 + $0x34] ss:$12 sps:$4 sm:$0xff]   ;;  %v1403_v28 = vld [vmem:[%s1521_s8 + $0x30] ss:$12 sps:$4 sm:$0xff]  }
  0x14   : > { %1187 = vmatprep.subr.bf16.mxu0 %v1378_v8  ;;  %1349 = vmatprep.subr.bf16.mxu1 %v1378_v8  ;;  %v1398_v25 = vld [vmem:[%s1521_s8 + $0x138] ss:$12 sps:$4 sm:$0xff]   ;;  %v1401_v27 = vld [vmem:[%s1521_s8 + $0x154] ss:$12 sps:$4 sm:$0xff]   ;;  %v1404_v29 = vld [vmem:[%s1521_s8 + $0x150] ss:$12 sps:$4 sm:$0xff]  }
  0x15   : > { %804 = vmatprep.mubr.bf16.mxu1 %v1391_v12  ;;  %v1406_v30 = vld [vmem:[%s1521_s8 + $0x4c] ss:$12 sps:$4 sm:$0xff]   ;;  %v1410_v32 = vld [vmem:[%s1521_s8 + $0x48] ss:$12 sps:$4 sm:$0xff]   ;;  %v1412_v34 = vld [vmem:[%s1521_s8 + $0x64] ss:$12 sps:$4 sm:$0xff]  }
  0x16   : > { %v1408_v31 = vld [vmem:[%s1521_s8 + $0x16c] ss:$12 sps:$4 sm:$0xff]   ;;  %v1411_v33 = vld [vmem:[%s1521_s8 + $0x168] ss:$12 sps:$4 sm:$0xff]   ;;  %v1421_v41 = vld [vmem:[%s1521_s8 + $0x50] ss:$12 sps:$4 sm:$0xff]  }
  0x17   : > { %1188 = vmatpush3.bf16.msra.mxu0 %v1379_v9  ;;  %1357 = vmatpush3.bf16.msra.mxu1 %v1379_v9  ;;  %v1414_v35 = vld [vmem:[%s1521_s8 + $0x8] ss:$12 sps:$4 sm:$0xff]   ;;  %v1415_v36 = vld [vmem:[%s1521_s8 + $0x60] ss:$12 sps:$4 sm:$0xff]   ;;  %v1419_v39 = vld [vmem:[%s1521_s8 + $0x38] ss:$12 sps:$4 sm:$0xff]  }
  0x18   : > { %1189 = vmatprep.subr.bf16.mxu0 %v1380_v10  ;;  %1350 = vmatprep.subr.bf16.mxu1 %v1380_v10  ;;  %v1416_v37 = vld [vmem:[%s1521_s8 + $0x20] ss:$12 sps:$4 sm:$0xff]   ;;  %v1417_v38 = vld [vmem:[%s1521_s8 + $0x7c] ss:$12 sps:$4 sm:$0xff]   ;;  %v1420_v40 = vld [vmem:[%s1521_s8 + $0x78] ss:$12 sps:$4 sm:$0xff]  }
  0x19   : > { %v1422_v42 = vld [vmem:[%s1521_s8 + $0x94] ss:$12 sps:$4 sm:$0xff]   ;;  %v1425_v44 = vld [vmem:[%s1521_s8 + $0x90] ss:$12 sps:$4 sm:$0xff]   ;;  %v1427_v46 = vld [vmem:[%s1521_s8 + $0xac] ss:$12 sps:$4 sm:$0xff]  }
  0x1a   : > { %v1424_v43 = vld [vmem:[%s1521_s8 + $0x68] ss:$12 sps:$4 sm:$0xff]   ;;  %v1426_v45 = vld [vmem:[%s1521_s8 + $0x80] ss:$12 sps:$4 sm:$0xff]   ;;  %v1429_v47 = vld [vmem:[%s1521_s8 + $0x98] ss:$12 sps:$4 sm:$0xff]  }
  0x1b   : > { %1190 = vmatpush3.bf16.msra.mxu0 %v1381_v13  ;;  %1358 = vmatpush3.bf16.msra.mxu1 %v1381_v13  ;;  %v1430_v48 = vld [vmem:[%s1521_s8 + $0xa8] ss:$12 sps:$4 sm:$0xff]   ;;  %v1431_v49 = vld [vmem:[%s1521_s8 + $0xb0] ss:$12 sps:$4 sm:$0xff]   ;;  %v1435_v52 = vld [vmem:[%s1521_s8 + $0xc0] ss:$12 sps:$4 sm:$0xff]  }
  0x1c   : > { %1191 = vmatprep.subr.bf16.mxu0 %v1382_v14  ;;  %1351 = vmatprep.subr.bf16.mxu1 %v1382_v14  ;;  %v1432_v50 = vld [vmem:[%s1521_s8 + $0xc4] ss:$12 sps:$4 sm:$0xff]   ;;  %v1434_v51 = vld [vmem:[%s1521_s8 + $0xc8] ss:$12 sps:$4 sm:$0xff]   ;;  %v1436_v53 = vld [vmem:[%s1521_s8 + $0xe0] ss:$12 sps:$4 sm:$0xff]  }
  0x1d   : > { %v1437_v54 = vld [vmem:[%s1521_s8 + $0xdc] ss:$12 sps:$4 sm:$0xff]   ;;  %v1439_v55 = vld [vmem:[%s1521_s8 + $0xf8] ss:$12 sps:$4 sm:$0xff]   ;;  %v1442_v58 = vld [vmem:[%s1521_s8 + $0xf4] ss:$12 sps:$4 sm:$0xff]  }
  0x1e   : > { %v1440_v56 = vld [vmem:[%s1521_s8 + $0xd8] ss:$12 sps:$4 sm:$0xff]   ;;  %v1441_v57 = vld [vmem:[%s1521_s8 + $0x110] ss:$12 sps:$4 sm:$0xff]   ;;  %v1444_v59 = vld [vmem:[%s1521_s8 + $0x128] ss:$12 sps:$4 sm:$0xff]  }
  0x1f   : > { %1192 = vmatpush3.bf16.msra.mxu0 %v1383_v15  ;;  %1359 = vmatpush3.bf16.msra.mxu1 %v1383_v15  ;;  %v1445_v60 = vld [vmem:[%s1521_s8 + $0xf0] ss:$12 sps:$4 sm:$0xff]   ;;  %v1446_v61 = vld [vmem:[%s1521_s8 + $0x140] ss:$12 sps:$4 sm:$0xff]   ;;  %v1449_v63 = vld [vmem:[%s1521_s8 + $0x158] ss:$12 sps:$4 sm:$0xff]  }
  0x20   : > { %1193 = vmatprep.subr.bf16.mxu0 %v1384_v16  ;;  %1352 = vmatprep.subr.bf16.mxu1 %v1384_v16  ;;  %v1447_v62 = vld [vmem:[%s1521_s8 + $0x10c] ss:$12 sps:$4 sm:$0xff]   ;;  %v1450_v0 = vld [vmem:[%s1521_s8 + $0x108] ss:$12 sps:$4 sm:$0xff]   ;;  %v1451_v1 = vld [vmem:[%s1521_s8 + $0x170] ss:$12 sps:$4 sm:$0xff]  }
  0x23   : > { %1194 = vmatpush3.bf16.msra.mxu0 %v1385_v17  ;;  %1360 = vmatpush3.bf16.msra.mxu1 %v1385_v17 }
  0x24   : > { %1309 = vmatprep.subr.bf16.mxu1 %v1392_v18 }
  0x26   : > { %709 = vmatmul.mubr.bf16.vlgmr.msra.gmra.mrb[0].mxu0 %v1386_v19  ;;  %805 = vmatmul.mubr.bf16.vlgmr.msra.gmra.mrb[0].mxu1 %v1389_v20 }
  0x27   : > { %1310 = vmatpush3.bf16.msra.mxu1 %v1392_v18  ;;  %716 = vmatprep.mubr.bf16.mxu0 %v1393_v21 }
  0x28   : > { %812 = vmatprep.mubr.bf16.mxu1 %v1395_v22  ;;  %1311 = vmatprep.subr.bf16.mxu1 %v1405_v23 }
  0x2b   : > { %1312 = vmatpush3.bf16.msra.mxu1 %v1405_v23 }
  0x2e   : > { %717 = vmatmul.mubr.bf16.gmra.mrb[4].mxu0 %v1397_v24  ;;  %813 = vmatmul.mubr.bf16.gmra.mrb[4].mxu1 %v1398_v25 }
  0x2f   : > { %724 = vmatprep.mubr.bf16.mxu0 %v1399_v26  ;;  %820 = vmatprep.mubr.bf16.mxu1 %v1401_v27 }
  0x36   : > { %725 = vmatmul.mubr.bf16.gmra.mrb[8].mxu0 %v1403_v28  ;;  %821 = vmatmul.mubr.bf16.gmra.mrb[8].mxu1 %v1404_v29 }
  0x37   : > { %732 = vmatprep.mubr.bf16.mxu0 %v1406_v30  ;;  %828 = vmatprep.mubr.bf16.mxu1 %v1408_v31 }
  0x3e   : > { %733 = vmatmul.mubr.bf16.gmra.mrb[12].mxu0 %v1410_v32  ;;  %829 = vmatmul.mubr.bf16.gmra.mrb[12].mxu1 %v1411_v33 }
  0x3f   : > { %740 = vmatprep.mubr.bf16.mxu0 %v1412_v34  ;;  %1313 = vmatprep.mubr.msk.bf16.mxu1 %vm627_vm0, %v1414_v35 }
  0x46   : > { %741 = vmatmul.mubr.bf16.gmra.mrb[16].mxu0 %v1415_v36  ;;  %1314 = vmatmul.mubr.msk.bf16.vlgmr.msra.gmra.mrb[16].mxu1 %vm627_vm0, %v1416_v37 }
  0x47   : > { %748 = vmatprep.mubr.bf16.mxu0 %v1417_v38  ;;  %1317 = vmatprep.mubr.msk.bf16.mxu1 %vm627_vm0, %v1419_v39 }
  0x4e   : > { %749 = vmatmul.mubr.bf16.gmra.mrb[20].mxu0 %v1420_v40  ;;  %1318 = vmatmul.mubr.msk.bf16.gmra.mrb[20].mxu1 %vm627_vm0, %v1421_v41 }
  0x4f   : > { %756 = vmatprep.mubr.bf16.mxu0 %v1422_v42  ;;  %1321 = vmatprep.mubr.msk.bf16.mxu1 %vm627_vm0, %v1424_v43 }
  0x56   : > { %757 = vmatmul.mubr.bf16.gmra.mrb[24].mxu0 %v1425_v44  ;;  %1322 = vmatmul.mubr.msk.bf16.gmra.mrb[24].mxu1 %vm627_vm0, %v1426_v45 }
  0x57   : > { %764 = vmatprep.mubr.bf16.mxu0 %v1427_v46  ;;  %1325 = vmatprep.mubr.msk.bf16.mxu1 %vm627_vm0, %v1429_v47 }
  0x5e   : > { %765 = vmatmul.mubr.bf16.gmra.mrb[28].mxu0 %v1430_v48  ;;  %1326 = vmatmul.mubr.msk.bf16.gmra.mrb[28].mxu1 %vm627_vm0, %v1431_v49 }
  0x5f   : > { %772 = vmatprep.mubr.bf16.mxu0 %v1432_v50  ;;  %1329 = vmatprep.mubr.msk.bf16.mxu1 %vm627_vm0, %v1434_v51  ;;  %v1634_v50 = vld [vmem:[%s1724_s2] ss:$0 sm:$0xff] }
  0x66   : > { %773 = vmatmul.mubr.bf16.gmra.mrb[32].mxu0 %v1435_v52  ;;  %1330 = vmatmul.mubr.msk.bf16.gmra.mrb[32].mxu1 %vm627_vm0, %v1436_v53 }
  0x67   : > { %780 = vmatprep.mubr.bf16.mxu0 %v1437_v54  ;;  %1333 = vmatprep.mubr.msk.bf16.mxu1 %vm627_vm0, %v1439_v55 }
  0x6e   : > { %781 = vmatmul.mubr.bf16.gmra.mrb[36].mxu0 %v1440_v56  ;;  %1334 = vmatmul.mubr.msk.bf16.gmra.mrb[36].mxu1 %vm627_vm0, %v1441_v57 }
  0x6f   : > { %788 = vmatprep.mubr.bf16.mxu0 %v1442_v58  ;;  %1337 = vmatprep.mubr.msk.bf16.mxu1 %vm627_vm0, %v1444_v59 }
  0x76   : > { %789 = vmatmul.mubr.bf16.gmra.mrb[40].mxu0 %v1445_v60  ;;  %1338 = vmatmul.mubr.msk.bf16.gmra.mrb[40].mxu1 %vm627_vm0, %v1446_v61 }
  0x77   : > { %796 = vmatprep.mubr.bf16.mxu0 %v1447_v62  ;;  %1341 = vmatprep.mubr.msk.bf16.mxu1 %vm627_vm0, %v1449_v63 }
  0x7e   : > { %797 = vmatmul.mubr.bf16.gmra.mrb[44].mxu0 %v1450_v0  ;;  %1342 = vmatmul.mubr.msk.bf16.gmra.mrb[44].mxu1 %vm627_vm0, %v1451_v1 }
  0xf9   : > { %v1195_v2 = vpop.f32.mrb[0].mxu0  ;;  %v1267_v3 = vpop.f32.mrb[0].mxu1 }
  0xfa   : > { %v1196_v4 = vpop.f32.mrb[1].mxu0  ;;  %v1268_v5 = vpop.f32.mrb[1].mxu1 }
  0xfb   : > { %v1197_v6 = vadd.f32 %v1196_v4, %v1195_v2  ;;  %v1198_v7 = vpop.f32.mrb[2].mxu0  ;;  %v1614_v8 = vadd.f32 %v1268_v5, %v1267_v3  ;;  %v1270_v9 = vpop.f32.mrb[2].mxu1 }
  0xfc   : > { %v1199_v10 = vpop.f32.mrb[3].mxu0  ;;  %v1271_v11 = vpop.f32.mrb[3].mxu1 }
  0xfd   : > { %v1200_v12 = vadd.f32 %v1199_v10, %v1198_v7  ;;  %v1616_v13 = vadd.f32 %v1271_v11, %v1270_v9  ;;  %v711_v54 = vadd.f32 %v1197_v6, %v1634_v50 }
  0xff   : > { %v714_v63 = vadd.f32 %v1200_v12, %v1634_v50 }
 0x101   : > { %v1201_v14 = vpop.f32.mrb[4].mxu0  ;;  %v1273_v15 = vpop.f32.mrb[4].mxu1 }
 0x102   : > { %v1202_v16 = vpop.f32.mrb[5].mxu0  ;;  %v1274_v17 = vpop.f32.mrb[5].mxu1 }
 0x103   : > { %v1203_v18 = vadd.f32 %v1202_v16, %v1201_v14  ;;  %v1204_v19 = vpop.f32.mrb[6].mxu0  ;;  %v1618_v20 = vadd.f32 %v1274_v17, %v1273_v15  ;;  %v1276_v21 = vpop.f32.mrb[6].mxu1 }
 0x104   : > { %v1205_v22 = vpop.f32.mrb[7].mxu0  ;;  %v1277_v23 = vpop.f32.mrb[7].mxu1 }
 0x105   : > { %v1206_v24 = vadd.f32 %v1205_v22, %v1204_v19  ;;  %v1620_v25 = vadd.f32 %v1277_v23, %v1276_v21  ;;  %v719_v51 = vadd.f32 %v1203_v18, %v1634_v50 }
 0x107   : > { %v722_v58 = vadd.f32 %v1206_v24, %v1634_v50 }
 0x109   : > { %v1207_v26 = vpop.f32.mrb[8].mxu0  ;;  %v1279_v27 = vpop.f32.mrb[8].mxu1 }
 0x10a   : > { %v1208_v28 = vpop.f32.mrb[9].mxu0  ;;  %v1280_v29 = vpop.f32.mrb[9].mxu1 }
 0x10b   : > { %v1209_v30 = vadd.f32 %v1208_v28, %v1207_v26  ;;  %v1210_v31 = vpop.f32.mrb[10].mxu0  ;;  %v1622_v32 = vadd.f32 %v1280_v29, %v1279_v27  ;;  %v1282_v33 = vpop.f32.mrb[10].mxu1 }
 0x10c   : > { %v1211_v34 = vpop.f32.mrb[11].mxu0  ;;  %v1283_v35 = vpop.f32.mrb[11].mxu1 }
 0x10d   : > { %v1212_v36 = vadd.f32 %v1211_v34, %v1210_v31  ;;  %v1624_v37 = vadd.f32 %v1283_v35, %v1282_v33  ;;  %v727_v9 = vadd.f32 %v1209_v30, %v1634_v50 }
 0x10f   : > { %v730_v19 = vadd.f32 %v1212_v36, %v1634_v50 }
 0x111   : > { %v1213_v38 = vpop.f32.mrb[12].mxu0  ;;  %v1285_v39 = vpop.f32.mrb[12].mxu1 }
 0x112   : > { %v1214_v40 = vpop.f32.mrb[13].mxu0  ;;  %v1286_v41 = vpop.f32.mrb[13].mxu1 }
 0x113   : > { %v1215_v42 = vadd.f32 %v1214_v40, %v1213_v38  ;;  %v1216_v43 = vpop.f32.mrb[14].mxu0  ;;  %v1626_v44 = vadd.f32 %v1286_v41, %v1285_v39  ;;  %v1288_v45 = vpop.f32.mrb[14].mxu1 }
 0x114   : > { %v1217_v46 = vpop.f32.mrb[15].mxu0  ;;  %v1289_v47 = vpop.f32.mrb[15].mxu1 }
 0x115   : > { %v1218_v48 = vadd.f32 %v1217_v46, %v1216_v43  ;;  %v1628_v49 = vadd.f32 %v1289_v47, %v1288_v45  ;;  %v735_v5 = vadd.f32 %v1215_v42, %v1634_v50 }
 0x117   : > { %v738_v14 = vadd.f32 %v1218_v48, %v1634_v50 }
 0x119   : > { %v1219_v52 = vpop.f32.mrb[16].mxu0  ;;  %v1315_v53 = vpop.f32.mrb[16].mxu1 }
 0x11a   : > { %v880_v55 = vadd.f32 %v1315_v53, %v719_v51  ;;  %v1220_v56 = vpop.f32.mrb[17].mxu0  ;;  %v871_v57 = vpop.f32.mrb[17].mxu1 }
 0x11b   : > { %v1221_v59 = vadd.f32 %v1220_v56, %v1219_v52  ;;  %v872_v60 = vadd.f32 %v871_v57, %v711_v54  ;;  %v1222_v61 = vpop.f32.mrb[18].mxu0  ;;  %v1316_v62 = vpop.f32.mrb[18].mxu1 }
 0x11c   : > { %1000 = vst [vmem:[%s1640_s7 + $0x10] sm:$0xff] %v880_v55  ;;  %v883_v0 = vadd.f32 %v1316_v62, %v722_v58  ;;  %v1223_v1 = vpop.f32.mrb[19].mxu0  ;;  %v874_v2 = vpop.f32.mrb[19].mxu1 }
 0x11d   : > { %998 = vst [vmem:[%s1640_s7] sm:$0xff] %v872_v60  ;;  %v1224_v3 = vadd.f32 %v1223_v1, %v1222_v61  ;;  %v875_v4 = vadd.f32 %v874_v2, %v714_v63  ;;  %v743_v30 = vadd.f32 %v1221_v59, %v1634_v50 }
 0x11e   : > { %1001 = vst [vmem:[%s1640_s7 + $0x18] sm:$0xff] %v883_v0 }
 0x11f   : > { %999 = vst [vmem:[%s1640_s7 + $0x8] sm:$0xff] %v875_v4  ;;  %v746_v41 = vadd.f32 %v1224_v3, %v1634_v50 }
 0x121   : > { %v1225_v6 = vpop.f32.mrb[20].mxu0  ;;  %v1319_v7 = vpop.f32.mrb[20].mxu1 }
 0x122   : > { %v896_v10 = vadd.f32 %v1319_v7, %v735_v5  ;;  %v1226_v11 = vpop.f32.mrb[21].mxu0  ;;  %v887_v12 = vpop.f32.mrb[21].mxu1 }
 0x123   : > { %v1227_v15 = vadd.f32 %v1226_v11, %v1225_v6  ;;  %v888_v16 = vadd.f32 %v887_v12, %v727_v9  ;;  %v1228_v17 = vpop.f32.mrb[22].mxu0  ;;  %v1320_v18 = vpop.f32.mrb[22].mxu1 }
 0x124   : > { %1004 = vst [vmem:[%s1640_s7 + $0x30] sm:$0xff] %v896_v10  ;;  %v899_v21 = vadd.f32 %v1320_v18, %v738_v14  ;;  %v1229_v22 = vpop.f32.mrb[23].mxu0  ;;  %v890_v23 = vpop.f32.mrb[23].mxu1 }
 0x125   : > { %1002 = vst [vmem:[%s1640_s7 + $0x20] sm:$0xff] %v888_v16  ;;  %v1230_v24 = vadd.f32 %v1229_v22, %v1228_v17  ;;  %v891_v26 = vadd.f32 %v890_v23, %v730_v19  ;;  %v751_v27 = vadd.f32 %v1227_v15, %v1634_v50 }
 0x126   : > { %1005 = vst [vmem:[%s1640_s7 + $0x38] sm:$0xff] %v899_v21 }
 0x127   : > { %1003 = vst [vmem:[%s1640_s7 + $0x28] sm:$0xff] %v891_v26  ;;  %v754_v35 = vadd.f32 %v1230_v24, %v1634_v50 }
 0x129   : > { %v1231_v28 = vpop.f32.mrb[24].mxu0  ;;  %v1323_v29 = vpop.f32.mrb[24].mxu1 }
 0x12a   : > { %v912_v31 = vadd.f32 %v1323_v29, %v751_v27  ;;  %v1232_v33 = vpop.f32.mrb[25].mxu0  ;;  %v903_v34 = vpop.f32.mrb[25].mxu1 }
 0x12b   : > { %v1233_v36 = vadd.f32 %v1232_v33, %v1231_v28  ;;  %v904_v38 = vadd.f32 %v903_v34, %v743_v30  ;;  %v1234_v39 = vpop.f32.mrb[26].mxu0  ;;  %v1324_v40 = vpop.f32.mrb[26].mxu1 }
 0x12c   : > { %1008 = vst [vmem:[%s1640_s7 + $0x50] sm:$0xff] %v912_v31  ;;  %v915_v42 = vadd.f32 %v1324_v40, %v754_v35  ;;  %v1235_v43 = vpop.f32.mrb[27].mxu0  ;;  %v906_v45 = vpop.f32.mrb[27].mxu1 }
 0x12d   : > { %1006 = vst [vmem:[%s1640_s7 + $0x40] sm:$0xff] %v904_v38  ;;  %v1236_v46 = vadd.f32 %v1235_v43, %v1234_v39  ;;  %v907_v47 = vadd.f32 %v906_v45, %v746_v41  ;;  %v759_v52 = vadd.f32 %v1233_v36, %v1634_v50  ;;  %v815_v36 = vadd.f32 %v1618_v20, %v1634_v50 }
 0x12e   : > { %1009 = vst [vmem:[%s1640_s7 + $0x58] sm:$0xff] %v915_v42  ;;  %v807_v41 = vadd.f32 %v1614_v8, %v1634_v50 }
 0x12f   : > { %1007 = vst [vmem:[%s1640_s7 + $0x48] sm:$0xff] %v907_v47  ;;  %v762_v59 = vadd.f32 %v1236_v46, %v1634_v50  ;;  %v818_v46 = vadd.f32 %v1620_v25, %v1634_v50 }
 0x131   : > { %v1237_v48 = vpop.f32.mrb[28].mxu0  ;;  %v1327_v51 = vpop.f32.mrb[28].mxu1 }
 0x132   : > { %v1238_v53 = vpop.f32.mrb[29].mxu0  ;;  %v919_v54 = vpop.f32.mrb[29].mxu1 }
 0x133   : > { %v1239_v55 = vadd.f32 %v1238_v53, %v1237_v48  ;;  %v920_v56 = vadd.f32 %v919_v54, %v759_v52  ;;  %v1240_v57 = vpop.f32.mrb[30].mxu0  ;;  %v1328_v58 = vpop.f32.mrb[30].mxu1  ;;  %v810_v52 = vadd.f32 %v1616_v13, %v1634_v50 }
 0x134   : > { %v1241_v60 = vpop.f32.mrb[31].mxu0  ;;  %v922_v61 = vpop.f32.mrb[31].mxu1 }
 0x135   : > { %v767_v62 = vadd.f32 %v1239_v55, %v1634_v50  ;;  %1010 = vst [vmem:[%s1640_s7 + $0x60] sm:$0xff] %v920_v56  ;;  %v1242_v63 = vadd.f32 %v1241_v60, %v1240_v57  ;;  %v923_v0 = vadd.f32 %v922_v61, %v762_v59  ;;  %v831_v59 = vadd.f32 %v1626_v44, %v1634_v50 }
 0x137   : > { %v928_v1 = vadd.f32 %v1327_v51, %v767_v62  ;;  %v770_v2 = vadd.f32 %v1242_v63, %v1634_v50  ;;  %1011 = vst [vmem:[%s1640_s7 + $0x68] sm:$0xff] %v923_v0  ;;  %v823_v62 = vadd.f32 %v1622_v32, %v1634_v50 }
 0x139   : > { %1012 = vst [vmem:[%s1640_s7 + $0x70] sm:$0xff] %v928_v1  ;;  %v931_v3 = vadd.f32 %v1328_v58, %v770_v2  ;;  %v1243_v4 = vpop.f32.mrb[32].mxu0  ;;  %v1331_v5 = vpop.f32.mrb[32].mxu1  ;;  %v834_v2 = vadd.f32 %v1628_v49, %v1634_v50 }
 0x13a   : > { %v1244_v6 = vpop.f32.mrb[33].mxu0  ;;  %v935_v7 = vpop.f32.mrb[33].mxu1 }
 0x13b   : > { %1013 = vst [vmem:[%s1640_s7 + $0x78] sm:$0xff] %v931_v3  ;;  %v1245_v9 = vadd.f32 %v1244_v6, %v1243_v4  ;;  %v1246_v10 = vpop.f32.mrb[34].mxu0  ;;  %v1332_v11 = vpop.f32.mrb[34].mxu1  ;;  %v826_v6 = vadd.f32 %v1624_v37, %v1634_v50 }
 0x13c   : > { %v1247_v12 = vpop.f32.mrb[35].mxu0  ;;  %v938_v14 = vpop.f32.mrb[35].mxu1 }
 0x13d   : > { %v775_v15 = vadd.f32 %v1245_v9, %v1634_v50  ;;  %v1248_v16 = vadd.f32 %v1247_v12, %v1246_v10 }
 0x13f   : > { %v936_v17 = vadd.f32 %v935_v7, %v775_v15  ;;  %v778_v18 = vadd.f32 %v1248_v16, %v1634_v50 }
 0x141   : > { %1014 = vst [vmem:[%s1640_s7 + $0x80] sm:$0xff] %v936_v17  ;;  %v939_v19 = vadd.f32 %v938_v14, %v778_v18  ;;  %v1249_v21 = vpop.f32.mrb[36].mxu0  ;;  %v1676_v22 = vpop.f32.mrb[36].mxu1 }
 0x142   : > { %v1250_v23 = vpop.f32.mrb[37].mxu0  ;;  %v951_v24 = vpop.f32.mrb[37].mxu1 }
 0x143   : > { %1015 = vst [vmem:[%s1640_s7 + $0x88] sm:$0xff] %v939_v19  ;;  %v1251_v26 = vadd.f32 %v1250_v23, %v1249_v21  ;;  %v1252_v27 = vpop.f32.mrb[38].mxu0  ;;  %v1679_v28 = vpop.f32.mrb[38].mxu1 }
 0x144   : > { %v1253_v29 = vpop.f32.mrb[39].mxu0  ;;  %v954_v30 = vpop.f32.mrb[39].mxu1 }
 0x145   : > { %v783_v31 = vadd.f32 %v1251_v26, %v1634_v50  ;;  %v1254_v33 = vadd.f32 %v1253_v29, %v1252_v27 }
 0x147   : > { %v944_v34 = vadd.f32 %v1331_v5, %v783_v31  ;;  %v786_v35 = vadd.f32 %v1254_v33, %v1634_v50 }
 0x149   : > { %1016 = vst [vmem:[%s1640_s7 + $0x90] sm:$0xff] %v944_v34  ;;  %v947_v38 = vadd.f32 %v1332_v11, %v786_v35  ;;  %v1255_v39 = vpop.f32.mrb[40].mxu0  ;;  %v1339_v40 = vpop.f32.mrb[40].mxu1 }
 0x14a   : > { %v976_v42 = vadd.f32 %v1339_v40, %v815_v36  ;;  %v1256_v43 = vpop.f32.mrb[41].mxu0  ;;  %v967_v45 = vpop.f32.mrb[41].mxu1 }
 0x14b   : > { %1017 = vst [vmem:[%s1640_s7 + $0x98] sm:$0xff] %v947_v38  ;;  %v1257_v47 = vadd.f32 %v1256_v43, %v1255_v39  ;;  %v968_v20 = vadd.f32 %v967_v45, %v807_v41  ;;  %v1258_v48 = vpop.f32.mrb[42].mxu0  ;;  %v1340_v51 = vpop.f32.mrb[42].mxu1 }
 0x14c   : > { %1024 = vst [vmem:[%s1640_s7 + $0xd0] sm:$0xff] %v976_v42  ;;  %v979_v8 = vadd.f32 %v1340_v51, %v818_v46  ;;  %v1259_v53 = vpop.f32.mrb[43].mxu0  ;;  %v970_v54 = vpop.f32.mrb[43].mxu1 }
 0x14d   : > { %v791_v55 = vadd.f32 %v1257_v47, %v1634_v50  ;;  %1022 = vst [vmem:[%s1640_s7 + $0xc0] sm:$0xff] %v968_v20  ;;  %v1260_v56 = vadd.f32 %v1259_v53, %v1258_v48  ;;  %v971_v25 = vadd.f32 %v970_v54, %v810_v52 }
 0x14e   : > { %1025 = vst [vmem:[%s1640_s7 + $0xd8] sm:$0xff] %v979_v8 }
 0x14f   : > { %v952_v57 = vadd.f32 %v951_v24, %v791_v55  ;;  %v794_v58 = vadd.f32 %v1260_v56, %v1634_v50  ;;  %1023 = vst [vmem:[%s1640_s7 + $0xc8] sm:$0xff] %v971_v25 }
 0x151   : > { %1018 = vst [vmem:[%s1640_s7 + $0xa0] sm:$0xff] %v952_v57  ;;  %v955_v13 = vadd.f32 %v954_v30, %v794_v58  ;;  %v1261_v60 = vpop.f32.mrb[44].mxu0  ;;  %v1343_v61 = vpop.f32.mrb[44].mxu1 }
 0x152   : > { %v992_v63 = vadd.f32 %v1343_v61, %v831_v59  ;;  %v1262_v0 = vpop.f32.mrb[45].mxu0  ;;  %v983_v1 = vpop.f32.mrb[45].mxu1 }
 0x153   : > { %1019 = vst [vmem:[%s1640_s7 + $0xa8] sm:$0xff] %v955_v13  ;;  %v1263_v3 = vadd.f32 %v1262_v0, %v1261_v60  ;;  %v984_v44 = vadd.f32 %v983_v1, %v823_v62  ;;  %v1264_v4 = vpop.f32.mrb[46].mxu0  ;;  %v1344_v5 = vpop.f32.mrb[46].mxu1 }
 0x154   : > { %1028 = vst [vmem:[%s1640_s7 + $0xf0] sm:$0xff] %v992_v63  ;;  %v995_v32 = vadd.f32 %v1344_v5, %v834_v2  ;;  %v1265_v7 = vpop.f32.mrb[47].mxu0  ;;  %v986_v9 = vpop.f32.mrb[47].mxu1 }
 0x155   : > { %v799_v10 = vadd.f32 %v1263_v3, %v1634_v50  ;;  %1026 = vst [vmem:[%s1640_s7 + $0xe0] sm:$0xff] %v984_v44  ;;  %v1266_v11 = vadd.f32 %v1265_v7, %v1264_v4  ;;  %v987_v49 = vadd.f32 %v986_v9, %v826_v6 }
 0x156   : > { %1029 = vst [vmem:[%s1640_s7 + $0xf8] sm:$0xff] %v995_v32 }
 0x157   : > { %v960_v12 = vadd.f32 %v1676_v22, %v799_v10  ;;  %v802_v14 = vadd.f32 %v1266_v11, %v1634_v50  ;;  %1027 = vst [vmem:[%s1640_s7 + $0xe8] sm:$0xff] %v987_v49 }
 0x159   : > { %1020 = vst [vmem:[%s1640_s7 + $0xb0] sm:$0xff] %v960_v12  ;;  %v963_v15 = vadd.f32 %v1679_v28, %v802_v14 }
 0x15b   : > { %1021 = vst [vmem:[%s1640_s7 + $0xb8] sm:$0xff] %v963_v15 }
 0x15c PF: > { %s13_s12 = sadd.s32 1, %s1458_s12  }
 0x15d   : > { %p10_p4 = scmp.ge.s32.totalorder %s13_s12, 4  }
 0x15f   :  { %12 = sbr.rel (!%p10_p4) target bundleno = 1 (0x1), region = 62 }

</bundles_post_ra>
